<compile_context>
chip_gen: v7x
topology: tpu7x:2x2x1
jax: 0.10.0
libtpu: 0.0.40
codegen_flags: <defaults>
</compile_context>

<pallas_src>
import functools

import jax
import jax.numpy as jnp
import numpy as np
from jax.experimental import pallas as pl
from jax.experimental.pallas import tpu as pltpu


def _round_up(x, m):
    return -(-x // m) * m


def _cdiv(a, b):
    return -(-a // b)


def _tpu_config():
    """Returns (per-step input target bytes, TensorCores/chip, VMEM cap bytes)."""
    try:
        kind = jax.devices()[0].device_kind.lower()
    except Exception:
        kind = ""
    if "v7" in kind or "tpu7" in kind or "7x" in kind:
        # v7x: ~3.2 TB/s HBM per TC, 2 TCs, only 64 MiB VMEM per TC.
        return 8 * 1024 * 1024, 2, 40 * 1024 * 1024
    if "v6" in kind or "6e" in kind:
        # v6e: ~1.4 TB/s HBM, 1 TC, 128 MiB VMEM.
        return 4 * 1024 * 1024, 1, 64 * 1024 * 1024
    if "v5" in kind:
        # v5e: ~0.8 TB/s HBM, 1 TC, 128 MiB VMEM (16 MiB scoped default).
        return 2 * 1024 * 1024, 1, 48 * 1024 * 1024
    # Unknown generation: conservative settings that are safe everywhere.
    return 2 * 1024 * 1024, 1, 40 * 1024 * 1024


def _pick_tile(N, M, Fin, Fout, itemsize, target_bytes, num_cores, vmem_cap):
    """Pick a batch tile: ~target_bytes of input per grid step, within VMEM."""
    if N <= 8:
        return 8

    in_row = M * Fin * itemsize                        # streamed input per row
    io_row = (M * Fin + Fin + M) * itemsize            # emb tile + comb + alpha per row
    inter_row = M * (Fin + Fout) * 4                   # f32 intermediates per row
    weights_bytes = 2 * 4 * (Fin * Fout + Fout)        # (double-buffered) resident weights
    budget = vmem_cap - weights_bytes - (2 << 20)      # slack for compiler scratch
    max_tn = max(8, (budget // (2 * io_row + inter_row)) // 8 * 8)

    tn = target_bytes // max(1, in_row)
    tn = max(256, min(8192, tn))
    tn = min(tn, _round_up(N, 8), max_tn)
    tn = max(8, tn // 8 * 8)

    if num_cores > 1:
        # v7x: shard the 1-D "parallel" grid across both TensorCores — keep the
        # step count a multiple of num_cores (ideally >= 2 steps per core).
        steps = _cdiv(N, tn)
        want = _round_up(max(steps, 2 * num_cores), num_cores)
        cand = min(tn, max(8, _round_up(_cdiv(N, want), 8)))
        while cand > 8 and _cdiv(N, cand) % num_cores != 0:
            cand -= 8
        if _cdiv(N, cand) % num_cores == 0:
            tn = cand
    return tn


def attention_kernel(emb_ref, w_ref, u_ref, comb_ref, alpha_ref):
    """One grid step handles a tile of TN batch rows for all M modalities.

    emb_ref  : (M, TN, Fin)  stacked modality embeddings (VMEM tile)
    w_ref    : (Fin, Fout)   w_omega (full, resident)
    u_ref    : (Fout, 1)     u_omega (full, resident, f32)
    comb_ref : (TN, Fin)     fused output tile
    alpha_ref: (TN, M)       softmax attention weights tile
    """
    M, TN, Fin = emb_ref.shape

    # Single fused MXU call for all modalities (major-dim collapse, no relayout)
    # + one tanh stream on the EUP.
    e = emb_ref[...].reshape(M * TN, Fin)
    v = jnp.tanh(jnp.dot(e, w_ref[...], preferred_element_type=jnp.float32))

    # Per-row score <v_m, u> as a second tiny MXU dot (frees VALU/XLU slots).
    vu = jnp.dot(v, u_ref[...], preferred_element_type=jnp.float32)   # (M*TN, 1)
    scores = [vu[m * TN:(m + 1) * TN, :] for m in range(M)]           # static slices

    # Numerically stable softmax over the modality axis, kept as per-m columns
    # so the raw exp weights feed the fused sum directly (no lane slicing).
    s_max = scores[0]
    for m in range(1, M):
        s_max = jnp.maximum(s_max, scores[m])
    p = [jnp.exp(scores[m] - s_max) for m in range(M)]                 # M x (TN, 1)
    denom = p[0]
    for m in range(1, M):
        denom = denom + p[m]
    inv = pl.reciprocal(denom, approx=False)          # exact divide, (TN,1) is tiny

    # Un-normalized weighted sum; each modality slice is re-read from the VMEM
    # tile and up-cast per-slice (no full-tile f32 intermediate), normalized once.
    comb = p[0] * emb_ref[0].astype(jnp.float32)
    for m in range(1, M):
        comb = comb + p[m] * emb_ref[m].astype(jnp.float32)
    comb_ref[...] = (comb * inv).astype(comb_ref.dtype)
    alpha_ref[...] = (jnp.concatenate(p, axis=-1) * inv).astype(alpha_ref.dtype)


@functools.partial(jax.jit, static_argnames=("tn",))
def attention_layer(emb_stack, w_omega, u_omega, *, tn=None):
    """emb_stack: (M, N, Fin); w_omega: (Fin, Fout); u_omega: (Fout, 1).

    Returns (emb_combined (N, Fin), alpha (N, M)) — same math as the PyTorch
    AttentionLayer.forward.
    """
    M, N, Fin = emb_stack.shape
    Fout = w_omega.shape[1]
    itemsize = jnp.dtype(emb_stack.dtype).itemsize
    target_bytes, num_cores, vmem_cap = _tpu_config()

    if tn is None:
        tn = _pick_tile(N, M, Fin, Fout, itemsize, target_bytes, num_cores, vmem_cap)
    tn = max(8, _round_up(int(tn), 8))
    tn = min(tn, _round_up(N, 8))
    grid = pl.cdiv(N, tn)                 # ragged N -> Pallas partial last block

    # MXU projection in the input dtype (NOTE: this downcasts f32 params when
    # the embeddings are bf16 — standard mixed precision, slight deviation from
    # the PyTorch reference); scores / softmax / accumulation stay in f32.
    w_in = w_omega.astype(emb_stack.dtype)
    u_col = u_omega.astype(jnp.float32)   # (Fout, 1)

    cost = pl.CostEstimate(
        flops=int(2 * M * N * Fin * Fout + 2 * M * N * Fout
                  + 2 * M * N * Fin + 6 * M * N),
        transcendentals=int(M * N * Fout + M * N),        # tanh + exp
        bytes_accessed=int(itemsize * (M * N * Fin + N * Fin + N * M)
                           + 4 * (Fin * Fout + Fout)),
    )

    comb, alpha = pl.pallas_call(
        attention_kernel,
        out_shape=(
            jax.ShapeDtypeStruct((N, Fin), emb_stack.dtype),
            jax.ShapeDtypeStruct((N, M), emb_stack.dtype),
        ),
        grid_spec=pltpu.PrefetchScalarGridSpec(
            num_scalar_prefetch=0,
            grid=(grid,),
            in_specs=[
                pl.BlockSpec((M, tn, Fin), lambda i: (0, i, 0)),
                pl.BlockSpec((Fin, Fout), lambda i: (0, 0)),
                pl.BlockSpec((Fout, 1), lambda i: (0, 0)),
            ],
            out_specs=[
                pl.BlockSpec((tn, Fin), lambda i: (i, 0)),
                pl.BlockSpec((tn, M), lambda i: (i, 0)),
            ],
        ),
        compiler_params=pltpu.CompilerParams(
            dimension_semantics=("parallel",),
            vmem_limit_bytes=int(vmem_cap),
        ),
        cost_estimate=cost,
    )(emb_stack, w_in, u_col)
    return comb, alpha


def reference(emb_list, w_omega, u_omega):
    emb_tensor = jnp.stack(emb_list, axis=1)                       # (N, M, Fin)
    v = jnp.tanh(jnp.matmul(emb_tensor, w_omega))                  # (N, M, Fout)
    vu = jnp.matmul(v, u_omega)                                    # (N, M, 1)
    alpha = jax.nn.softmax(jnp.squeeze(vu, -1), axis=1)            # (N, M)
    emb_combined = jnp.sum(emb_tensor * alpha[..., None], axis=1)  # (N, Fin)
    return emb_combined, alpha


def xavier_uniform(key, shape):
    fan_in, fan_out = shape[0], shape[1]
    limit = float(np.sqrt(6.0 / (fan_in + fan_out)))
    return jax.random.uniform(key, shape, jnp.float32, -limit, limit)


if __name__ == "__main__":
    # M=3 modalities, in_feat=32, out_feat=16 (consistent with the module).
    M, in_feat, out_feat = 3, 32, 16
    key = jax.random.PRNGKey(0)
    kw, ku, *kx = jax.random.split(key, 2 + M)

    w_omega = xavier_uniform(kw, (in_feat, out_feat))
    u_omega = xavier_uniform(ku, (out_feat, 1))

    # Case 1: N divisible by 8, auto-picked tile.
    N = 256
    emb_list = [jax.random.normal(k, (N, in_feat), jnp.float32) for k in kx]
    emb_stack = jnp.stack(emb_list, axis=0)                        # (M, N, Fin)

    comb, alpha = attention_layer(emb_stack, w_omega, u_omega)
    jax.block_until_ready((comb, alpha))
    comb_ref, alpha_ref = reference(emb_list, w_omega, u_omega)
    assert np.allclose(np.asarray(comb), np.asarray(comb_ref), atol=1e-4, rtol=1e-4)
    assert np.allclose(np.asarray(alpha), np.asarray(alpha_ref), atol=1e-4, rtol=1e-4)

    # Case 2: explicit small tile -> multi-step pipelined grid.
    comb_t, alpha_t = attention_layer(emb_stack, w_omega, u_omega, tn=64)
    jax.block_until_ready((comb_t, alpha_t))
    assert np.allclose(np.asarray(comb_t), np.asarray(comb_ref), atol=1e-4, rtol=1e-4)
    assert np.allclose(np.asarray(alpha_t), np.asarray(alpha_ref), atol=1e-4, rtol=1e-4)

    # Case 3: ragged N (partial last block handled in the kernel pipeline,
    # no wrapper-side pad or output slice copies).
    N2 = 100
    emb_list2 = [jax.random.normal(k, (N2, in_feat), jnp.float32)
                 for k in jax.random.split(jax.random.PRNGKey(1), M)]
    emb_stack2 = jnp.stack(emb_list2, axis=0)
    comb2, alpha2 = attention_layer(emb_stack2, w_omega, u_omega)
    jax.block_until_ready((comb2, alpha2))
    comb2_ref, alpha2_ref = reference(emb_list2, w_omega, u_omega)
    assert comb2.shape == (N2, in_feat) and alpha2.shape == (N2, M)
    assert np.allclose(np.asarray(comb2), np.asarray(comb2_ref), atol=1e-4, rtol=1e-4)
    assert np.allclose(np.asarray(alpha2), np.asarray(alpha2_ref), atol=1e-4, rtol=1e-4)

    print("KERNEL_OK")
</pallas_src>

<mosaic_0001>
module attributes {stable_mosaic.version = 11 : i64} {
  func.func @attention_kernel(%arg0: i32, %arg1: memref<3x256x32xf32, #tpu.memory_space<vmem>>, %arg2: memref<32x16xf32, #tpu.memory_space<vmem>>, %arg3: memref<16x1xf32, #tpu.memory_space<vmem>>, %arg4: memref<256x32xf32, #tpu.memory_space<vmem>>, %arg5: memref<256x3xf32, #tpu.memory_space<vmem>>) attributes {dimension_semantics = [#tpu.dimension_semantics<parallel>], iteration_bounds = array<i64: 1>, scalar_prefetch = 0 : i64, scratch_operands = 0 : i64, tpu.core_type = #tpu.core_type<tc>, window_params = [{transform_indices = @transform_0, window_bounds = array<i64: 3, 256, 32>}, {pipeline_mode = #tpu.pipeline_mode<synchronous>, transform_indices = @transform_1, window_bounds = array<i64: 32, 16>}, {pipeline_mode = #tpu.pipeline_mode<synchronous>, transform_indices = @transform_2, window_bounds = array<i64: 16, 1>}, {transform_indices = @transform_3, window_bounds = array<i64: 256, 32>}, {transform_indices = @transform_4, window_bounds = array<i64: 256, 3>}]} {
    %c0 = arith.constant 0 : index
    %c0_0 = arith.constant 0 : index
    %c0_1 = arith.constant 0 : index
    %0 = vector.load %arg1[%c0, %c0_0, %c0_1] : memref<3x256x32xf32, #tpu.memory_space<vmem>>, vector<3x256x32xf32>
    %1 = vector.shape_cast %0 : vector<3x256x32xf32> to vector<768x32xf32>
    %c0_2 = arith.constant 0 : index
    %c0_3 = arith.constant 0 : index
    %2 = vector.load %arg2[%c0_2, %c0_3] : memref<32x16xf32, #tpu.memory_space<vmem>>, vector<32x16xf32>
    %cst = arith.constant dense<0.000000e+00> : vector<768x16xf32>
    %3 = tpu.matmul %1, %2, %cst {dimension_numbers = #tpu.dot_dimension_numbers<[1], [0], [0], [1], [0, 0, 1, 1], [], []>} : vector<768x32xf32>, vector<32x16xf32>, vector<768x16xf32> -> vector<768x16xf32>
    %4 = math.tanh %3 : vector<768x16xf32>
    %c0_4 = arith.constant 0 : index
    %c0_5 = arith.constant 0 : index
    %5 = vector.load %arg3[%c0_4, %c0_5] : memref<16x1xf32, #tpu.memory_space<vmem>>, vector<16x1xf32>
    %cst_6 = arith.constant dense<0.000000e+00> : vector<768x1xf32>
    %6 = tpu.matmul %4, %5, %cst_6 {dimension_numbers = #tpu.dot_dimension_numbers<[1], [0], [0], [1], [0, 0, 1, 1], [], []>} : vector<768x16xf32>, vector<16x1xf32>, vector<768x1xf32> -> vector<768x1xf32>
    %7 = vector.extract_strided_slice %6 {offsets = [0, 0], sizes = [256, 1], strides = [1, 1]} : vector<768x1xf32> to vector<256x1xf32>
    %8 = vector.extract_strided_slice %6 {offsets = [256, 0], sizes = [256, 1], strides = [1, 1]} : vector<768x1xf32> to vector<256x1xf32>
    %9 = vector.extract_strided_slice %6 {offsets = [512, 0], sizes = [256, 1], strides = [1, 1]} : vector<768x1xf32> to vector<256x1xf32>
    %10 = arith.maximumf %7, %8 : vector<256x1xf32>
    %11 = arith.maximumf %10, %9 : vector<256x1xf32>
    %12 = arith.subf %7, %11 : vector<256x1xf32>
    %13 = math.exp %12 : vector<256x1xf32>
    %14 = arith.subf %8, %11 : vector<256x1xf32>
    %15 = math.exp %14 : vector<256x1xf32>
    %16 = arith.subf %9, %11 : vector<256x1xf32>
    %17 = math.exp %16 : vector<256x1xf32>
    %18 = arith.addf %13, %15 : vector<256x1xf32>
    %19 = arith.addf %18, %17 : vector<256x1xf32>
    %20 = tpu.reciprocal %19 : vector<256x1xf32> -> vector<256x1xf32>
    %c0_7 = arith.constant 0 : index
    %c0_8 = arith.constant 0 : index
    %c0_9 = arith.constant 0 : index
    %21 = vector.load %arg1[%c0_7, %c0_8, %c0_9] : memref<3x256x32xf32, #tpu.memory_space<vmem>>, vector<1x256x32xf32>
    %22 = vector.shape_cast %21 : vector<1x256x32xf32> to vector<256x32xf32>
    %23 = vector.broadcast %13 : vector<256x1xf32> to vector<256x32xf32>
    %24 = arith.mulf %23, %22 : vector<256x32xf32>
    %c1 = arith.constant 1 : index
    %c0_10 = arith.constant 0 : index
    %c0_11 = arith.constant 0 : index
    %25 = vector.load %arg1[%c1, %c0_10, %c0_11] : memref<3x256x32xf32, #tpu.memory_space<vmem>>, vector<1x256x32xf32>
    %26 = vector.shape_cast %25 : vector<1x256x32xf32> to vector<256x32xf32>
    %27 = vector.broadcast %15 : vector<256x1xf32> to vector<256x32xf32>
    %28 = arith.mulf %27, %26 : vector<256x32xf32>
    %29 = arith.addf %24, %28 : vector<256x32xf32>
    %c2 = arith.constant 2 : index
    %c0_12 = arith.constant 0 : index
    %c0_13 = arith.constant 0 : index
    %30 = vector.load %arg1[%c2, %c0_12, %c0_13] : memref<3x256x32xf32, #tpu.memory_space<vmem>>, vector<1x256x32xf32>
    %31 = vector.shape_cast %30 : vector<1x256x32xf32> to vector<256x32xf32>
    %32 = vector.broadcast %17 : vector<256x1xf32> to vector<256x32xf32>
    %33 = arith.mulf %32, %31 : vector<256x32xf32>
    %34 = arith.addf %29, %33 : vector<256x32xf32>
    %35 = vector.broadcast %20 : vector<256x1xf32> to vector<256x32xf32>
    %36 = arith.mulf %34, %35 : vector<256x32xf32>
    %c0_14 = arith.constant 0 : index
    %c0_15 = arith.constant 0 : index
    %37 = vector.load %arg4[%c0_14, %c0_15] : memref<256x32xf32, #tpu.memory_space<vmem>>, vector<256x32xf32>
    tpu.vector_store %arg4[%c0_14, %c0_15], %36 {strides = array<i32>} : memref<256x32xf32, #tpu.memory_space<vmem>>, vector<256x32xf32>,
    %38 = tpu.concatenate %13, %15, %17 in 1 : vector<256x1xf32>, vector<256x1xf32>, vector<256x1xf32> -> vector<256x3xf32>
    %39 = vector.broadcast %20 : vector<256x1xf32> to vector<256x3xf32>
    %40 = arith.mulf %38, %39 : vector<256x3xf32>
    %c0_16 = arith.constant 0 : index
    %c0_17 = arith.constant 0 : index
    %41 = vector.load %arg5[%c0_16, %c0_17] : memref<256x3xf32, #tpu.memory_space<vmem>>, vector<256x3xf32>
    tpu.vector_store %arg5[%c0_16, %c0_17], %40 {strides = array<i32>} : memref<256x3xf32, #tpu.memory_space<vmem>>, vector<256x3xf32>,
    return
  }
  func.func @transform_0(%arg0: i32) -> (i32, i32, i32) {
    %c0_i32 = arith.constant 0 : i32
    %c0_i32_0 = arith.constant 0 : i32
    %c0_i32_1 = arith.constant 0 : i32
    return %c0_i32, %arg0, %c0_i32_0 : i32, i32, i32
  }
  func.func @transform_1(%arg0: i32) -> (i32, i32) {
    %c0_i32 = arith.constant 0 : i32
    %c0_i32_0 = arith.constant 0 : i32
    %c0_i32_1 = arith.constant 0 : i32
    return %c0_i32, %c0_i32_0 : i32, i32
  }
  func.func @transform_2(%arg0: i32) -> (i32, i32) {
    %c0_i32 = arith.constant 0 : i32
    %c0_i32_0 = arith.constant 0 : i32
    %c0_i32_1 = arith.constant 0 : i32
    return %c0_i32, %c0_i32_0 : i32, i32
  }
  func.func @transform_3(%arg0: i32) -> (i32, i32) {
    %c0_i32 = arith.constant 0 : i32
    %c0_i32_0 = arith.constant 0 : i32
    return %arg0, %c0_i32 : i32, i32
  }
  func.func @transform_4(%arg0: i32) -> (i32, i32) {
    %c0_i32 = arith.constant 0 : i32
    %c0_i32_0 = arith.constant 0 : i32
    return %arg0, %c0_i32 : i32, i32
  }
}

</mosaic_0001>

<bundles_post_ra>
// kernel: attention_layer.1
= control target key start
LH: loop header
LB: loop body
LE: loop exit
PB: predicated region body
PF: predicated region fallthrough
CT: control target
= control target key end

     0   :  { %vm116_vm0 = vcmask 261120   ;;  %vm1048_vm1 = vcmask 130048   ;;  %s4843_s26 = smov 1   ;;  %s4844_s27 = smov 2   ;;  %vm3484_vm2 = vcmask 7168   ;;  %vm3517_vm3 = vcmask 15360   ;;  %s7794_s1 = inlined_call_operand.vmem [shape: f32[32,16], index: 1, kind: input, shape index: {}]   ;;  %s7795_s0 = inlined_call_operand.vmem [shape: f32[3,256,32], index: 0, kind: input, shape index: {}]   ;;  %s7796_s2 = inlined_call_operand.vmem [shape: f32[16,1], index: 2, kind: input, shape index: {}]   ;;  %s7797_s3 = inlined_call_operand.vmem [shape: f32[256,32], index: 3, kind: output, shape index: {0}]   ;;  %s7798_s4 = inlined_call_operand.vmem [shape: f32[256,3], index: 4, kind: output, shape index: {1}]  }
   0x1   :  { %v112_v0 = vld [vmem:[%s7794_s1] sm:$0xff]  ;;  %v113_v1 = vld [vmem:[%s7794_s1 + $0x8] sm:$0xff]  ;;  %v114_v2 = vld [vmem:[%s7794_s1 + $0x10] sm:$0xff]  ;;  %vm3582_vm4 = vcmask 23552  }
   0x2   :  { %v4377_v3 = vpack.c.bf16 %v113_v1, %v112_v0  ;;  %v115_v4 = vld [vmem:[%s7794_s1 + $0x18] sm:$0xff]  ;;  %v16_v5 = vld [vmem:[%s7795_s0] sm:$0xff]  ;;  %v17_v7 = vld [vmem:[%s7795_s0 + $0x8] sm:$0xff] }
   0x3   :  { %v4381_v6 = vpack.c.bf16 %v115_v4, %v114_v2  ;;  %4085 = vmatprep.mubr.msk.f32.mxu0 %vm116_vm0, %v16_v5  ;;  %v18_v8 = vld [vmem:[%s7795_s0 + $0x10] sm:$0xff]  ;;  %v19_v9 = vld [vmem:[%s7795_s0 + $0x18] sm:$0xff]  ;;  %v20_v10 = vld [vmem:[%s7795_s0 + $0x20] sm:$0xff] }
   0x4   :  { %4378 = vmatprep.subr.bf16.mxu0 %v4377_v3  ;;  %v21_v11 = vld [vmem:[%s7795_s0 + $0x28] sm:$0xff]  ;;  %v22_v12 = vld [vmem:[%s7795_s0 + $0x30] sm:$0xff]  ;;  %v23_v13 = vld [vmem:[%s7795_s0 + $0x38] sm:$0xff] }
   0x5   :  { %4380 = vmatpush3.bf16.msra.mxu0 %v4377_v3  ;;  %v24_v14 = vld [vmem:[%s7795_s0 + $0x40] sm:$0xff]  ;;  %v25_v15 = vld [vmem:[%s7795_s0 + $0x48] sm:$0xff]  ;;  %v26_v16 = vld [vmem:[%s7795_s0 + $0x50] sm:$0xff] }
   0x6   :  { %4382 = vmatprep.subr.bf16.mxu0 %v4381_v6  ;;  %v27_v17 = vld [vmem:[%s7795_s0 + $0x58] sm:$0xff]  ;;  %v28_v18 = vld [vmem:[%s7795_s0 + $0x60] sm:$0xff]  ;;  %v29_v19 = vld [vmem:[%s7795_s0 + $0x68] sm:$0xff] }
   0x7   :  { %v30_v20 = vld [vmem:[%s7795_s0 + $0x70] sm:$0xff]  ;;  %v31_v21 = vld [vmem:[%s7795_s0 + $0x78] sm:$0xff]  ;;  %v32_v22 = vld [vmem:[%s7795_s0 + $0x80] sm:$0xff] }
   0x8   :  { %v33_v23 = vld [vmem:[%s7795_s0 + $0x88] sm:$0xff]  ;;  %v34_v24 = vld [vmem:[%s7795_s0 + $0x90] sm:$0xff]  ;;  %v35_v25 = vld [vmem:[%s7795_s0 + $0x98] sm:$0xff] }
   0x9   :  { %4384 = vmatpush3.bf16.msra.mxu0 %v4381_v6  ;;  %v36_v26 = vld [vmem:[%s7795_s0 + $0xa0] sm:$0xff]  ;;  %v37_v27 = vld [vmem:[%s7795_s0 + $0xa8] sm:$0xff]  ;;  %v38_v28 = vld [vmem:[%s7795_s0 + $0xb0] sm:$0xff] }
   0xa   :  { %v39_v29 = vld [vmem:[%s7795_s0 + $0xb8] sm:$0xff]  ;;  %v40_v30 = vld [vmem:[%s7795_s0 + $0xc0] sm:$0xff]  ;;  %v41_v31 = vld [vmem:[%s7795_s0 + $0xc8] sm:$0xff] }
   0xb   :  { %v42_v32 = vld [vmem:[%s7795_s0 + $0xd0] sm:$0xff]  ;;  %v43_v33 = vld [vmem:[%s7795_s0 + $0xd8] sm:$0xff]  ;;  %v44_v34 = vld [vmem:[%s7795_s0 + $0xe0] sm:$0xff] }
   0xc   :  { %4086 = vmatmul.mubr.msk.f32.vlgmr.msra.gmra.mrb[0].mxu0 %vm116_vm0, %v17_v7  ;;  %v45_v35 = vld [vmem:[%s7795_s0 + $0xe8] sm:$0xff]  ;;  %v46_v36 = vld [vmem:[%s7795_s0 + $0xf0] sm:$0xff]  ;;  %v47_v37 = vld [vmem:[%s7795_s0 + $0xf8] sm:$0xff] }
   0xd   :  { %4088 = vmatprep.mubr.msk.f32.mxu0 %vm116_vm0, %v18_v8  ;;  %v48_v38 = vld [vmem:[%s7795_s0 + $0x100] sm:$0xff]  ;;  %v49_v39 = vld [vmem:[%s7795_s0 + $0x108] sm:$0xff]  ;;  %v50_v40 = vld [vmem:[%s7795_s0 + $0x110] sm:$0xff] }
   0xe   :  { %v51_v41 = vld [vmem:[%s7795_s0 + $0x118] sm:$0xff]  ;;  %v52_v42 = vld [vmem:[%s7795_s0 + $0x120] sm:$0xff]  ;;  %v53_v43 = vld [vmem:[%s7795_s0 + $0x128] sm:$0xff] }
   0xf   :  { %v54_v44 = vld [vmem:[%s7795_s0 + $0x130] sm:$0xff]  ;;  %v55_v45 = vld [vmem:[%s7795_s0 + $0x138] sm:$0xff]  ;;  %v56_v46 = vld [vmem:[%s7795_s0 + $0x140] sm:$0xff] }
  0x10   :  { %4089 = vmatmul.mubr.msk.f32.gmra.mrb[2].mxu0 %vm116_vm0, %v19_v9  ;;  %v57_v47 = vld [vmem:[%s7795_s0 + $0x148] sm:$0xff]  ;;  %v58_v48 = vld [vmem:[%s7795_s0 + $0x150] sm:$0xff]  ;;  %v59_v49 = vld [vmem:[%s7795_s0 + $0x158] sm:$0xff] }
  0x11   :  { %4091 = vmatprep.mubr.msk.f32.mxu0 %vm116_vm0, %v20_v10  ;;  %v60_v50 = vld [vmem:[%s7795_s0 + $0x160] sm:$0xff]  ;;  %v61_v51 = vld [vmem:[%s7795_s0 + $0x168] sm:$0xff]  ;;  %v62_v52 = vld [vmem:[%s7795_s0 + $0x170] sm:$0xff] }
  0x12   :  { %v63_v53 = vld [vmem:[%s7795_s0 + $0x178] sm:$0xff]  ;;  %v64_v54 = vld [vmem:[%s7795_s0 + $0x180] sm:$0xff]  ;;  %v1047_v56 = vld [vmem:[%s7796_s2 + $0x8] sm:$0xff] }
  0x13   :  { %v1046_v55 = vld [vmem:[%s7796_s2] sm:$0xff]  ;;  %v65_v58 = vld [vmem:[%s7795_s0 + $0x188] sm:$0xff]  ;;  %v66_v59 = vld [vmem:[%s7795_s0 + $0x190] sm:$0xff] }
  0x14   :  { %4092 = vmatmul.mubr.msk.f32.gmra.mrb[4].mxu0 %vm116_vm0, %v21_v11  ;;  %v4385_v57 = vpack.c.bf16 %v1047_v56, %v1046_v55  ;;  %v67_v60 = vld [vmem:[%s7795_s0 + $0x198] sm:$0xff]  ;;  %v68_v61 = vld [vmem:[%s7795_s0 + $0x1a0] sm:$0xff]  ;;  %v69_v62 = vld [vmem:[%s7795_s0 + $0x1a8] sm:$0xff] }
  0x15   :  { %4094 = vmatprep.mubr.msk.f32.mxu0 %vm116_vm0, %v22_v12  ;;  %v70_v63 = vld [vmem:[%s7795_s0 + $0x1b0] sm:$0xff]  ;;  %v71_v0 = vld [vmem:[%s7795_s0 + $0x1b8] sm:$0xff]  ;;  %v72_v1 = vld [vmem:[%s7795_s0 + $0x1c0] sm:$0xff] }
  0x16   :  { %4386 = vmatprep.subr.bf16.mxu1 %v4385_v57  ;;  %v73_v2 = vld [vmem:[%s7795_s0 + $0x1c8] sm:$0xff]  ;;  %v74_v3 = vld [vmem:[%s7795_s0 + $0x1d0] sm:$0xff]  ;;  %v75_v4 = vld [vmem:[%s7795_s0 + $0x1d8] sm:$0xff] }
  0x17   :  { %4388 = vmatpush3.bf16.msra.mxu1 %v4385_v57  ;;  %v76_v5 = vld [vmem:[%s7795_s0 + $0x1e0] sm:$0xff]  ;;  %v77_v6 = vld [vmem:[%s7795_s0 + $0x1e8] sm:$0xff]  ;;  %v78_v7 = vld [vmem:[%s7795_s0 + $0x1f0] sm:$0xff] }
  0x18   :  { %4095 = vmatmul.mubr.msk.f32.gmra.mrb[6].mxu0 %vm116_vm0, %v23_v13  ;;  %v79_v8 = vld [vmem:[%s7795_s0 + $0x1f8] sm:$0xff]  ;;  %v80_v9 = vld [vmem:[%s7795_s0 + $0x200] sm:$0xff]  ;;  %v81_v10 = vld [vmem:[%s7795_s0 + $0x208] sm:$0xff] }
  0x19   :  { %4097 = vmatprep.mubr.msk.f32.mxu0 %vm116_vm0, %v24_v14  ;;  %v82_v11 = vld [vmem:[%s7795_s0 + $0x210] sm:$0xff]  ;;  %v83_v12 = vld [vmem:[%s7795_s0 + $0x218] sm:$0xff]  ;;  %v84_v13 = vld [vmem:[%s7795_s0 + $0x220] sm:$0xff] }
  0x1a   :  { %v85_v14 = vld [vmem:[%s7795_s0 + $0x228] sm:$0xff] }
  0x1c   :  { %4098 = vmatmul.mubr.msk.f32.gmra.mrb[8].mxu0 %vm116_vm0, %v25_v15  ;;  %v86_v15 = vld [vmem:[%s7795_s0 + $0x230] sm:$0xff] }
  0x1d   :  { %4100 = vmatprep.mubr.msk.f32.mxu0 %vm116_vm0, %v26_v16  ;;  %v87_v16 = vld [vmem:[%s7795_s0 + $0x238] sm:$0xff] }
  0x20   :  { %4101 = vmatmul.mubr.msk.f32.gmra.mrb[10].mxu0 %vm116_vm0, %v27_v17  ;;  %v88_v17 = vld [vmem:[%s7795_s0 + $0x240] sm:$0xff] }
  0x21   :  { %4103 = vmatprep.mubr.msk.f32.mxu0 %vm116_vm0, %v28_v18  ;;  %v89_v18 = vld [vmem:[%s7795_s0 + $0x248] sm:$0xff] }
  0x24   :  { %4104 = vmatmul.mubr.msk.f32.gmra.mrb[12].mxu0 %vm116_vm0, %v29_v19  ;;  %v90_v19 = vld [vmem:[%s7795_s0 + $0x250] sm:$0xff] }
  0x25   :  { %4106 = vmatprep.mubr.msk.f32.mxu0 %vm116_vm0, %v30_v20  ;;  %v91_v20 = vld [vmem:[%s7795_s0 + $0x258] sm:$0xff] }
  0x28   :  { %4107 = vmatmul.mubr.msk.f32.gmra.mrb[14].mxu0 %vm116_vm0, %v31_v21  ;;  %v92_v21 = vld [vmem:[%s7795_s0 + $0x260] sm:$0xff] }
  0x29   :  { %4109 = vmatprep.mubr.msk.f32.mxu0 %vm116_vm0, %v32_v22  ;;  %v93_v22 = vld [vmem:[%s7795_s0 + $0x268] sm:$0xff] }
  0x2c   :  { %4110 = vmatmul.mubr.msk.f32.gmra.mrb[16].mxu0 %vm116_vm0, %v33_v23  ;;  %v94_v23 = vld [vmem:[%s7795_s0 + $0x270] sm:$0xff] }
  0x2d   :  { %4112 = vmatprep.mubr.msk.f32.mxu0 %vm116_vm0, %v34_v24  ;;  %v95_v24 = vld [vmem:[%s7795_s0 + $0x278] sm:$0xff] }
  0x30   :  { %4113 = vmatmul.mubr.msk.f32.gmra.mrb[18].mxu0 %vm116_vm0, %v35_v25  ;;  %v96_v25 = vld [vmem:[%s7795_s0 + $0x280] sm:$0xff] }
  0x31   :  { %4115 = vmatprep.mubr.msk.f32.mxu0 %vm116_vm0, %v36_v26  ;;  %v97_v26 = vld [vmem:[%s7795_s0 + $0x288] sm:$0xff] }
  0x34   :  { %4116 = vmatmul.mubr.msk.f32.gmra.mrb[20].mxu0 %vm116_vm0, %v37_v27  ;;  %v98_v27 = vld [vmem:[%s7795_s0 + $0x290] sm:$0xff] }
  0x35   :  { %4118 = vmatprep.mubr.msk.f32.mxu0 %vm116_vm0, %v38_v28  ;;  %v99_v28 = vld [vmem:[%s7795_s0 + $0x298] sm:$0xff] }
  0x38   :  { %4119 = vmatmul.mubr.msk.f32.gmra.mrb[22].mxu0 %vm116_vm0, %v39_v29  ;;  %v100_v29 = vld [vmem:[%s7795_s0 + $0x2a0] sm:$0xff] }
  0x39   :  { %4121 = vmatprep.mubr.msk.f32.mxu0 %vm116_vm0, %v40_v30  ;;  %v101_v30 = vld [vmem:[%s7795_s0 + $0x2a8] sm:$0xff] }
  0x3c   :  { %4122 = vmatmul.mubr.msk.f32.gmra.mrb[24].mxu0 %vm116_vm0, %v41_v31  ;;  %v102_v31 = vld [vmem:[%s7795_s0 + $0x2b0] sm:$0xff] }
  0x3d   :  { %4124 = vmatprep.mubr.msk.f32.mxu0 %vm116_vm0, %v42_v32  ;;  %v103_v32 = vld [vmem:[%s7795_s0 + $0x2b8] sm:$0xff] }
  0x40   :  { %4125 = vmatmul.mubr.msk.f32.gmra.mrb[26].mxu0 %vm116_vm0, %v43_v33  ;;  %v104_v33 = vld [vmem:[%s7795_s0 + $0x2c0] sm:$0xff] }
  0x41   :  { %4127 = vmatprep.mubr.msk.f32.mxu0 %vm116_vm0, %v44_v34  ;;  %v105_v34 = vld [vmem:[%s7795_s0 + $0x2c8] sm:$0xff] }
  0x44   :  { %4128 = vmatmul.mubr.msk.f32.gmra.mrb[28].mxu0 %vm116_vm0, %v45_v35  ;;  %v106_v35 = vld [vmem:[%s7795_s0 + $0x2d0] sm:$0xff] }
  0x45   :  { %4130 = vmatprep.mubr.msk.f32.mxu0 %vm116_vm0, %v46_v36  ;;  %v107_v36 = vld [vmem:[%s7795_s0 + $0x2d8] sm:$0xff] }
  0x48   :  { %4131 = vmatmul.mubr.msk.f32.gmra.mrb[30].mxu0 %vm116_vm0, %v47_v37  ;;  %v108_v37 = vld [vmem:[%s7795_s0 + $0x2e0] sm:$0xff] }
  0x49   :  { %4133 = vmatprep.mubr.msk.f32.mxu0 %vm116_vm0, %v48_v38  ;;  %v109_v38 = vld [vmem:[%s7795_s0 + $0x2e8] sm:$0xff] }
  0x4c   :  { %4134 = vmatmul.mubr.msk.f32.gmra.mrb[32].mxu0 %vm116_vm0, %v49_v39  ;;  %v110_v39 = vld [vmem:[%s7795_s0 + $0x2f0] sm:$0xff] }
  0x4d   :  { %4136 = vmatprep.mubr.msk.f32.mxu0 %vm116_vm0, %v50_v40  ;;  %v111_v40 = vld [vmem:[%s7795_s0 + $0x2f8] sm:$0xff] }
  0x50   :  { %4137 = vmatmul.mubr.msk.f32.gmra.mrb[34].mxu0 %vm116_vm0, %v51_v41 }
  0x51   :  { %4139 = vmatprep.mubr.msk.f32.mxu0 %vm116_vm0, %v52_v42 }
  0x54   :  { %4140 = vmatmul.mubr.msk.f32.gmra.mrb[36].mxu0 %vm116_vm0, %v53_v43 }
  0x55   :  { %4142 = vmatprep.mubr.msk.f32.mxu0 %vm116_vm0, %v54_v44 }
  0x58   :  { %4143 = vmatmul.mubr.msk.f32.gmra.mrb[38].mxu0 %vm116_vm0, %v55_v45 }
  0x59   :  { %4145 = vmatprep.mubr.msk.f32.mxu0 %vm116_vm0, %v56_v46 }
  0x5c   :  { %4146 = vmatmul.mubr.msk.f32.gmra.mrb[40].mxu0 %vm116_vm0, %v57_v47 }
  0x5d   :  { %4148 = vmatprep.mubr.msk.f32.mxu0 %vm116_vm0, %v58_v48 }
  0x60   :  { %4149 = vmatmul.mubr.msk.f32.gmra.mrb[42].mxu0 %vm116_vm0, %v59_v49 }
  0x61   :  { %4151 = vmatprep.mubr.msk.f32.mxu0 %vm116_vm0, %v60_v50 }
  0x64   :  { %4152 = vmatmul.mubr.msk.f32.gmra.mrb[44].mxu0 %vm116_vm0, %v61_v51 }
  0x65   :  { %4154 = vmatprep.mubr.msk.f32.mxu0 %vm116_vm0, %v62_v52 }
  0x68   :  { %4155 = vmatmul.mubr.msk.f32.gmra.mrb[46].mxu0 %vm116_vm0, %v63_v53 }
  0x69   :  { %4157 = vmatprep.mubr.msk.f32.mxu0 %vm116_vm0, %v64_v54 }
  0x6c   :  { %4158 = vmatmul.mubr.msk.f32.gmra.mrb[48].mxu0 %vm116_vm0, %v65_v58 }
  0x6d   :  { %4160 = vmatprep.mubr.msk.f32.mxu0 %vm116_vm0, %v66_v59 }
  0x70   :  { %4161 = vmatmul.mubr.msk.f32.gmra.mrb[50].mxu0 %vm116_vm0, %v67_v60 }
  0x71   :  { %4163 = vmatprep.mubr.msk.f32.mxu0 %vm116_vm0, %v68_v61 }
  0x74   :  { %4164 = vmatmul.mubr.msk.f32.gmra.mrb[52].mxu0 %vm116_vm0, %v69_v62 }
  0x75   :  { %4166 = vmatprep.mubr.msk.f32.mxu0 %vm116_vm0, %v70_v63 }
  0x78   :  { %4167 = vmatmul.mubr.msk.f32.gmra.mrb[54].mxu0 %vm116_vm0, %v71_v0 }
  0x79   :  { %4169 = vmatprep.mubr.msk.f32.mxu0 %vm116_vm0, %v72_v1 }
  0x7c   :  { %4170 = vmatmul.mubr.msk.f32.gmra.mrb[56].mxu0 %vm116_vm0, %v73_v2 }
  0x7d   :  { %4172 = vmatprep.mubr.msk.f32.mxu0 %vm116_vm0, %v74_v3 }
  0x80   :  { %4173 = vmatmul.mubr.msk.f32.gmra.mrb[58].mxu0 %vm116_vm0, %v75_v4 }
  0x81   :  { %4175 = vmatprep.mubr.msk.f32.mxu0 %vm116_vm0, %v76_v5 }
  0x84   :  { %4176 = vmatmul.mubr.msk.f32.gmra.mrb[60].mxu0 %vm116_vm0, %v77_v6 }
  0x85   :  { %4178 = vmatprep.mubr.msk.f32.mxu0 %vm116_vm0, %v78_v7 }
  0x88   :  { %4179 = vmatmul.mubr.msk.f32.gmra.mrb[62].mxu0 %vm116_vm0, %v79_v8 }
  0x89   :  { %4181 = vmatprep.mubr.msk.f32.mxu0 %vm116_vm0, %v80_v9 }
  0x8c   :  { %4182 = vmatmul.mubr.msk.f32.gmra.mrb[64].mxu0 %vm116_vm0, %v81_v10 }
  0x8d   :  { %4184 = vmatprep.mubr.msk.f32.mxu0 %vm116_vm0, %v82_v11 }
  0x90   :  { %4185 = vmatmul.mubr.msk.f32.gmra.mrb[66].mxu0 %vm116_vm0, %v83_v12 }
  0x91   :  { %4187 = vmatprep.mubr.msk.f32.mxu0 %vm116_vm0, %v84_v13 }
  0x94   :  { %4188 = vmatmul.mubr.msk.f32.gmra.mrb[68].mxu0 %vm116_vm0, %v85_v14 }
  0x95   :  { %4190 = vmatprep.mubr.msk.f32.mxu0 %vm116_vm0, %v86_v15 }
  0x98   :  { %4191 = vmatmul.mubr.msk.f32.gmra.mrb[70].mxu0 %vm116_vm0, %v87_v16 }
  0x99   :  { %4193 = vmatprep.mubr.msk.f32.mxu0 %vm116_vm0, %v88_v17 }
  0x9c   :  { %4194 = vmatmul.mubr.msk.f32.gmra.mrb[72].mxu0 %vm116_vm0, %v89_v18 }
  0x9d   :  { %4196 = vmatprep.mubr.msk.f32.mxu0 %vm116_vm0, %v90_v19 }
  0xa0   :  { %4197 = vmatmul.mubr.msk.f32.gmra.mrb[74].mxu0 %vm116_vm0, %v91_v20 }
  0xa1   :  { %4199 = vmatprep.mubr.msk.f32.mxu0 %vm116_vm0, %v92_v21 }
  0xa4   :  { %4200 = vmatmul.mubr.msk.f32.gmra.mrb[76].mxu0 %vm116_vm0, %v93_v22 }
  0xa5   :  { %4202 = vmatprep.mubr.msk.f32.mxu0 %vm116_vm0, %v94_v23 }
  0xa8   :  { %4203 = vmatmul.mubr.msk.f32.gmra.mrb[78].mxu0 %vm116_vm0, %v95_v24 }
  0xa9   :  { %4205 = vmatprep.mubr.msk.f32.mxu0 %vm116_vm0, %v96_v25 }
  0xac   :  { %4206 = vmatmul.mubr.msk.f32.gmra.mrb[80].mxu0 %vm116_vm0, %v97_v26 }
  0xad   :  { %4208 = vmatprep.mubr.msk.f32.mxu0 %vm116_vm0, %v98_v27 }
  0xb0   :  { %4209 = vmatmul.mubr.msk.f32.gmra.mrb[82].mxu0 %vm116_vm0, %v99_v28 }
  0xb1   :  { %4211 = vmatprep.mubr.msk.f32.mxu0 %vm116_vm0, %v100_v29 }
  0xb4   :  { %4212 = vmatmul.mubr.msk.f32.gmra.mrb[84].mxu0 %vm116_vm0, %v101_v30 }
  0xb5   :  { %4214 = vmatprep.mubr.msk.f32.mxu0 %vm116_vm0, %v102_v31 }
  0xb8   :  { %4215 = vmatmul.mubr.msk.f32.gmra.mrb[86].mxu0 %vm116_vm0, %v103_v32 }
  0xb9   :  { %4217 = vmatprep.mubr.msk.f32.mxu0 %vm116_vm0, %v104_v33 }
  0xbc   :  { %4218 = vmatmul.mubr.msk.f32.gmra.mrb[88].mxu0 %vm116_vm0, %v105_v34 }
  0xbd   :  { %4220 = vmatprep.mubr.msk.f32.mxu0 %vm116_vm0, %v106_v35 }
  0xc0   :  { %4221 = vmatmul.mubr.msk.f32.gmra.mrb[90].mxu0 %vm116_vm0, %v107_v36 }
  0xc1   :  { %4223 = vmatprep.mubr.msk.f32.mxu0 %vm116_vm0, %v108_v37 }
  0xc4   :  { %4224 = vmatmul.mubr.msk.f32.gmra.mrb[92].mxu0 %vm116_vm0, %v109_v38 }
  0xc5   :  { %4226 = vmatprep.mubr.msk.f32.mxu0 %vm116_vm0, %v110_v39 }
  0xc8   :  { %4227 = vmatmul.mubr.msk.f32.gmra.mrb[94].mxu0 %vm116_vm0, %v111_v40 }
  0xdf   :  { %v4087_v41 = vpop.f32.mrb[0].mxu0 }
  0xe0   :  { %v471_v42 = vpop.f32.mrb[1].mxu0 }
  0xe1   :  { %4394 = vtanh.f32 %v471_v42 }
  0xe2   :  { %4396 = vtanh.f32 %v4087_v41 }
  0xe3   :  { %v4090_v43 = vpop.f32.mrb[2].mxu0 }
  0xe4   :  { %v481_v44 = vpop.f32.mrb[3].mxu0 }
  0xe5   :  { %4398 = vtanh.f32 %v481_v44 }
  0xe6   :  { %4400 = vtanh.f32 %v4090_v43 }
  0xe7   :  { %v4093_v45 = vpop.f32.mrb[4].mxu0 }
  0xe8   :  { %v491_v46 = vpop.f32.mrb[5].mxu0 }
  0xe9   :  { %4402 = vtanh.f32 %v491_v46 }
  0xea   :  { %4404 = vtanh.f32 %v4093_v45 }
  0xeb   :  { %v4395_v47 = vpop.eup %4394  ;;  %v4096_v48 = vpop.f32.mrb[6].mxu0 }
  0xec   :  { %v4397_v49 = vpop.eup %4396  ;;  %v501_v50 = vpop.f32.mrb[7].mxu0  ;;  %4233 = vmatprep.mubr.msk.f32.mxu1 %vm1048_vm1, %v4395_v47 }
  0xed   :  { %4406 = vtanh.f32 %v501_v50  ;;  %4234 = vmatmul.mubr.msk.f32.vlgmr.msra.gmra.mrb[0].mxu1 %vm1048_vm1, %v4397_v49 }
  0xee   :  { %4408 = vtanh.f32 %v4096_v48 }
  0xef   :  { %v4399_v51 = vpop.eup %4398  ;;  %v4099_v52 = vpop.f32.mrb[8].mxu0 }
  0xf0   :  { %v4401_v53 = vpop.eup %4400  ;;  %v511_v54 = vpop.f32.mrb[9].mxu0  ;;  %4236 = vmatprep.mubr.msk.f32.mxu1 %vm1048_vm1, %v4399_v51 }
  0xf1   :  { %4410 = vtanh.f32 %v511_v54  ;;  %4237 = vmatmul.mubr.msk.f32.gmra.mrb[2].mxu1 %vm1048_vm1, %v4401_v53 }
  0xf2   :  { %4412 = vtanh.f32 %v4099_v52 }
  0xf3   :  { %v4403_v55 = vpop.eup %4402  ;;  %v4102_v56 = vpop.f32.mrb[10].mxu0 }
  0xf4   :  { %v4405_v57 = vpop.eup %4404  ;;  %v521_v58 = vpop.f32.mrb[11].mxu0  ;;  %4239 = vmatprep.mubr.msk.f32.mxu1 %vm1048_vm1, %v4403_v55 }
  0xf5   :  { %4414 = vtanh.f32 %v521_v58  ;;  %4240 = vmatmul.mubr.msk.f32.gmra.mrb[4].mxu1 %vm1048_vm1, %v4405_v57 }
  0xf6   :  { %4416 = vtanh.f32 %v4102_v56 }
  0xf7   :  { %v4407_v59 = vpop.eup %4406  ;;  %v4105_v60 = vpop.f32.mrb[12].mxu0 }
  0xf8   :  { %v4409_v61 = vpop.eup %4408  ;;  %v531_v62 = vpop.f32.mrb[13].mxu0  ;;  %4242 = vmatprep.mubr.msk.f32.mxu1 %vm1048_vm1, %v4407_v59 }
  0xf9   :  { %4418 = vtanh.f32 %v531_v62  ;;  %4243 = vmatmul.mubr.msk.f32.gmra.mrb[6].mxu1 %vm1048_vm1, %v4409_v61 }
  0xfa   :  { %4420 = vtanh.f32 %v4105_v60 }
  0xfb   :  { %v4411_v63 = vpop.eup %4410  ;;  %v4108_v0 = vpop.f32.mrb[14].mxu0 }
  0xfc   :  { %v4413_v1 = vpop.eup %4412  ;;  %v541_v2 = vpop.f32.mrb[15].mxu0  ;;  %4245 = vmatprep.mubr.msk.f32.mxu1 %vm1048_vm1, %v4411_v63 }
  0xfd   :  { %4422 = vtanh.f32 %v541_v2  ;;  %4246 = vmatmul.mubr.msk.f32.gmra.mrb[8].mxu1 %vm1048_vm1, %v4413_v1 }
  0xfe   :  { %4424 = vtanh.f32 %v4108_v0 }
  0xff   :  { %v4415_v3 = vpop.eup %4414  ;;  %v4111_v4 = vpop.f32.mrb[16].mxu0 }
 0x100   :  { %v4417_v5 = vpop.eup %4416  ;;  %v551_v6 = vpop.f32.mrb[17].mxu0  ;;  %4248 = vmatprep.mubr.msk.f32.mxu1 %vm1048_vm1, %v4415_v3 }
 0x101   :  { %4426 = vtanh.f32 %v551_v6  ;;  %4249 = vmatmul.mubr.msk.f32.gmra.mrb[10].mxu1 %vm1048_vm1, %v4417_v5 }
 0x102   :  { %4428 = vtanh.f32 %v4111_v4 }
 0x103   :  { %v4419_v7 = vpop.eup %4418  ;;  %v4114_v8 = vpop.f32.mrb[18].mxu0 }
 0x104   :  { %v4421_v9 = vpop.eup %4420  ;;  %v561_v10 = vpop.f32.mrb[19].mxu0  ;;  %4251 = vmatprep.mubr.msk.f32.mxu1 %vm1048_vm1, %v4419_v7 }
 0x105   :  { %4430 = vtanh.f32 %v561_v10  ;;  %4252 = vmatmul.mubr.msk.f32.gmra.mrb[12].mxu1 %vm1048_vm1, %v4421_v9 }
 0x106   :  { %4432 = vtanh.f32 %v4114_v8 }
 0x107   :  { %v4423_v11 = vpop.eup %4422  ;;  %v4117_v12 = vpop.f32.mrb[20].mxu0 }
 0x108   :  { %v4425_v13 = vpop.eup %4424  ;;  %v571_v14 = vpop.f32.mrb[21].mxu0  ;;  %4254 = vmatprep.mubr.msk.f32.mxu1 %vm1048_vm1, %v4423_v11 }
 0x109   :  { %4434 = vtanh.f32 %v571_v14  ;;  %4255 = vmatmul.mubr.msk.f32.gmra.mrb[14].mxu1 %vm1048_vm1, %v4425_v13 }
 0x10a   :  { %4436 = vtanh.f32 %v4117_v12 }
 0x10b   :  { %v4427_v15 = vpop.eup %4426  ;;  %v4120_v16 = vpop.f32.mrb[22].mxu0 }
 0x10c   :  { %v4429_v17 = vpop.eup %4428  ;;  %v581_v18 = vpop.f32.mrb[23].mxu0  ;;  %4257 = vmatprep.mubr.msk.f32.mxu1 %vm1048_vm1, %v4427_v15 }
 0x10d   :  { %4438 = vtanh.f32 %v581_v18  ;;  %4258 = vmatmul.mubr.msk.f32.gmra.mrb[16].mxu1 %vm1048_vm1, %v4429_v17 }
 0x10e   :  { %4440 = vtanh.f32 %v4120_v16 }
 0x10f   :  { %v4431_v19 = vpop.eup %4430  ;;  %v4123_v20 = vpop.f32.mrb[24].mxu0 }
 0x110   :  { %v4433_v21 = vpop.eup %4432  ;;  %v591_v22 = vpop.f32.mrb[25].mxu0  ;;  %4260 = vmatprep.mubr.msk.f32.mxu1 %vm1048_vm1, %v4431_v19 }
 0x111   :  { %4442 = vtanh.f32 %v591_v22  ;;  %4261 = vmatmul.mubr.msk.f32.gmra.mrb[18].mxu1 %vm1048_vm1, %v4433_v21 }
 0x112   :  { %4444 = vtanh.f32 %v4123_v20 }
 0x113   :  { %v4435_v23 = vpop.eup %4434  ;;  %v4126_v24 = vpop.f32.mrb[26].mxu0 }
 0x114   :  { %v4437_v25 = vpop.eup %4436  ;;  %v601_v26 = vpop.f32.mrb[27].mxu0  ;;  %4263 = vmatprep.mubr.msk.f32.mxu1 %vm1048_vm1, %v4435_v23 }
 0x115   :  { %4446 = vtanh.f32 %v601_v26  ;;  %4264 = vmatmul.mubr.msk.f32.gmra.mrb[20].mxu1 %vm1048_vm1, %v4437_v25 }
 0x116   :  { %4448 = vtanh.f32 %v4126_v24 }
 0x117   :  { %v4439_v27 = vpop.eup %4438  ;;  %v4129_v28 = vpop.f32.mrb[28].mxu0 }
 0x118   :  { %v4441_v29 = vpop.eup %4440  ;;  %v611_v30 = vpop.f32.mrb[29].mxu0  ;;  %4266 = vmatprep.mubr.msk.f32.mxu1 %vm1048_vm1, %v4439_v27 }
 0x119   :  { %4450 = vtanh.f32 %v611_v30  ;;  %4267 = vmatmul.mubr.msk.f32.gmra.mrb[22].mxu1 %vm1048_vm1, %v4441_v29 }
 0x11a   :  { %4452 = vtanh.f32 %v4129_v28 }
 0x11b   :  { %v4443_v31 = vpop.eup %4442  ;;  %v4132_v32 = vpop.f32.mrb[30].mxu0 }
 0x11c   :  { %v4445_v33 = vpop.eup %4444  ;;  %v621_v34 = vpop.f32.mrb[31].mxu0  ;;  %4269 = vmatprep.mubr.msk.f32.mxu1 %vm1048_vm1, %v4443_v31 }
 0x11d   :  { %4454 = vtanh.f32 %v621_v34  ;;  %4270 = vmatmul.mubr.msk.f32.gmra.mrb[24].mxu1 %vm1048_vm1, %v4445_v33 }
 0x11e   :  { %4456 = vtanh.f32 %v4132_v32 }
 0x11f   :  { %v4447_v35 = vpop.eup %4446  ;;  %v4135_v36 = vpop.f32.mrb[32].mxu0 }
 0x120   :  { %v4449_v37 = vpop.eup %4448  ;;  %v631_v38 = vpop.f32.mrb[33].mxu0  ;;  %4272 = vmatprep.mubr.msk.f32.mxu1 %vm1048_vm1, %v4447_v35 }
 0x121   :  { %4458 = vtanh.f32 %v631_v38  ;;  %4273 = vmatmul.mubr.msk.f32.gmra.mrb[26].mxu1 %vm1048_vm1, %v4449_v37 }
 0x122   :  { %4460 = vtanh.f32 %v4135_v36 }
 0x123   :  { %v4451_v39 = vpop.eup %4450  ;;  %v4138_v40 = vpop.f32.mrb[34].mxu0 }
 0x124   :  { %v4453_v41 = vpop.eup %4452  ;;  %v641_v42 = vpop.f32.mrb[35].mxu0  ;;  %4275 = vmatprep.mubr.msk.f32.mxu1 %vm1048_vm1, %v4451_v39 }
 0x125   :  { %4462 = vtanh.f32 %v641_v42  ;;  %4276 = vmatmul.mubr.msk.f32.gmra.mrb[28].mxu1 %vm1048_vm1, %v4453_v41 }
 0x126   :  { %4464 = vtanh.f32 %v4138_v40 }
 0x127   :  { %v4455_v43 = vpop.eup %4454  ;;  %v4141_v44 = vpop.f32.mrb[36].mxu0 }
 0x128   :  { %v4457_v45 = vpop.eup %4456  ;;  %v651_v46 = vpop.f32.mrb[37].mxu0  ;;  %4278 = vmatprep.mubr.msk.f32.mxu1 %vm1048_vm1, %v4455_v43 }
 0x129   :  { %4466 = vtanh.f32 %v651_v46  ;;  %4279 = vmatmul.mubr.msk.f32.gmra.mrb[30].mxu1 %vm1048_vm1, %v4457_v45 }
 0x12a   :  { %4468 = vtanh.f32 %v4141_v44 }
 0x12b   :  { %v4459_v47 = vpop.eup %4458  ;;  %v4144_v48 = vpop.f32.mrb[38].mxu0 }
 0x12c   :  { %v4461_v49 = vpop.eup %4460  ;;  %v661_v50 = vpop.f32.mrb[39].mxu0  ;;  %4281 = vmatprep.mubr.msk.f32.mxu1 %vm1048_vm1, %v4459_v47 }
 0x12d   :  { %4470 = vtanh.f32 %v661_v50  ;;  %4282 = vmatmul.mubr.msk.f32.gmra.mrb[32].mxu1 %vm1048_vm1, %v4461_v49 }
 0x12e   :  { %4472 = vtanh.f32 %v4144_v48 }
 0x12f   :  { %v4463_v51 = vpop.eup %4462  ;;  %v4147_v52 = vpop.f32.mrb[40].mxu0 }
 0x130   :  { %v4465_v53 = vpop.eup %4464  ;;  %v671_v54 = vpop.f32.mrb[41].mxu0  ;;  %4284 = vmatprep.mubr.msk.f32.mxu1 %vm1048_vm1, %v4463_v51 }
 0x131   :  { %4474 = vtanh.f32 %v671_v54  ;;  %4285 = vmatmul.mubr.msk.f32.gmra.mrb[34].mxu1 %vm1048_vm1, %v4465_v53 }
 0x132   :  { %4476 = vtanh.f32 %v4147_v52 }
 0x133   :  { %v4467_v55 = vpop.eup %4466  ;;  %v4150_v56 = vpop.f32.mrb[42].mxu0 }
 0x134   :  { %v4469_v57 = vpop.eup %4468  ;;  %v681_v58 = vpop.f32.mrb[43].mxu0  ;;  %4287 = vmatprep.mubr.msk.f32.mxu1 %vm1048_vm1, %v4467_v55 }
 0x135   :  { %4478 = vtanh.f32 %v681_v58  ;;  %4288 = vmatmul.mubr.msk.f32.gmra.mrb[36].mxu1 %vm1048_vm1, %v4469_v57 }
 0x136   :  { %4480 = vtanh.f32 %v4150_v56 }
 0x137   :  { %v4471_v59 = vpop.eup %4470  ;;  %v4153_v60 = vpop.f32.mrb[44].mxu0 }
 0x138   :  { %v4473_v61 = vpop.eup %4472  ;;  %v691_v62 = vpop.f32.mrb[45].mxu0  ;;  %4290 = vmatprep.mubr.msk.f32.mxu1 %vm1048_vm1, %v4471_v59 }
 0x139   :  { %4482 = vtanh.f32 %v691_v62  ;;  %4291 = vmatmul.mubr.msk.f32.gmra.mrb[38].mxu1 %vm1048_vm1, %v4473_v61 }
 0x13a   :  { %4484 = vtanh.f32 %v4153_v60 }
 0x13b   :  { %v4475_v63 = vpop.eup %4474  ;;  %v4156_v0 = vpop.f32.mrb[46].mxu0 }
 0x13c   :  { %v4477_v1 = vpop.eup %4476  ;;  %v701_v2 = vpop.f32.mrb[47].mxu0  ;;  %4293 = vmatprep.mubr.msk.f32.mxu1 %vm1048_vm1, %v4475_v63 }
 0x13d   :  { %4486 = vtanh.f32 %v701_v2  ;;  %4294 = vmatmul.mubr.msk.f32.gmra.mrb[40].mxu1 %vm1048_vm1, %v4477_v1 }
 0x13e   :  { %4488 = vtanh.f32 %v4156_v0 }
 0x13f   :  { %v4479_v3 = vpop.eup %4478  ;;  %v4159_v4 = vpop.f32.mrb[48].mxu0 }
 0x140   :  { %v4481_v5 = vpop.eup %4480  ;;  %v711_v6 = vpop.f32.mrb[49].mxu0  ;;  %4296 = vmatprep.mubr.msk.f32.mxu1 %vm1048_vm1, %v4479_v3 }
 0x141   :  { %4490 = vtanh.f32 %v711_v6  ;;  %4297 = vmatmul.mubr.msk.f32.gmra.mrb[42].mxu1 %vm1048_vm1, %v4481_v5 }
 0x142   :  { %4492 = vtanh.f32 %v4159_v4 }
 0x143   :  { %v4483_v7 = vpop.eup %4482  ;;  %v4162_v8 = vpop.f32.mrb[50].mxu0 }
 0x144   :  { %v4485_v9 = vpop.eup %4484  ;;  %v721_v10 = vpop.f32.mrb[51].mxu0  ;;  %4299 = vmatprep.mubr.msk.f32.mxu1 %vm1048_vm1, %v4483_v7 }
 0x145   :  { %4494 = vtanh.f32 %v721_v10  ;;  %4300 = vmatmul.mubr.msk.f32.gmra.mrb[44].mxu1 %vm1048_vm1, %v4485_v9 }
 0x146   :  { %4496 = vtanh.f32 %v4162_v8 }
 0x147   :  { %v4487_v11 = vpop.eup %4486  ;;  %v4165_v12 = vpop.f32.mrb[52].mxu0 }
 0x148   :  { %v4489_v13 = vpop.eup %4488  ;;  %v731_v14 = vpop.f32.mrb[53].mxu0  ;;  %4302 = vmatprep.mubr.msk.f32.mxu1 %vm1048_vm1, %v4487_v11 }
 0x149   :  { %4498 = vtanh.f32 %v731_v14  ;;  %4303 = vmatmul.mubr.msk.f32.gmra.mrb[46].mxu1 %vm1048_vm1, %v4489_v13 }
 0x14a   :  { %4500 = vtanh.f32 %v4165_v12 }
 0x14b   :  { %v4491_v15 = vpop.eup %4490  ;;  %v4168_v16 = vpop.f32.mrb[54].mxu0 }
 0x14c   :  { %v4493_v17 = vpop.eup %4492  ;;  %v741_v18 = vpop.f32.mrb[55].mxu0  ;;  %4305 = vmatprep.mubr.msk.f32.mxu1 %vm1048_vm1, %v4491_v15 }
 0x14d   :  { %4502 = vtanh.f32 %v741_v18  ;;  %4306 = vmatmul.mubr.msk.f32.gmra.mrb[48].mxu1 %vm1048_vm1, %v4493_v17 }
 0x14e   :  { %4504 = vtanh.f32 %v4168_v16 }
 0x14f   :  { %v4495_v19 = vpop.eup %4494  ;;  %v4171_v20 = vpop.f32.mrb[56].mxu0 }
 0x150   :  { %v4497_v21 = vpop.eup %4496  ;;  %v751_v22 = vpop.f32.mrb[57].mxu0  ;;  %4308 = vmatprep.mubr.msk.f32.mxu1 %vm1048_vm1, %v4495_v19 }
 0x151   :  { %4506 = vtanh.f32 %v751_v22  ;;  %4309 = vmatmul.mubr.msk.f32.gmra.mrb[50].mxu1 %vm1048_vm1, %v4497_v21 }
 0x152   :  { %4508 = vtanh.f32 %v4171_v20 }
 0x153   :  { %v4499_v23 = vpop.eup %4498  ;;  %v4174_v24 = vpop.f32.mrb[58].mxu0 }
 0x154   :  { %v4501_v25 = vpop.eup %4500  ;;  %v761_v26 = vpop.f32.mrb[59].mxu0  ;;  %4311 = vmatprep.mubr.msk.f32.mxu1 %vm1048_vm1, %v4499_v23 }
 0x155   :  { %4510 = vtanh.f32 %v761_v26  ;;  %4312 = vmatmul.mubr.msk.f32.gmra.mrb[52].mxu1 %vm1048_vm1, %v4501_v25 }
 0x156   :  { %4512 = vtanh.f32 %v4174_v24 }
 0x157   :  { %v4503_v27 = vpop.eup %4502  ;;  %v4177_v28 = vpop.f32.mrb[60].mxu0 }
 0x158   :  { %v4505_v29 = vpop.eup %4504  ;;  %v771_v30 = vpop.f32.mrb[61].mxu0  ;;  %4314 = vmatprep.mubr.msk.f32.mxu1 %vm1048_vm1, %v4503_v27 }
 0x159   :  { %4514 = vtanh.f32 %v771_v30  ;;  %4315 = vmatmul.mubr.msk.f32.gmra.mrb[54].mxu1 %vm1048_vm1, %v4505_v29 }
 0x15a   :  { %4516 = vtanh.f32 %v4177_v28 }
 0x15b   :  { %v4507_v31 = vpop.eup %4506  ;;  %v4180_v32 = vpop.f32.mrb[62].mxu0 }
 0x15c   :  { %v4509_v33 = vpop.eup %4508  ;;  %v781_v34 = vpop.f32.mrb[63].mxu0  ;;  %4317 = vmatprep.mubr.msk.f32.mxu1 %vm1048_vm1, %v4507_v31 }
 0x15d   :  { %4518 = vtanh.f32 %v781_v34  ;;  %4318 = vmatmul.mubr.msk.f32.gmra.mrb[56].mxu1 %vm1048_vm1, %v4509_v33 }
 0x15e   :  { %4520 = vtanh.f32 %v4180_v32 }
 0x15f   :  { %v4511_v35 = vpop.eup %4510  ;;  %v4183_v36 = vpop.f32.mrb[64].mxu0 }
 0x160   :  { %v4513_v37 = vpop.eup %4512  ;;  %v791_v38 = vpop.f32.mrb[65].mxu0  ;;  %4320 = vmatprep.mubr.msk.f32.mxu1 %vm1048_vm1, %v4511_v35 }
 0x161   :  { %4522 = vtanh.f32 %v791_v38  ;;  %4321 = vmatmul.mubr.msk.f32.gmra.mrb[58].mxu1 %vm1048_vm1, %v4513_v37 }
 0x162   :  { %4524 = vtanh.f32 %v4183_v36 }
 0x163   :  { %v4515_v39 = vpop.eup %4514  ;;  %v4186_v40 = vpop.f32.mrb[66].mxu0 }
 0x164   :  { %v4517_v41 = vpop.eup %4516  ;;  %4526 = vtanh.f32 %v4186_v40  ;;  %v801_v42 = vpop.f32.mrb[67].mxu0  ;;  %4323 = vmatprep.mubr.msk.f32.mxu1 %vm1048_vm1, %v4515_v39 }
 0x165   :  { %4528 = vtanh.f32 %v801_v42  ;;  %4324 = vmatmul.mubr.msk.f32.gmra.mrb[60].mxu1 %vm1048_vm1, %v4517_v41 }
 0x167   :  { %v4519_v43 = vpop.eup %4518  ;;  %v4189_v44 = vpop.f32.mrb[68].mxu0 }
 0x168   :  { %v4521_v45 = vpop.eup %4520  ;;  %4530 = vtanh.f32 %v4189_v44  ;;  %v811_v46 = vpop.f32.mrb[69].mxu0  ;;  %4326 = vmatprep.mubr.msk.f32.mxu1 %vm1048_vm1, %v4519_v43 }
 0x169   :  { %4532 = vtanh.f32 %v811_v46  ;;  %4327 = vmatmul.mubr.msk.f32.gmra.mrb[62].mxu1 %vm1048_vm1, %v4521_v45 }
 0x16b   :  { %v4523_v47 = vpop.eup %4522  ;;  %v4192_v48 = vpop.f32.mrb[70].mxu0 }
 0x16c   :  { %v4525_v49 = vpop.eup %4524  ;;  %4534 = vtanh.f32 %v4192_v48  ;;  %v821_v50 = vpop.f32.mrb[71].mxu0  ;;  %4329 = vmatprep.mubr.msk.f32.mxu1 %vm1048_vm1, %v4523_v47 }
 0x16d   :  { %4536 = vtanh.f32 %v821_v50  ;;  %4330 = vmatmul.mubr.msk.f32.gmra.mrb[64].mxu1 %vm1048_vm1, %v4525_v49 }
 0x16e   :  { %v4527_v51 = vpop.eup %4526 }
 0x16f   :  { %v4529_v52 = vpop.eup %4528  ;;  %v4195_v53 = vpop.f32.mrb[72].mxu0 }
 0x170   :  { %4538 = vtanh.f32 %v4195_v53  ;;  %v831_v54 = vpop.f32.mrb[73].mxu0  ;;  %4332 = vmatprep.mubr.msk.f32.mxu1 %vm1048_vm1, %v4529_v52 }
 0x171   :  { %4540 = vtanh.f32 %v831_v54  ;;  %4333 = vmatmul.mubr.msk.f32.gmra.mrb[66].mxu1 %vm1048_vm1, %v4527_v51 }
 0x172   :  { %v4531_v55 = vpop.eup %4530 }
 0x173   :  { %v4533_v56 = vpop.eup %4532  ;;  %v4198_v57 = vpop.f32.mrb[74].mxu0 }
 0x174   :  { %4542 = vtanh.f32 %v4198_v57  ;;  %v841_v58 = vpop.f32.mrb[75].mxu0  ;;  %4335 = vmatprep.mubr.msk.f32.mxu1 %vm1048_vm1, %v4533_v56 }
 0x175   :  { %4544 = vtanh.f32 %v841_v58  ;;  %4336 = vmatmul.mubr.msk.f32.gmra.mrb[68].mxu1 %vm1048_vm1, %v4531_v55  ;;  %v4842_v55 = vmov 0  }
 0x176   :  { %v4535_v59 = vpop.eup %4534  ;;  %4393 = vset.pattern.permute.xlu1 %v4842_v55  ;;  %4392 = vset.pattern.permute.xlu0 %v4842_v55 }
 0x177   :  { %v4537_v60 = vpop.eup %4536  ;;  %v4201_v61 = vpop.f32.mrb[76].mxu0 }
 0x178   :  { %4546 = vtanh.f32 %v4201_v61  ;;  %v851_v62 = vpop.f32.mrb[77].mxu0  ;;  %4338 = vmatprep.mubr.msk.f32.mxu1 %vm1048_vm1, %v4537_v60 }
 0x179   :  { %4548 = vtanh.f32 %v851_v62  ;;  %4339 = vmatmul.mubr.msk.f32.gmra.mrb[70].mxu1 %vm1048_vm1, %v4535_v59 }
 0x17a   :  { %v4539_v63 = vpop.eup %4538 }
 0x17b   :  { %v4541_v0 = vpop.eup %4540  ;;  %v4204_v1 = vpop.f32.mrb[78].mxu0 }
 0x17c   :  { %4550 = vtanh.f32 %v4204_v1  ;;  %v861_v2 = vpop.f32.mrb[79].mxu0  ;;  %4341 = vmatprep.mubr.msk.f32.mxu1 %vm1048_vm1, %v4541_v0 }
 0x17d   :  { %4552 = vtanh.f32 %v861_v2  ;;  %4342 = vmatmul.mubr.msk.f32.gmra.mrb[72].mxu1 %vm1048_vm1, %v4539_v63 }
 0x17e   :  { %v4543_v3 = vpop.eup %4542 }
 0x17f   :  { %v4545_v4 = vpop.eup %4544  ;;  %v4207_v5 = vpop.f32.mrb[80].mxu0 }
 0x180   :  { %4554 = vtanh.f32 %v4207_v5  ;;  %v871_v6 = vpop.f32.mrb[81].mxu0  ;;  %4344 = vmatprep.mubr.msk.f32.mxu1 %vm1048_vm1, %v4545_v4 }
 0x181   :  { %4556 = vtanh.f32 %v871_v6  ;;  %4345 = vmatmul.mubr.msk.f32.gmra.mrb[74].mxu1 %vm1048_vm1, %v4543_v3 }
 0x182   :  { %v4547_v7 = vpop.eup %4546 }
 0x183   :  { %v4549_v8 = vpop.eup %4548  ;;  %v4210_v9 = vpop.f32.mrb[82].mxu0 }
 0x184   :  { %4558 = vtanh.f32 %v4210_v9  ;;  %v881_v10 = vpop.f32.mrb[83].mxu0  ;;  %4347 = vmatprep.mubr.msk.f32.mxu1 %vm1048_vm1, %v4549_v8 }
 0x185   :  { %4560 = vtanh.f32 %v881_v10  ;;  %4348 = vmatmul.mubr.msk.f32.gmra.mrb[76].mxu1 %vm1048_vm1, %v4547_v7 }
 0x186   :  { %v4551_v11 = vpop.eup %4550 }
 0x187   :  { %v4553_v12 = vpop.eup %4552  ;;  %v4213_v13 = vpop.f32.mrb[84].mxu0 }
 0x188   :  { %4562 = vtanh.f32 %v4213_v13  ;;  %v891_v14 = vpop.f32.mrb[85].mxu0  ;;  %4350 = vmatprep.mubr.msk.f32.mxu1 %vm1048_vm1, %v4553_v12 }
 0x189   :  { %4564 = vtanh.f32 %v891_v14  ;;  %4351 = vmatmul.mubr.msk.f32.gmra.mrb[78].mxu1 %vm1048_vm1, %v4551_v11 }
 0x18a   :  { %v4555_v15 = vpop.eup %4554 }
 0x18b   :  { %v4557_v16 = vpop.eup %4556  ;;  %v4216_v17 = vpop.f32.mrb[86].mxu0 }
 0x18c   :  { %4566 = vtanh.f32 %v4216_v17  ;;  %v901_v18 = vpop.f32.mrb[87].mxu0  ;;  %4353 = vmatprep.mubr.msk.f32.mxu1 %vm1048_vm1, %v4557_v16 }
 0x18d   :  { %4568 = vtanh.f32 %v901_v18  ;;  %4354 = vmatmul.mubr.msk.f32.gmra.mrb[80].mxu1 %vm1048_vm1, %v4555_v15 }
 0x18e   :  { %v4559_v19 = vpop.eup %4558 }
 0x18f   :  { %v4561_v20 = vpop.eup %4560  ;;  %v4219_v21 = vpop.f32.mrb[88].mxu0 }
 0x190   :  { %4570 = vtanh.f32 %v4219_v21  ;;  %v911_v22 = vpop.f32.mrb[89].mxu0  ;;  %4356 = vmatprep.mubr.msk.f32.mxu1 %vm1048_vm1, %v4561_v20 }
 0x191   :  { %4572 = vtanh.f32 %v911_v22  ;;  %4357 = vmatmul.mubr.msk.f32.gmra.mrb[82].mxu1 %vm1048_vm1, %v4559_v19 }
 0x192   :  { %v4563_v23 = vpop.eup %4562 }
 0x193   :  { %v4565_v24 = vpop.eup %4564  ;;  %v4222_v25 = vpop.f32.mrb[90].mxu0 }
 0x194   :  { %4574 = vtanh.f32 %v4222_v25  ;;  %v921_v26 = vpop.f32.mrb[91].mxu0  ;;  %4359 = vmatprep.mubr.msk.f32.mxu1 %vm1048_vm1, %v4565_v24 }
 0x195   :  { %4576 = vtanh.f32 %v921_v26  ;;  %4360 = vmatmul.mubr.msk.f32.gmra.mrb[84].mxu1 %vm1048_vm1, %v4563_v23 }
 0x196   :  { %v4567_v27 = vpop.eup %4566 }
 0x197   :  { %v4569_v28 = vpop.eup %4568  ;;  %v4225_v29 = vpop.f32.mrb[92].mxu0 }
 0x198   :  { %4578 = vtanh.f32 %v4225_v29  ;;  %v931_v30 = vpop.f32.mrb[93].mxu0  ;;  %4362 = vmatprep.mubr.msk.f32.mxu1 %vm1048_vm1, %v4569_v28 }
 0x199   :  { %4580 = vtanh.f32 %v931_v30  ;;  %4363 = vmatmul.mubr.msk.f32.gmra.mrb[86].mxu1 %vm1048_vm1, %v4567_v27 }
 0x19a   :  { %v4571_v31 = vpop.eup %4570 }
 0x19b   :  { %v4573_v32 = vpop.eup %4572  ;;  %v4228_v33 = vpop.f32.mrb[94].mxu0 }
 0x19c   :  { %4582 = vtanh.f32 %v4228_v33  ;;  %v941_v34 = vpop.f32.mrb[95].mxu0  ;;  %4365 = vmatprep.mubr.msk.f32.mxu1 %vm1048_vm1, %v4573_v32 }
 0x19d   :  { %4584 = vtanh.f32 %v941_v34  ;;  %4366 = vmatmul.mubr.msk.f32.gmra.mrb[88].mxu1 %vm1048_vm1, %v4571_v31 }
 0x19e   :  { %v4575_v35 = vpop.eup %4574 }
 0x19f   :  { %v4577_v36 = vpop.eup %4576 }
 0x1a0   :  { %4368 = vmatprep.mubr.msk.f32.mxu1 %vm1048_vm1, %v4577_v36 }
 0x1a1   :  { %4369 = vmatmul.mubr.msk.f32.gmra.mrb[90].mxu1 %vm1048_vm1, %v4575_v35 }
 0x1a2   :  { %v4579_v37 = vpop.eup %4578 }
 0x1a3   :  { %v4581_v38 = vpop.eup %4580 }
 0x1a4   :  { %4371 = vmatprep.mubr.msk.f32.mxu1 %vm1048_vm1, %v4581_v38 }
 0x1a5   :  { %4372 = vmatmul.mubr.msk.f32.gmra.mrb[92].mxu1 %vm1048_vm1, %v4579_v37 }
 0x1a6   :  { %v4583_v39 = vpop.eup %4582 }
 0x1a7   :  { %v4585_v40 = vpop.eup %4584 }
 0x1a8   :  { %4374 = vmatprep.mubr.msk.f32.mxu1 %vm1048_vm1, %v4585_v40 }
 0x1a9   :  { %4375 = vmatmul.mubr.msk.f32.gmra.mrb[94].mxu1 %vm1048_vm1, %v4583_v39 }
 0x1c0   :  { %v5368_v41 = vpop.f32.mrb[0].mxu1 }
 0x1c1   :  { %v5370_v42 = vpop.f32.mrb[1].mxu1 }
 0x1c4   :  { %v5372_v43 = vpop.f32.mrb[2].mxu1 }
 0x1c5   :  { %v5374_v44 = vpop.f32.mrb[3].mxu1 }
 0x1c8   :  { %v5376_v45 = vpop.f32.mrb[4].mxu1 }
 0x1c9   :  { %v5378_v46 = vpop.f32.mrb[5].mxu1 }
 0x1cc   :  { %v5380_v47 = vpop.f32.mrb[6].mxu1 }
 0x1cd   :  { %v5382_v48 = vpop.f32.mrb[7].mxu1 }
 0x1d0   :  { %v5384_v49 = vpop.f32.mrb[8].mxu1 }
 0x1d1   :  { %7967 = vst [vmem:[#allocation2_spill] sm:$0xff] %v5384_v49  ;;  %v5386_v50 = vpop.f32.mrb[9].mxu1 }
 0x1d4   :  { %v5388_v51 = vpop.f32.mrb[10].mxu1 }
 0x1d5   :  { %v5390_v52 = vpop.f32.mrb[11].mxu1 }
 0x1d8   :  { %v5392_v53 = vpop.f32.mrb[12].mxu1 }
 0x1d9   :  { %v5394_v54 = vpop.f32.mrb[13].mxu1 }
 0x1dc   :  { %v5396_v56 = vpop.f32.mrb[14].mxu1 }
 0x1dd   :  { %7968 = vst [vmem:[#allocation3_spill] sm:$0xff] %v5396_v56  ;;  %v5398_v57 = vpop.f32.mrb[15].mxu1 }
 0x1de   :  { %7969 = vst [vmem:[#allocation4_spill] sm:$0xff] %v5398_v57 }
 0x1e0   :  { %v5400_v58 = vpop.f32.mrb[16].mxu1 }
 0x1e1   :  { %7970 = vst [vmem:[#allocation5_spill] sm:$0xff] %v5400_v58  ;;  %v5402_v59 = vpop.f32.mrb[17].mxu1 }
 0x1e2   :  { %7971 = vst [vmem:[#allocation6_spill] sm:$0xff] %v5402_v59 }
 0x1e4   :  { %v5404_v60 = vpop.f32.mrb[18].mxu1 }
 0x1e5   :  { %7972 = vst [vmem:[#allocation7_spill] sm:$0xff] %v5404_v60  ;;  %v5406_v61 = vpop.f32.mrb[19].mxu1 }
 0x1e6   :  { %7973 = vst [vmem:[#allocation8_spill] sm:$0xff] %v5406_v61 }
 0x1e8   :  { %v5408_v62 = vpop.f32.mrb[20].mxu1 }
 0x1e9   :  { %7974 = vst [vmem:[#allocation9_spill] sm:$0xff] %v5408_v62  ;;  %v5410_v63 = vpop.f32.mrb[21].mxu1 }
 0x1ea   :  { %7975 = vst [vmem:[#allocation10_spill] sm:$0xff] %v5410_v63 }
 0x1ec   :  { %v5412_v0 = vpop.f32.mrb[22].mxu1 }
 0x1ed   :  { %7976 = vst [vmem:[#allocation11_spill] sm:$0xff] %v5412_v0  ;;  %v5414_v1 = vpop.f32.mrb[23].mxu1 }
 0x1ee   :  { %7977 = vst [vmem:[#allocation12_spill] sm:$0xff] %v5414_v1 }
 0x1f0   :  { %v5416_v2 = vpop.f32.mrb[24].mxu1 }
 0x1f1   :  { %7978 = vst [vmem:[#allocation13_spill] sm:$0xff] %v5416_v2  ;;  %v5418_v3 = vpop.f32.mrb[25].mxu1 }
 0x1f2   :  { %7979 = vst [vmem:[#allocation14_spill] sm:$0xff] %v5418_v3 }
 0x1f4   :  { %v5420_v4 = vpop.f32.mrb[26].mxu1 }
 0x1f5   :  { %7980 = vst [vmem:[#allocation15_spill] sm:$0xff] %v5420_v4  ;;  %v5422_v5 = vpop.f32.mrb[27].mxu1 }
 0x1f6   :  { %7981 = vst [vmem:[#allocation16_spill] sm:$0xff] %v5422_v5 }
 0x1f8   :  { %v5424_v6 = vpop.f32.mrb[28].mxu1 }
 0x1f9   :  { %7982 = vst [vmem:[#allocation17_spill] sm:$0xff] %v5424_v6  ;;  %v5426_v7 = vpop.f32.mrb[29].mxu1 }
 0x1fa   :  { %7983 = vst [vmem:[#allocation18_spill] sm:$0xff] %v5426_v7 }
 0x1fc   :  { %v5428_v8 = vpop.f32.mrb[30].mxu1 }
 0x1fd   :  { %7984 = vst [vmem:[#allocation19_spill] sm:$0xff] %v5428_v8  ;;  %v5430_v9 = vpop.f32.mrb[31].mxu1 }
 0x1fe   :  { %7985 = vst [vmem:[#allocation20_spill] sm:$0xff] %v5430_v9 }
 0x200   :  { %v5432_v10 = vpop.f32.mrb[32].mxu1 }
 0x201   :  { %v5436_v12 = vpop.f32.mrb[33].mxu1  ;;  %v8008_v5 = vmax.f32 %v5368_v41, %v5432_v10 }
 0x202   :  { %v8009_v6 = vmax.f32 %v5370_v42, %v5436_v12 }
 0x204   :  { %v5440_v14 = vpop.f32.mrb[34].mxu1 }
 0x205   :  { %v5444_v16 = vpop.f32.mrb[35].mxu1 }
 0x208   :  { %v5448_v18 = vpop.f32.mrb[36].mxu1 }
 0x209   :  { %v5452_v20 = vpop.f32.mrb[37].mxu1 }
 0x20c   :  { %v5456_v22 = vpop.f32.mrb[38].mxu1 }
 0x20d   :  { %v5460_v24 = vpop.f32.mrb[39].mxu1 }
 0x210   :  { %v5464_v26 = vpop.f32.mrb[40].mxu1 }
 0x211   :  { %7986 = vst [vmem:[#allocation21_spill] sm:$0xff] %v5464_v26  ;;  %v5468_v28 = vpop.f32.mrb[41].mxu1 }
 0x214   :  { %v5472_v30 = vpop.f32.mrb[42].mxu1 }
 0x215   :  { %v5476_v32 = vpop.f32.mrb[43].mxu1 }
 0x216   :  { %7987 = vst [vmem:[#allocation22_spill] sm:$0xff] %v5476_v32  ;;  %v8028_v0 = vmax.f32 %v5390_v52, %v5476_v32 }
 0x218   :  { %v5480_v34 = vpop.f32.mrb[44].mxu1 }
 0x219   :  { %7988 = vst [vmem:[#allocation23_spill] sm:$0xff] %v5480_v34  ;;  %v5484_v36 = vpop.f32.mrb[45].mxu1 }
 0x21a   :  { %7989 = vst [vmem:[#allocation24_spill] sm:$0xff] %v5484_v36 }
 0x21c   :  { %v5488_v38 = vpop.f32.mrb[46].mxu1 }
 0x21d   :  { %7990 = vst [vmem:[#allocation25_spill] sm:$0xff] %v5488_v38  ;;  %v5492_v40 = vpop.f32.mrb[47].mxu1 }
 0x21e   :  { %7991 = vst [vmem:[#allocation26_spill] sm:$0xff] %v5492_v40 }
 0x220   :  { %v5496_v33 = vpop.f32.mrb[48].mxu1 }
 0x221   :  { %7992 = vst [vmem:[#allocation27_spill] sm:$0xff] %v5496_v33  ;;  %v5500_v31 = vpop.f32.mrb[49].mxu1 }
 0x222   :  { %7993 = vst [vmem:[#allocation28_spill] sm:$0xff] %v5500_v31  ;;  %v8047_v32 = vmax.f32 %v5402_v59, %v5500_v31 }
 0x224   :  { %v5504_v29 = vpop.f32.mrb[50].mxu1 }
 0x225   :  { %7994 = vst [vmem:[#allocation29_spill] sm:$0xff] %v5504_v29  ;;  %v5508_v27 = vpop.f32.mrb[51].mxu1 }
 0x226   :  { %7995 = vst [vmem:[#allocation30_spill] sm:$0xff] %v5508_v27 }
 0x228   :  { %v5512_v25 = vpop.f32.mrb[52].mxu1 }
 0x229   :  { %7996 = vst [vmem:[#allocation31_spill] sm:$0xff] %v5512_v25  ;;  %v5516_v23 = vpop.f32.mrb[53].mxu1 }
 0x22a   :  { %7997 = vst [vmem:[#allocation32_spill] sm:$0xff] %v5516_v23 }
 0x22c   :  { %v5520_v21 = vpop.f32.mrb[54].mxu1 }
 0x22d   :  { %7998 = vst [vmem:[#allocation33_spill] sm:$0xff] %v5520_v21  ;;  %v5524_v19 = vpop.f32.mrb[55].mxu1 }
 0x22e   :  { %7999 = vst [vmem:[#allocation34_spill] sm:$0xff] %v5524_v19 }
 0x230   :  { %v5528_v17 = vpop.f32.mrb[56].mxu1 }
 0x231   :  { %8000 = vst [vmem:[#allocation35_spill] sm:$0xff] %v5528_v17  ;;  %v5532_v15 = vpop.f32.mrb[57].mxu1 }
 0x232   :  { %8001 = vst [vmem:[#allocation36_spill] sm:$0xff] %v5532_v15 }
 0x234   :  { %v5536_v13 = vpop.f32.mrb[58].mxu1 }
 0x235   :  { %8002 = vst [vmem:[#allocation37_spill] sm:$0xff] %v5536_v13  ;;  %v5540_v11 = vpop.f32.mrb[59].mxu1 }
 0x236   :  { %8003 = vst [vmem:[#allocation38_spill] sm:$0xff] %v5540_v11 }
 0x238   :  { %v5544_v19 = vpop.f32.mrb[60].mxu1 }
 0x239   :  { %8004 = vst [vmem:[#allocation39_spill] sm:$0xff] %v5544_v19  ;;  %v5548_v17 = vpop.f32.mrb[61].mxu1 }
 0x23a   :  { %8005 = vst [vmem:[#allocation40_spill] sm:$0xff] %v5548_v17 }
 0x23c   :  { %v5552_v15 = vpop.f32.mrb[62].mxu1 }
 0x23d   :  { %8006 = vst [vmem:[#allocation41_spill] sm:$0xff] %v5552_v15  ;;  %v5556_v13 = vpop.f32.mrb[63].mxu1 }
 0x23e   :  { %8007 = vst [vmem:[#allocation42_spill] sm:$0xff] %v5556_v13 }
 0x240   :  { %v4331_v11 = vpop.f32.mrb[64].mxu1 }
 0x241   :  { %v1915_v35 = vmax.f32 %v8008_v5, %v4331_v11  ;;  %v1723_v19 = vpop.f32.mrb[65].mxu1  ;;  %v8010_v5 = vmax.f32 %v5372_v43, %v5440_v14 }
 0x242   :  { %v1914_v37 = vmax.f32 %v8009_v6, %v1723_v19 }
 0x243   :  { %v1947_v17 = vsub.f32 %v5368_v41, %v1915_v35  ;;  %v2043_v7 = vsub.f32 %v5432_v10, %v1915_v35  ;;  %v2139_v39 = vsub.f32 %v4331_v11, %v1915_v35  ;;  %v8012_v35 = vmax.f32 %v5376_v45, %v5448_v18 }
 0x244   :  { %v1946_v15 = vsub.f32 %v5370_v42, %v1914_v37  ;;  %v2042_v8 = vsub.f32 %v5436_v12, %v1914_v37  ;;  %v2138_v55 = vsub.f32 %v1723_v19, %v1914_v37  ;;  %v5570_v13 = vpop.f32.mrb[66].mxu1  ;;  %v8011_v12 = vmax.f32 %v5374_v44, %v5444_v16 }
 0x245   :  { %v1980_v9 = vmul.f32 1.442695, %v1947_v17  ;;  %v2076_v4 = vmul.f32 1.442695, %v2043_v7  ;;  %v5576_v3 = vmax.f32 %v8010_v5, %v5570_v13  ;;  %v5584_v11 = vpop.f32.mrb[67].mxu1 }
 0x246   :  { %v1978_v6 = vmul.f32 1.442695, %v1946_v15  ;;  %v2172_v7 = vmul.f32 1.442695, %v2139_v39  ;;  %v5590_v17 = vmax.f32 %v8011_v12, %v5584_v11  ;;  %v8013_v39 = vmax.f32 %v5378_v46, %v5452_v20 }
 0x247   :  { %4586 = vpow2.f32 %v1980_v9  ;;  %v1949_v41 = vsub.f32 %v5372_v43, %v5576_v3  ;;  %v2045_v42 = vsub.f32 %v5440_v14, %v5576_v3 }
 0x248   :  { %4588 = vpow2.f32 %v2076_v4  ;;  %v5592_v9 = vpop.f32.mrb[68].mxu1  ;;  %v2044_v14 = vsub.f32 %v5444_v16, %v5590_v17  ;;  %v2074_v4 = vmul.f32 1.442695, %v2042_v8  ;;  %v2170_v16 = vmul.f32 1.442695, %v2138_v55 }
 0x249   :  { %v5600_v19 = vpop.f32.mrb[69].mxu1  ;;  %4590 = vpow2.f32 %v1978_v6  ;;  %v5606_v37 = vmax.f32 %v8012_v35, %v5592_v9  ;;  %v8017_v8 = vmax.f32 %v5380_v47, %v5456_v22  ;;  %v8018_v35 = vmax.f32 %v5382_v48, %v5460_v24 }
 0x24a   :  { %v5612_v5 = vmax.f32 %v8013_v39, %v5600_v19  ;;  %4592 = vpow2.f32 %v2172_v7  ;;  %v8020_v55 = vmax.f32 %v5384_v49, %v5464_v26  ;;  %v1984_v21 = vmul.f32 1.442695, %v1949_v41 }
 0x24b   :  { %4594 = vpow2.f32 %v2074_v4  ;;  %v2080_v1 = vmul.f32 1.442695, %v2045_v42  ;;  %v8027_v42 = vmax.f32 %v5388_v51, %v5472_v30  ;;  %v2078_v49 = vmul.f32 1.442695, %v2044_v14 }
 0x24c   :  { %v5620_v12 = vpop.f32.mrb[70].mxu1  ;;  %4596 = vpow2.f32 %v2170_v16  ;;  %v8026_v16 = vmax.f32 %v5386_v50, %v5468_v28  ;;  %v8032_v14 = vsub.f32 %v5584_v11, %v5590_v17  ;;  %v8035_v11 = vmax.f32 %v5394_v54, %v5484_v36 }
 0x24d   :  { %8014 = vst [vmem:[#allocation43_spill] sm:$0xff] %v5620_v12  ;;  %v5628_v39 = vpop.f32.mrb[71].mxu1  ;;  %v5636_v6 = vmax.f32 %v8017_v8, %v5620_v12  ;;  %4598 = vpow2.f32 %v1984_v21 }
 0x24e   :  { %8015 = vst [vmem:[#allocation44_spill] sm:$0xff] %v5628_v39  ;;  %v5642_v43 = vmax.f32 %v8018_v35, %v5628_v39  ;;  %4600 = vpow2.f32 %v2080_v1 }
 0x24f   :  { %4602 = vpow2.f32 %v2078_v49 }
 0x250   :  { %v5644_v10 = vpop.f32.mrb[72].mxu1 }
 0x251   :  { %v5630_v15 = vpop.eup %4586  ;;  %8019 = vst [vmem:[#allocation46_spill] sm:$0xff] %v5644_v10  ;;  %v5652_v4 = vmax.f32 %v8020_v55, %v5644_v10  ;;  %v5654_v2 = vpop.f32.mrb[73].mxu1 }
 0x252   :  { %8016 = vst [vmem:[#allocation45_spill] sm:$0xff] %v5630_v15  ;;  %v5646_v7 = vpop.eup %4588  ;;  %8022 = vst [vmem:[#allocation48_spill] sm:$0xff] %v5654_v2  ;;  %2369 = vperm.xlu0 %4392, %v5630_v15  }
 0x253   :  { %8021 = vst [vmem:[#allocation47_spill] sm:$0xff] %v5652_v4  ;;  %2594 = vperm.xlu1 %4393, %v5646_v7   ;;  %v5672_v8 = vpop.eup %4590 }
 0x254   :  { %v5670_v15 = vpop.f32.mrb[74].mxu1  ;;  %8024 = vst [vmem:[#allocation50_spill] sm:$0xff] %v5672_v8  ;;  %v5674_v35 = vpop.eup %4592 }
 0x255   :  { %8023 = vst [vmem:[#allocation49_spill] sm:$0xff] %v5670_v15  ;;  %v5683_v12 = vpop.f32.mrb[75].mxu1  ;;  %v5696_v41 = vmax.f32 %v8027_v42, %v5670_v15  ;;  %v5706_v21 = vpop.eup %4594  ;;  %v8031_v42 = vsub.f32 %v5570_v13, %v5576_v3  ;;  %v8034_v3 = vmax.f32 %v5392_v53, %v5480_v34 }
 0x256   :  { %2364 = vperm.xlu0 %4392, %v5672_v8   ;;  %8025 = vst [vmem:[#allocation51_spill] sm:$0xff] %v5683_v12  ;;  %v5690_v8 = vmax.f32 %v8026_v16, %v5654_v2  ;;  %v5702_v55 = vmax.f32 %v8028_v0, %v5683_v12  ;;  %v5728_v2 = vpop.eup %4596  ;;  %v2174_v0 = vmul.f32 1.442695, %v8032_v14  ;;  %v8036_v14 = vmax.f32 %v5396_v56, %v5488_v38 }
 0x257   :  { %2851 = vperm.xlu1 %4393, %v5674_v35   ;;  %v2176_v26 = vmul.f32 1.442695, %v8031_v42 }
 0x258   :  { %v5704_v10 = vpop.f32.mrb[76].mxu1 }
 0x259   :  { %8029 = vst [vmem:[#allocation52_spill] sm:$0xff] %v5704_v10  ;;  %v5714_v4 = vpop.f32.mrb[77].mxu1  ;;  %v5746_v13 = vmax.f32 %v8034_v3, %v5704_v10  ;;  %4604 = vpow2.f32 %v2176_v26 }
 0x25a   :  { %8030 = vst [vmem:[#allocation53_spill] sm:$0xff] %v5714_v4  ;;  %2589 = vperm.xlu0 %4392, %v5706_v21   ;;  %v5752_v42 = vmax.f32 %v8035_v11, %v5714_v4  ;;  %4606 = vpow2.f32 %v2174_v0  ;;  %v8043_v4 = vmax.f32 %v5398_v57, %v5492_v40  ;;  %v8045_v11 = vmax.f32 %v5400_v58, %v5496_v33 }
 0x25b   :  { %3294 = vrot.lane.b32.xlu1 %v5646_v7, %s4843_s26 }
 0x25c   :  { %v5739_v1 = vpop.f32.mrb[78].mxu1 }
 0x25d   :  { %8033 = vst [vmem:[#allocation54_spill] sm:$0xff] %v5739_v1  ;;  %v5758_v15 = vmax.f32 %v8036_v14, %v5739_v1  ;;  %v5760_v16 = vpop.f32.mrb[79].mxu1  ;;  %v5772_v14 = vpop.eup %4598 }
 0x25e   :  { %2846 = vperm.xlu0 %4392, %v5728_v2   ;;  %8038 = vst [vmem:[#allocation56_spill] sm:$0xff] %v5760_v16  ;;  %8040 = vst [vmem:[#allocation58_spill] sm:$0xff] %v5772_v14  ;;  %v5793_v26 = vpop.eup %4600  ;;  %v5799_v0 = vmax.f32 %v8043_v4, %v5760_v16  ;;  %v8050_v4 = vsub.f32 %v5374_v44, %v5590_v17  ;;  %v8054_v16 = vsub.f32 %v5378_v46, %v5612_v5 }
 0x25f   :  { %8037 = vst [vmem:[#allocation55_spill] sm:$0xff] %v5758_v15  ;;  %3390 = vrot.lane.b32.xlu1 %v5674_v35, %s4844_s27  ;;  %v5829_v36 = vpop.eup %4602  ;;  %v8056_v46 = vmax.f32 %v5404_v60, %v5504_v29  ;;  %v8088_v29 = vsub.f32 %v5382_v48, %v5642_v43 }
 0x260   :  { %v5770_v39 = vpop.f32.mrb[80].mxu1  ;;  %8044 = vst [vmem:[#allocation61_spill] sm:$0xff] %v5799_v0  ;;  %v1982_v38 = vmul.f32 1.442695, %v8050_v4  ;;  %v1986_v34 = vmul.f32 1.442695, %v8054_v16 }
 0x261   :  { %8039 = vst [vmem:[#allocation57_spill] sm:$0xff] %v5770_v39  ;;  %v5780_v49 = vpop.f32.mrb[81].mxu1  ;;  %v5805_v56 = vmax.f32 %v8045_v11, %v5770_v39  ;;  %v8060_v39 = vmax.f32 %v5408_v62, %v5512_v25 }
 0x262   :  { %8041 = vst [vmem:[#allocation59_spill] sm:$0xff] %v5780_v49  ;;  %3292 = vrot.lane.b32.xlu0 %v5706_v21, %s4843_s26  ;;  %v5811_v3 = vmax.f32 %v8047_v32, %v5780_v49  ;;  %v8053_v32 = vsub.f32 %v5376_v45, %v5606_v37  ;;  %4608 = vpow2.f32 %v1982_v38  ;;  %v8058_v38 = vmax.f32 %v5406_v61, %v5508_v27  ;;  %v8108_v61 = vld [vmem:[#allocation21_spill] sm:$0xff] }
 0x263   :  { %2379 = vperm.xlu1 %4393, %v5772_v14   ;;  %8046 = vst [vmem:[#allocation62_spill] sm:$0xff] %v5805_v56  ;;  %v5839_v11 = vpop.eup %4604  ;;  %v8063_v49 = vsub.f32 %v5448_v18, %v5606_v37  ;;  %4610 = vpow2.f32 %v1986_v34  ;;  %v8068_v34 = vsub.f32 %v5592_v9, %v5606_v37  ;;  %v8123_v56 = vld [vmem:[#allocation46_spill] sm:$0xff] }
 0x264   :  { %v5791_v12 = vpop.f32.mrb[82].mxu1  ;;  %8048 = vst [vmem:[#allocation63_spill] sm:$0xff] %v5811_v3  ;;  %v1988_v15 = vmul.f32 1.442695, %v8053_v32  ;;  %v5857_v45 = vpop.eup %4606 }
 0x265   :  { %8042 = vst [vmem:[#allocation60_spill] sm:$0xff] %v5791_v12  ;;  %v5813_v1 = vpop.f32.mrb[83].mxu1  ;;  %v5863_v16 = vmax.f32 %v8056_v46, %v5791_v12  ;;  %v2084_v31 = vmul.f32 1.442695, %v8063_v49  ;;  %v8064_v46 = vsub.f32 %v5452_v20, %v5612_v5  ;;  %v2180_v20 = vmul.f32 1.442695, %v8068_v34 }
 0x266   :  { %8049 = vst [vmem:[#allocation64_spill] sm:$0xff] %v5813_v1  ;;  %3388 = vrot.lane.b32.xlu0 %v5728_v2, %s4844_s27  ;;  %v5869_v32 = vmax.f32 %v8058_v38, %v5813_v1  ;;  %4612 = vpow2.f32 %v1988_v15  ;;  %v8067_v15 = vsub.f32 %v5600_v19, %v5612_v5  ;;  %v8069_v19 = vmax.f32 %v5410_v63, %v5516_v23 }
 0x267   :  { %2604 = vperm.xlu1 %4393, %v5793_v26   ;;  %8057 = vst [vmem:[#allocation68_spill] sm:$0xff] %v5863_v16  ;;  %v2082_v3 = vmul.f32 1.442695, %v8064_v46 }
 0x268   :  { %v5827_v10 = vpop.f32.mrb[84].mxu1  ;;  %8059 = vst [vmem:[#allocation69_spill] sm:$0xff] %v5869_v32  ;;  %v2178_v59 = vmul.f32 1.442695, %v8067_v15  ;;  %v8072_v15 = vld [vmem:[#allocation33_spill] sm:$0xff] }
 0x269   :  { %8051 = vst [vmem:[#allocation65_spill] sm:$0xff] %v5827_v10  ;;  %v5837_v4 = vpop.f32.mrb[85].mxu1  ;;  %v5875_v44 = vmax.f32 %v8060_v39, %v5827_v10  ;;  %4614 = vpow2.f32 %v2082_v3  ;;  %v8080_v10 = vld [vmem:[#allocation13_spill] sm:$0xff]  ;;  %v1990_v32 = vmul.f32 1.442695, %v8088_v29  ;;  %v8094_v29 = vsub.f32 %v5456_v22, %v5636_v6 }
 0x26a   :  { %8052 = vst [vmem:[#allocation66_spill] sm:$0xff] %v5837_v4  ;;  %2599 = vperm.xlu0 %4392, %v5829_v36   ;;  %4616 = vpow2.f32 %v2084_v31  ;;  %v5926_v5 = vmax.f32 %v8069_v19, %v5837_v4  ;;  %v8071_v31 = vld [vmem:[#allocation11_spill] sm:$0xff]  ;;  %v8077_v19 = vld [vmem:[#allocation34_spill] sm:$0xff]  ;;  %v8100_v22 = vld [vmem:[#allocation17_spill] sm:$0xff] }
 0x26b   :  { %2861 = vperm.xlu1 %4393, %v5839_v11   ;;  %8061 = vst [vmem:[#allocation70_spill] sm:$0xff] %v5875_v44  ;;  %v8073_v39 = vmax.f32 %v8071_v31, %v8072_v15  ;;  %4618 = vpow2.f32 %v2178_v59  ;;  %v8081_v15 = vld [vmem:[#allocation35_spill] sm:$0xff]  ;;  %v8085_v44 = vld [vmem:[#allocation36_spill] sm:$0xff] }
 0x26c   :  { %v5855_v33 = vpop.f32.mrb[86].mxu1  ;;  %8070 = vst [vmem:[#allocation74_spill] sm:$0xff] %v5926_v5  ;;  %v5936_v34 = vpop.eup %4608  ;;  %4620 = vpow2.f32 %v2180_v20  ;;  %v8082_v4 = vmax.f32 %v8080_v10, %v8081_v15  ;;  %v8084_v5 = vld [vmem:[#allocation14_spill] sm:$0xff] }
 0x26d   :  { %8055 = vst [vmem:[#allocation67_spill] sm:$0xff] %v5855_v33  ;;  %v5877_v17 = vpop.f32.mrb[87].mxu1  ;;  %v5932_v9 = vmax.f32 %v8073_v39, %v5855_v33  ;;  %v5953_v59 = vpop.eup %4610  ;;  %v8076_v39 = vld [vmem:[#allocation12_spill] sm:$0xff]  ;;  %v8086_v62 = vmax.f32 %v8084_v5, %v8085_v44  ;;  %4622 = vpow2.f32 %v1990_v32 }
 0x26e   :  { %8062 = vst [vmem:[#allocation71_spill] sm:$0xff] %v5877_v17  ;;  %2856 = vperm.xlu0 %4392, %v5857_v45   ;;  %8075 = vst [vmem:[#allocation76_spill] sm:$0xff] %v5953_v59  ;;  %v8078_v18 = vmax.f32 %v8076_v39, %v8077_v19  ;;  %v8097_v44 = vld [vmem:[#allocation16_spill] sm:$0xff] }
 0x26f   :  { %3298 = vrot.lane.b32.xlu1 %v5793_v26, %s4843_s26  ;;  %8074 = vst [vmem:[#allocation75_spill] sm:$0xff] %v5932_v9 }
 0x270   :  { %v5900_v49 = vpop.f32.mrb[88].mxu1  ;;  %v5957_v63 = vpop.eup %4612  ;;  %v5966_v31 = vmax.f32 %v8078_v18, %v5877_v17  ;;  %v2088_v18 = vmul.f32 1.442695, %v8094_v29  ;;  %v8101_v29 = vld [vmem:[#allocation39_spill] sm:$0xff] }
 0x271   :  { %8065 = vst [vmem:[#allocation72_spill] sm:$0xff] %v5900_v49  ;;  %v5902_v46 = vpop.f32.mrb[89].mxu1  ;;  %v5973_v23 = vmax.f32 %v8082_v4, %v5900_v49  ;;  %v8089_v4 = vsub.f32 %v5380_v47, %v5636_v6  ;;  %v8090_v47 = vsub.f32 %v5460_v24, %v5642_v43  ;;  %v8092_v49 = vld [vmem:[#allocation37_spill] sm:$0xff]  ;;  %v8102_v32 = vmax.f32 %v8100_v22, %v8101_v29 }
 0x272   :  { %8066 = vst [vmem:[#allocation73_spill] sm:$0xff] %v5902_v46  ;;  %3296 = vrot.lane.b32.xlu0 %v5829_v36, %s4843_s26  ;;  %8079 = vst [vmem:[#allocation77_spill] sm:$0xff] %v5966_v31  ;;  %v5979_v1 = vmax.f32 %v8086_v62, %v5902_v46  ;;  %v8091_v62 = vld [vmem:[#allocation15_spill] sm:$0xff]  ;;  %v8120_v31 = vld [vmem:[#allocation42_spill] sm:$0xff] }
 0x273   :  { %3394 = vrot.lane.b32.xlu1 %v5839_v11, %s4844_s27  ;;  %8083 = vst [vmem:[#allocation78_spill] sm:$0xff] %v5973_v23  ;;  %v5983_v33 = vpop.eup %4614  ;;  %v1992_v19 = vmul.f32 1.442695, %v8089_v4  ;;  %v2086_v4 = vmul.f32 1.442695, %v8090_v47  ;;  %v8093_v15 = vmax.f32 %v8091_v62, %v8092_v49  ;;  %v8095_v47 = vld [vmem:[#allocation43_spill] sm:$0xff] }
 0x274   :  { %v5920_v38 = vpop.f32.mrb[90].mxu1  ;;  %8087 = vst [vmem:[#allocation79_spill] sm:$0xff] %v5979_v1  ;;  %v5989_v12 = vpop.eup %4616  ;;  %v8096_v48 = vsub.f32 %v8095_v47, %v5636_v6  ;;  %v8103_v6 = vld [vmem:[#allocation44_spill] sm:$0xff] }
 0x275   :  { %v5934_v37 = vpop.f32.mrb[91].mxu1  ;;  %v6007_v39 = vpop.eup %4618  ;;  %v6027_v23 = vmax.f32 %v8093_v15, %v5920_v38  ;;  %4624 = vpow2.f32 %v1992_v19  ;;  %v8098_v19 = vld [vmem:[#allocation38_spill] sm:$0xff]  ;;  %v8106_v15 = vld [vmem:[#allocation47_spill] sm:$0xff] }
 0x276   :  { %3392 = vrot.lane.b32.xlu0 %v5857_v45, %s4844_s27  ;;  %v6011_v27 = vpop.eup %4620  ;;  %v2184_v46 = vmul.f32 1.442695, %v8096_v48  ;;  %v8099_v1 = vmax.f32 %v8097_v44, %v8098_v19  ;;  %4626 = vpow2.f32 %v2086_v4  ;;  %v8104_v48 = vsub.f32 %v8103_v6, %v5642_v43  ;;  %v8113_v6 = vld [vmem:[#allocation40_spill] sm:$0xff] }
 0x277   :  { %2374 = vperm.xlu1 %4393, %v5936_v34   ;;  %4628 = vpow2.f32 %v2088_v18  ;;  %v8109_v4 = vsub.f32 %v8108_v61, %v8106_v15  ;;  %v8111_v61 = vsub.f32 %v5468_v28, %v5690_v8  ;;  %v6095_v18 = vpop.eup %4622  ;;  %v8117_v28 = vld [vmem:[#allocation41_spill] sm:$0xff] }
 0x278   :  { %v5951_v25 = vpop.f32.mrb[92].mxu1  ;;  %v6046_v5 = vmax.f32 %v8099_v1, %v5934_v37  ;;  %v2182_v47 = vmul.f32 1.442695, %v8104_v48  ;;  %v8105_v1 = vld [vmem:[#allocation2_spill] sm:$0xff]  ;;  %4630 = vpow2.f32 %v2184_v46  ;;  %8115 = vst [vmem:[#allocation15_spill] sm:$0xff] %v6095_v18 }
 0x279   :  { %v5955_v3 = vpop.f32.mrb[93].mxu1  ;;  %v6052_v10 = vmax.f32 %v8102_v32, %v5951_v25  ;;  %v8107_v24 = vsub.f32 %v8105_v1, %v8106_v15  ;;  %v2092_v16 = vmul.f32 1.442695, %v8109_v4  ;;  %v2090_v1 = vmul.f32 1.442695, %v8111_v61  ;;  %v8112_v46 = vld [vmem:[#allocation18_spill] sm:$0xff] }
 0x27a   :  { %2384 = vperm.xlu0 %4392, %v5953_v59   ;;  %4632 = vpow2.f32 %v2182_v47  ;;  %v8116_v47 = vld [vmem:[#allocation19_spill] sm:$0xff] }
 0x27b   :  { %2389 = vperm.xlu1 %4393, %v5957_v63   ;;  %v1996_v17 = vmul.f32 1.442695, %v8107_v24  ;;  %v8110_v24 = vsub.f32 %v5386_v50, %v5690_v8  ;;  %v8114_v50 = vmax.f32 %v8112_v46, %v8113_v6  ;;  %v8118_v61 = vmax.f32 %v8116_v47, %v8117_v28 }
 0x27c   :  { %v5981_v20 = vpop.f32.mrb[94].mxu1 }
 0x27d   :  { %v5987_v9 = vpop.f32.mrb[95].mxu1  ;;  %v1994_v48 = vmul.f32 1.442695, %v8110_v24  ;;  %4634 = vpow2.f32 %v1996_v17  ;;  %v6093_v24 = vmax.f32 %v8114_v50, %v5955_v3  ;;  %v6101_v43 = vmax.f32 %v8118_v61, %v5981_v20  ;;  %v8119_v17 = vld [vmem:[#allocation20_spill] sm:$0xff] }
 0x27e   :  { %2609 = vperm.xlu0 %4392, %v5983_v33   ;;  %4636 = vpow2.f32 %v2092_v16  ;;  %v8121_v32 = vmax.f32 %v8119_v17, %v8120_v31  ;;  %v8124_v50 = vsub.f32 %v8123_v56, %v8106_v15  ;;  %v8125_v16 = vld [vmem:[#allocation48_spill] sm:$0xff] }
 0x27f   :  { %2614 = vperm.xlu1 %4393, %v5989_v12   ;;  %v6109_v60 = vpop.eup %4624  ;;  %4638 = vpow2.f32 %v1994_v48  ;;  %v8126_v40 = vsub.f32 %v8125_v16, %v5690_v8  ;;  %v8127_v8 = vld [vmem:[#allocation45_spill] sm:$0xff]  ;;  %v2237_v16 = vadd.f32 %v5793_v26, %v5772_v14 }
 0x280   :  { %v6107_v4 = vmax.f32 %v8121_v32, %v5987_v9  ;;  %8122 = vst [vmem:[#allocation37_spill] sm:$0xff] %v6109_v60  ;;  %v2188_v58 = vmul.f32 1.442695, %v8124_v50  ;;  %4640 = vpow2.f32 %v2090_v1  ;;  %v2235_v15 = vadd.f32 %v5646_v7, %v8127_v8  ;;  %v4627_v48 = vpop.eup %4626  ;;  %v8129_v1 = vld [vmem:[#allocation50_spill] sm:$0xff] }
 0x281   :  { %v2186_v0 = vmul.f32 1.442695, %v8126_v40  ;;  %v4629_v50 = vpop.eup %4628  ;;  %v2236_v40 = vadd.f32 %v5936_v34, %v5829_v36 }
 0x282   :  { %2866 = vperm.xlu0 %4392, %v6007_v39   ;;  %4642 = vpow2.f32 %v2188_v58  ;;  %v4631_v57 = vpop.eup %4630  ;;  %v6140_v7 = vadd.f32 %v5674_v35, %v2235_v15  ;;  %v2239_v35 = vadd.f32 %v5989_v12, %v5957_v63  ;;  %v2238_v15 = vadd.f32 %v5983_v33, %v5953_v59 }
 0x283   :  { %2871 = vperm.xlu1 %4393, %v6011_v27   ;;  %4644 = vpow2.f32 %v2186_v0  ;;  %v2234_v0 = vadd.f32 %v5706_v21, %v8129_v1  ;;  %v6162_v21 = vadd.f32 %v5839_v11, %v2237_v16  ;;  %v6167_v14 = vadd.f32 %v5857_v45, %v2236_v40 }
 0x284   :  { %v4633_v58 = vpop.eup %4632  ;;  %v6170_v36 = vadd.f32 %v6011_v27, %v2239_v35 }
 0x285   :  { %v6159_v8 = vadd.f32 %v5728_v2, %v2234_v0  ;;  %v2241_v2 = vadd.f32 %v4629_v50, %v6109_v60 }
 0x286   :  { %3300 = vrot.lane.b32.xlu0 %v5983_v33, %s4843_s26  ;;  %v2240_v33 = vadd.f32 %v4627_v48, %v6095_v18 }
 0x287   :  { %3302 = vrot.lane.b32.xlu1 %v5989_v12, %s4843_s26  ;;  %v6142_v32 = vpop.eup %4634  ;;  %v6173_v12 = vadd.f32 %v6007_v39, %v2238_v15  ;;  %v6190_v0 = vadd.f32 %v4631_v57, %v2241_v2  ;;  %v8132_v15 = vsub.f32 %v8092_v49, %v6027_v23  ;;  %v8136_v49 = vsub.f32 %v5934_v37, %v6046_v5 }
 0x288   :  { %8128 = vst [vmem:[#allocation43_spill] sm:$0xff] %v6142_v32  ;;  %v6148_v61 = vpop.eup %4636  ;;  %v6192_v35 = vadd.f32 %v4633_v58, %v2240_v33  ;;  %v8134_v33 = vsub.f32 %v8097_v44, %v6046_v5  ;;  %v8138_v44 = vsub.f32 %v8101_v29, %v6052_v10  ;;  %v8143_v29 = vsub.f32 %v5955_v3, %v6093_v24 }
 0x289   :  { %v6156_v56 = vpop.eup %4638  ;;  %v2243_v11 = vadd.f32 %v6148_v61, %v6142_v32 }
 0x28a   :  { %3396 = vrot.lane.b32.xlu0 %v6007_v39, %s4844_s27  ;;  %8130 = vst [vmem:[#allocation16_spill] sm:$0xff] %v6156_v56  ;;  %v6164_v26 = vpop.eup %4640  ;;  %v8131_v39 = vsub.f32 %v8091_v62, %v6027_v23  ;;  %v8133_v62 = vsub.f32 %v5920_v38, %v6027_v23  ;;  %v2132_v38 = vmul.f32 1.442695, %v8138_v44  ;;  %v8155_v44 = vsub.f32 %v8120_v31, %v6107_v4 }
 0x28b   :  { %3398 = vrot.lane.b32.xlu1 %v6011_v27, %s4844_s27  ;;  %v2242_v27 = vadd.f32 %v6164_v26, %v6156_v56 }
 0x28c   :  { %v6181_v16 = vpop.eup %4642  ;;  %v2032_v40 = vmul.f32 1.442695, %v8131_v39  ;;  %v2224_v2 = vmul.f32 1.442695, %v8133_v62  ;;  %v2222_v39 = vmul.f32 1.442695, %v8136_v49  ;;  %v8152_v49 = vsub.f32 %v8119_v17, %v6107_v4 }
 0x28d   :  { %v6185_v45 = vpop.eup %4644  ;;  %v2226_v62 = vmul.f32 1.442695, %v8143_v29  ;;  %v8157_v17 = vsub.f32 %v5987_v9, %v6107_v4 }
 0x28e   :  { %2394 = vperm.xlu0 %4392, %v6095_v18   ;;  %v2128_v18 = vmul.f32 1.442695, %v8132_v15  ;;  %4646 = vpow2.f32 %v2032_v40 }
 0x28f   :  { %2399 = vperm.xlu1 %4393, %v6109_v60  }
 0x290   :  { %4648 = vpow2.f32 %v2128_v18 }
 0x291   :  { %4650 = vpow2.f32 %v2224_v2 }
 0x292   :  { %2619 = vperm.xlu0 %4392, %v4627_v48  }
 0x293   :  { %2624 = vperm.xlu1 %4393, %v4629_v50  }
 0x296   :  { %2876 = vperm.xlu0 %4392, %v4633_v58  }
 0x297   :  { %2881 = vperm.xlu1 %4393, %v4631_v57  }
 0x298   :  { %v6229_v40 = vpop.eup %4646 }
 0x299   :  { %8141 = vst [vmem:[#allocation38_spill] sm:$0xff] %v6229_v40 }
 0x29a   :  { %3304 = vrot.lane.b32.xlu0 %v4627_v48, %s4843_s26  ;;  %v6195_v48 = vadd.f32 %v6181_v16, %v2243_v11  ;;  %v2030_v11 = vmul.f32 1.442695, %v8134_v33  ;;  %v6237_v2 = vpop.eup %4648 }
 0x29b   :  { %3306 = vrot.lane.b32.xlu1 %v4629_v50, %s4843_s26  ;;  %v6199_v50 = vadd.f32 %v6185_v45, %v2242_v27  ;;  %8144 = vst [vmem:[#allocation17_spill] sm:$0xff] %v6237_v2  ;;  %v2261_v33 = vadd.f32 %v6237_v2, %v6229_v40 }
 0x29c   :  { %4652 = vpow2.f32 %v2030_v11 }
 0x29e   :  { %3400 = vrot.lane.b32.xlu0 %v4633_v58, %s4844_s27  ;;  %v8135_v58 = vsub.f32 %v8098_v19, %v6046_v5  ;;  %v8139_v19 = vsub.f32 %v5951_v25, %v6052_v10  ;;  %v8140_v5 = vsub.f32 %v8112_v46, %v6093_v24  ;;  %v8145_v25 = vsub.f32 %v8116_v47, %v6101_v43  ;;  %v6242_v46 = vpop.eup %4650 }
 0x29f   :  { %3402 = vrot.lane.b32.xlu1 %v4631_v57, %s4844_s27  ;;  %v8137_v57 = vsub.f32 %v8100_v22, %v6052_v10  ;;  %v8142_v22 = vsub.f32 %v8113_v6, %v6093_v24  ;;  %8146 = vst [vmem:[#allocation39_spill] sm:$0xff] %v6242_v46  ;;  %v8148_v6 = vsub.f32 %v8117_v28, %v6101_v43 }
 0x2a0   :  { %v2126_v27 = vmul.f32 1.442695, %v8135_v58  ;;  %v2228_v18 = vmul.f32 1.442695, %v8139_v19  ;;  %v2034_v37 = vmul.f32 1.442695, %v8140_v5  ;;  %v6252_v24 = vadd.f32 %v6242_v46, %v2261_v33 }
 0x2a1   :  { %v2036_v23 = vmul.f32 1.442695, %v8137_v57  ;;  %v2130_v15 = vmul.f32 1.442695, %v8142_v22  ;;  %v2040_v10 = vmul.f32 1.442695, %v8145_v25  ;;  %v8150_v47 = vsub.f32 %v5981_v20, %v6101_v43 }
 0x2a2   :  { %4654 = vpow2.f32 %v2126_v27  ;;  %v2136_v3 = vmul.f32 1.442695, %v8148_v6  ;;  %8149 = vst [vmem:[#allocation2_spill] sm:$0xff] %v6252_v24  ;;  %v2134_v20 = vmul.f32 1.442695, %v8155_v44  ;;  %v8200_v24 = vld [vmem:[#allocation61_spill] sm:$0xff] }
 0x2a3   :  { %4656 = vpow2.f32 %v2222_v39  ;;  %v2232_v58 = vmul.f32 1.442695, %v8150_v47  ;;  %v2038_v39 = vmul.f32 1.442695, %v8152_v49  ;;  %v8216_v46 = vld [vmem:[#allocation63_spill] sm:$0xff] }
 0x2a4   :  { %4658 = vpow2.f32 %v2036_v23 }
 0x2a5   :  { %4660 = vpow2.f32 %v2132_v38  ;;  %v2230_v38 = vmul.f32 1.442695, %v8157_v17  ;;  %v8174_v17 = vsub.f32 %v5390_v52, %v5702_v55  ;;  %v8176_v52 = vld [vmem:[#allocation22_spill] sm:$0xff] }
 0x2a6   :  { %4662 = vpow2.f32 %v2228_v18  ;;  %v6246_v11 = vpop.eup %4652 }
 0x2a7   :  { %4664 = vpow2.f32 %v2034_v37  ;;  %8147 = vst [vmem:[#allocation44_spill] sm:$0xff] %v6246_v11 }
 0x2a8   :  { %4666 = vpow2.f32 %v2130_v15 }
 0x2a9   :  { %4668 = vpow2.f32 %v2226_v62 }
 0x2aa   :  { %4670 = vpow2.f32 %v2040_v10 }
 0x2ab   :  { %4672 = vpow2.f32 %v2136_v3 }
 0x2ac   :  { %v6257_v27 = vpop.eup %4654  ;;  %4674 = vpow2.f32 %v2232_v58 }
 0x2ad   :  { %8151 = vst [vmem:[#allocation47_spill] sm:$0xff] %v6257_v27  ;;  %v6262_v57 = vpop.eup %4656  ;;  %v2260_v28 = vadd.f32 %v6257_v27, %v6246_v11  ;;  %4676 = vpow2.f32 %v2038_v39  ;;  %v8173_v39 = vsub.f32 %v5388_v51, %v5696_v41  ;;  %v8175_v51 = vsub.f32 %v5472_v30, %v5696_v41  ;;  %v8220_v11 = vld [vmem:[#allocation28_spill] sm:$0xff] }
 0x2ae   :  { %8153 = vst [vmem:[#allocation21_spill] sm:$0xff] %v6262_v57  ;;  %v6266_v23 = vpop.eup %4658  ;;  %4678 = vpow2.f32 %v2134_v20 }
 0x2af   :  { %8154 = vst [vmem:[#allocation18_spill] sm:$0xff] %v6266_v23  ;;  %v6272_v43 = vadd.f32 %v6262_v57, %v2260_v28  ;;  %v6277_v19 = vpop.eup %4660  ;;  %4680 = vpow2.f32 %v2230_v38  ;;  %v2000_v28 = vmul.f32 1.442695, %v8173_v39  ;;  %v1998_v38 = vmul.f32 1.442695, %v8174_v17  ;;  %v8180_v39 = vld [vmem:[#allocation51_spill] sm:$0xff] }
 0x2b0   :  { %8158 = vst [vmem:[#allocation19_spill] sm:$0xff] %v6277_v19  ;;  %v6279_v18 = vpop.eup %4662  ;;  %v2263_v5 = vadd.f32 %v6277_v19, %v6266_v23  ;;  %4682 = vrcp.f32 %v6140_v7  ;;  %v8215_v57 = vld [vmem:[#allocation6_spill] sm:$0xff] }
 0x2b1   :  { %8156 = vst [vmem:[#allocation40_spill] sm:$0xff] %v6272_v43  ;;  %8159 = vst [vmem:[#allocation41_spill] sm:$0xff] %v6279_v18  ;;  %v6283_v37 = vpop.eup %4664  ;;  %4684 = vrcp.f32 %v6159_v8  ;;  %v8217_v27 = vsub.f32 %v8215_v57, %v8216_v46  ;;  %v8221_v57 = vsub.f32 %v8220_v11, %v8216_v46 }
 0x2b2   :  { %8160 = vst [vmem:[#allocation20_spill] sm:$0xff] %v6283_v37  ;;  %v6286_v31 = vadd.f32 %v6279_v18, %v2263_v5  ;;  %v6288_v22 = vpop.eup %4666  ;;  %4686 = vrcp.f32 %v6162_v21  ;;  %v2096_v21 = vmul.f32 1.442695, %v8175_v51 }
 0x2b3   :  { %8162 = vst [vmem:[#allocation46_spill] sm:$0xff] %v6288_v22  ;;  %v6291_v9 = vpop.eup %4668  ;;  %v2262_v4 = vadd.f32 %v6288_v22, %v6283_v37  ;;  %4688 = vrcp.f32 %v6167_v14  ;;  %v2010_v2 = vmul.f32 1.442695, %v8217_v27  ;;  %v2106_v27 = vmul.f32 1.442695, %v8221_v57 }
 0x2b4   :  { %8161 = vst [vmem:[#allocation42_spill] sm:$0xff] %v6286_v31  ;;  %8163 = vst [vmem:[#allocation48_spill] sm:$0xff] %v6291_v9  ;;  %v6295_v15 = vpop.eup %4670  ;;  %4690 = vpow2.f32 %v2000_v28  ;;  %v8181_v28 = vsub.f32 %v8180_v39, %v5702_v55  ;;  %v8185_v39 = vsub.f32 %v5394_v54, %v5752_v42 }
 0x2b5   :  { %8164 = vst [vmem:[#allocation50_spill] sm:$0xff] %v6295_v15  ;;  %v6299_v29 = vadd.f32 %v6291_v9, %v2262_v4  ;;  %v6301_v62 = vpop.eup %4672  ;;  %4692 = vpow2.f32 %v1998_v38 }
 0x2b6   :  { %8166 = vst [vmem:[#allocation81_spill] sm:$0xff] %v6301_v62  ;;  %v6303_v25 = vpop.eup %4674  ;;  %v2265_v10 = vadd.f32 %v6301_v62, %v6295_v15  ;;  %4694 = vpow2.f32 %v2096_v21  ;;  %v2190_v17 = vmul.f32 1.442695, %v8181_v28  ;;  %v2002_v28 = vmul.f32 1.442695, %v8185_v39  ;;  %v8204_v15 = vld [vmem:[#allocation26_spill] sm:$0xff] }
 0x2b7   :  { %8165 = vst [vmem:[#allocation80_spill] sm:$0xff] %v6299_v29  ;;  %8167 = vst [vmem:[#allocation82_spill] sm:$0xff] %v6303_v25  ;;  %v6307_v7 = vpop.eup %4676 }
 0x2b8   :  { %8168 = vst [vmem:[#allocation83_spill] sm:$0xff] %v6307_v7  ;;  %v6310_v33 = vadd.f32 %v6303_v25, %v2265_v10  ;;  %v6312_v6 = vpop.eup %4678  ;;  %v8177_v10 = vsub.f32 %v8176_v52, %v5702_v55 }
 0x2b9   :  { %8170 = vst [vmem:[#allocation85_spill] sm:$0xff] %v6312_v6  ;;  %v6314_v3 = vpop.eup %4680  ;;  %v2264_v8 = vadd.f32 %v6312_v6, %v6307_v7  ;;  %v8199_v6 = vld [vmem:[#allocation4_spill] sm:$0xff] }
 0x2ba   :  { %8169 = vst [vmem:[#allocation84_spill] sm:$0xff] %v6310_v33  ;;  %8171 = vst [vmem:[#allocation86_spill] sm:$0xff] %v6314_v3  ;;  %v4683_v47 = vpop.eup %4682  ;;  %v2094_v14 = vmul.f32 1.442695, %v8177_v10  ;;  %v8201_v25 = vsub.f32 %v8199_v6, %v8200_v24  ;;  %v8205_v6 = vsub.f32 %v8204_v15, %v8200_v24 }
 0x2bb   :  { %v6319_v58 = vadd.f32 %v6314_v3, %v2264_v8  ;;  %3075 = vperm.xlu1 %4393, %v4683_v47   ;;  %v4685_v49 = vpop.eup %4684 }
 0x2bc   :  { %3070 = vperm.xlu0 %4392, %v4685_v49   ;;  %v4687_v49 = vpop.eup %4686  ;;  %4696 = vpow2.f32 %v2094_v14  ;;  %v2006_v7 = vmul.f32 1.442695, %v8201_v25  ;;  %v2102_v25 = vmul.f32 1.442695, %v8205_v6 }
 0x2bd   :  { %8172 = vst [vmem:[#allocation87_spill] sm:$0xff] %v6319_v58 }
 0x2bf   :  { %2409 = vperm.xlu1 %4393, %v6142_v32  }
 0x2c0   :  { %2404 = vperm.xlu0 %4392, %v6156_v56  }
 0x2c3   :  { %2634 = vperm.xlu1 %4393, %v6148_v61  }
 0x2c4   :  { %2629 = vperm.xlu0 %4392, %v6164_v26  }
 0x2c7   :  { %2891 = vperm.xlu1 %4393, %v6181_v16  }
 0x2c8   :  { %2886 = vperm.xlu0 %4392, %v6185_v45  }
 0x2cb   :  { %3310 = vrot.lane.b32.xlu1 %v6148_v61, %s4843_s26  ;;  %v8178_v61 = vld [vmem:[#allocation49_spill] sm:$0xff] }
 0x2cc   :  { %3308 = vrot.lane.b32.xlu0 %v6164_v26, %s4843_s26  ;;  %v8179_v30 = vsub.f32 %v8178_v61, %v5696_v41 }
 0x2ce   :  { %v2192_v8 = vmul.f32 1.442695, %v8179_v30  ;;  %v8184_v30 = vsub.f32 %v5392_v53, %v5746_v13  ;;  %v8186_v53 = vld [vmem:[#allocation23_spill] sm:$0xff] }
 0x2cf   :  { %3406 = vrot.lane.b32.xlu1 %v6181_v16, %s4844_s27  ;;  %v4689_v16 = vpop.eup %4688 }
 0x2d0   :  { %3404 = vrot.lane.b32.xlu0 %v6185_v45, %s4844_s27  ;;  %4698 = vpow2.f32 %v2192_v8  ;;  %v6369_v41 = vpop.eup %4690  ;;  %v2004_v8 = vmul.f32 1.442695, %v8184_v30  ;;  %v8188_v30 = vld [vmem:[#allocation24_spill] sm:$0xff] }
 0x2d1   :  { %v6330_v44 = vpop.permute.xlu0 %2369  ;;  %8182 = vst [vmem:[#allocation22_spill] sm:$0xff] %v6369_v41  ;;  %4700 = vpow2.f32 %v2190_v17  ;;  %v6374_v45 = vpop.eup %4692  ;;  %v8189_v54 = vsub.f32 %v8188_v30, %v5752_v42 }
 0x2d2   :  { %v6333_v20 = vpop.permute.xlu1 %2594  ;;  %8183 = vst [vmem:[#allocation49_spill] sm:$0xff] %v6374_v45  ;;  %v6377_v21 = vpop.eup %4694  ;;  %4702 = vrcp.f32 %v6170_v36 }
 0x2d3   :  { %3085 = vperm.xlu1 %4393, %v4687_v49   ;;  %v6382_v52 = vpop.eup %4696  ;;  %4704 = vrcp.f32 %v6173_v12  ;;  %v2098_v39 = vmul.f32 1.442695, %v8189_v54  ;;  %v8190_v12 = vld [vmem:[#allocation52_spill] sm:$0xff] }
 0x2d4   :  { %3080 = vperm.xlu0 %4392, %v4689_v16   ;;  %4706 = vpow2.f32 %v2004_v8  ;;  %v8187_v16 = vsub.f32 %v8186_v53, %v5746_v13  ;;  %v8191_v8 = vsub.f32 %v8190_v12, %v5746_v13 }
 0x2d5   :  { %v6344_v5 = vpop.permute.xlu0 %2364  ;;  %4708 = vpow2.f32 %v2002_v28 }
 0x2d6   :  { %v6348_v4 = vpop.permute.xlu1 %2851  ;;  %v2100_v36 = vmul.f32 1.442695, %v8187_v16  ;;  %v2196_v29 = vmul.f32 1.442695, %v8191_v8  ;;  %v8192_v16 = vld [vmem:[#allocation53_spill] sm:$0xff] }
 0x2d7   :  { %2419 = vperm.xlu1 %4393, %v6369_v41   ;;  %v8193_v30 = vsub.f32 %v8192_v16, %v5752_v42  ;;  %v8196_v16 = vld [vmem:[#allocation3_spill] sm:$0xff] }
 0x2d8   :  { %2414 = vperm.xlu0 %4392, %v6374_v45   ;;  %4710 = vpow2.f32 %v2100_v36 }
 0x2d9   :  { %v6358_v47 = vpop.permute.xlu0 %2589  ;;  %4712 = vpow2.f32 %v2098_v39  ;;  %v2194_v54 = vmul.f32 1.442695, %v8193_v30  ;;  %v8197_v30 = vld [vmem:[#allocation55_spill] sm:$0xff] }
 0x2da   :  { %v6362_v26 = vpop.permute.xlu1 %3294  ;;  %v6387_v14 = vpop.eup %4698  ;;  %4714 = vpow2.f32 %v2196_v29 }
 0x2db   :  { %2644 = vperm.xlu1 %4393, %v6377_v21   ;;  %v6390_v61 = vpop.eup %4700  ;;  %4716 = vpow2.f32 %v2194_v54  ;;  %v8198_v54 = vsub.f32 %v8196_v16, %v8197_v30  ;;  %v8202_v16 = vld [vmem:[#allocation25_spill] sm:$0xff] }
 0x2dc   :  { %2639 = vperm.xlu0 %4392, %v6382_v52   ;;  %v4703_v28 = vpop.eup %4702  ;;  %4718 = vrcp.f32 %v6190_v0 }
 0x2dd   :  { %v6371_v51 = vpop.permute.xlu0 %2846  ;;  %v4705_v33 = vpop.eup %4704  ;;  %v2008_v3 = vmul.f32 1.442695, %v8198_v54  ;;  %4720 = vrcp.f32 %v6192_v35  ;;  %v8203_v54 = vsub.f32 %v8202_v16, %v8197_v30  ;;  %v8206_v35 = vld [vmem:[#allocation54_spill] sm:$0xff] }
 0x2de   :  { %v6367_v38 = vpop.permute.xlu1 %3390  ;;  %v6431_v36 = vpop.eup %4706 }
 0x2df   :  { %2901 = vperm.xlu1 %4393, %v6387_v14   ;;  %8194 = vst [vmem:[#allocation51_spill] sm:$0xff] %v6431_v36  ;;  %v6436_v12 = vpop.eup %4708  ;;  %4722 = vpow2.f32 %v2008_v3  ;;  %v2104_v0 = vmul.f32 1.442695, %v8203_v54  ;;  %v8207_v3 = vsub.f32 %v8206_v35, %v8197_v30  ;;  %v8208_v54 = vld [vmem:[#allocation56_spill] sm:$0xff] }
 0x2e0   :  { %2896 = vperm.xlu0 %4392, %v6390_v61   ;;  %8195 = vst [vmem:[#allocation23_spill] sm:$0xff] %v6436_v12  ;;  %4724 = vpow2.f32 %v2006_v7  ;;  %v8209_v15 = vsub.f32 %v8208_v54, %v8200_v24  ;;  %v8212_v54 = vld [vmem:[#allocation5_spill] sm:$0xff] }
 0x2e1   :  { %v6384_v10 = vpop.permute.xlu0 %3292  ;;  %4726 = vpow2.f32 %v2104_v0  ;;  %v2200_v18 = vmul.f32 1.442695, %v8207_v3 }
 0x2e2   :  { %v6379_v55 = vpop.permute.xlu1 %2379  ;;  %v6439_v39 = vpop.eup %4710  ;;  %4728 = vpow2.f32 %v2102_v25  ;;  %v2198_v6 = vmul.f32 1.442695, %v8209_v15  ;;  %v8213_v15 = vld [vmem:[#allocation62_spill] sm:$0xff] }
 0x2e3   :  { %3314 = vrot.lane.b32.xlu1 %v6377_v21, %s4843_s26  ;;  %v6444_v29 = vpop.eup %4712  ;;  %4730 = vpow2.f32 %v2200_v18 }
 0x2e4   :  { %3312 = vrot.lane.b32.xlu0 %v6382_v52, %s4843_s26  ;;  %v6449_v8 = vpop.eup %4714  ;;  %4732 = vpow2.f32 %v2198_v6  ;;  %v8214_v6 = vsub.f32 %v8212_v54, %v8213_v15  ;;  %v8218_v54 = vld [vmem:[#allocation27_spill] sm:$0xff] }
 0x2e5   :  { %v6403_v17 = vpop.permute.xlu0 %3388  ;;  %4734 = vrcp.f32 %v6195_v48 }
 0x2e6   :  { %v6396_v49 = vpop.permute.xlu1 %2604  ;;  %v2012_v37 = vmul.f32 1.442695, %v8214_v6  ;;  %4736 = vrcp.f32 %v6199_v50  ;;  %v8219_v6 = vsub.f32 %v8218_v54, %v8213_v15  ;;  %v8222_v50 = vld [vmem:[#allocation57_spill] sm:$0xff] }
 0x2e7   :  { %3410 = vrot.lane.b32.xlu1 %v6387_v14, %s4844_s27 }
 0x2e8   :  { %3408 = vrot.lane.b32.xlu0 %v6390_v61, %s4844_s27  ;;  %4738 = vpow2.f32 %v2012_v37  ;;  %v2108_v48 = vmul.f32 1.442695, %v8219_v6  ;;  %v8223_v37 = vsub.f32 %v8222_v50, %v8213_v15  ;;  %v8225_v6 = vld [vmem:[#allocation59_spill] sm:$0xff] }
 0x2e9   :  { %v6422_v53 = vpop.permute.xlu0 %2599  ;;  %4740 = vpow2.f32 %v2010_v2  ;;  %v8226_v11 = vsub.f32 %v8225_v6, %v8216_v46 }
 0x2ea   :  { %v6415_v58 = vpop.permute.xlu1 %2861  ;;  %4742 = vpow2.f32 %v2108_v48  ;;  %v2204_v40 = vmul.f32 1.442695, %v8223_v37 }
 0x2eb   :  { %3095 = vperm.xlu1 %4393, %v4703_v28   ;;  %v6452_v28 = vpop.eup %4716  ;;  %4744 = vpow2.f32 %v2106_v27  ;;  %v2202_v57 = vmul.f32 1.442695, %v8226_v11  ;;  %v2245_v27 = vadd.f32 %v6377_v21, %v6369_v41 }
 0x2ec   :  { %3090 = vperm.xlu0 %4392, %v4705_v33   ;;  %v4719_v7 = vpop.eup %4718  ;;  %4746 = vpow2.f32 %v2204_v40  ;;  %v2244_v40 = vadd.f32 %v6382_v52, %v6374_v45  ;;  %v8232_v52 = vld [vmem:[#allocation7_spill] sm:$0xff]  ;;  %v8233_v45 = vld [vmem:[#allocation68_spill] sm:$0xff] }
 0x2ed   :  { %v6433_v13 = vpop.permute.xlu0 %2856  ;;  %v4721_v22 = vpop.eup %4720  ;;  %4748 = vpow2.f32 %v2202_v57  ;;  %v8234_v41 = vsub.f32 %v8232_v52, %v8233_v45 }
 0x2ee   :  { %v6429_v43 = vpop.permute.xlu1 %3298  ;;  %v6493_v0 = vpop.eup %4722  ;;  %v2276_v11 = vadd.f32 %v6390_v61, %v2244_v40  ;;  %v8240_v61 = vld [vmem:[#allocation29_spill] sm:$0xff] }
 0x2ef   :  { %2429 = vperm.xlu1 %4393, %v6431_v36   ;;  %8210 = vst [vmem:[#allocation24_spill] sm:$0xff] %v6493_v0  ;;  %v6498_v35 = vpop.eup %4724  ;;  %v8241_v40 = vsub.f32 %v8240_v61, %v8233_v45  ;;  %v3816_v61 = vld [vmem:[%s7795_s0 + $0x108] sm:$0xff] }
 0x2f0   :  { %2424 = vperm.xlu0 %4392, %v6436_v12   ;;  %8211 = vst [vmem:[#allocation52_spill] sm:$0xff] %v6498_v35  ;;  %v6501_v25 = vpop.eup %4726 }
 0x2f1   :  { %v6446_v33 = vpop.permute.xlu0 %3296  ;;  %v6506_v18 = vpop.eup %4728 }
 0x2f2   :  { %v6441_v42 = vpop.permute.xlu1 %3394  ;;  %v6511_v3 = vpop.eup %4730 }
 0x2f3   :  { %2654 = vperm.xlu1 %4393, %v6439_v39  }
 0x2f4   :  { %2649 = vperm.xlu0 %4392, %v6444_v29  }
 0x2f5   :  { %v6465_v62 = vpop.permute.xlu0 %3392 }
 0x2f6   :  { %v6458_v31 = vpop.permute.xlu1 %2374 }
 0x2f7   :  { %2911 = vperm.xlu1 %4393, %v6449_v8  }
 0x2f8   :  { %2906 = vperm.xlu0 %4392, %v6452_v28  }
 0x2f9   :  { %v6484_v16 = vpop.permute.xlu0 %2384 }
 0x2fa   :  { %v6477_v9 = vpop.permute.xlu1 %2389 }
 0x2fb   :  { %3318 = vrot.lane.b32.xlu1 %v6439_v39, %s4843_s26 }
 0x2fc   :  { %3316 = vrot.lane.b32.xlu0 %v6444_v29, %s4843_s26 }
 0x2fd   :  { %v6495_v30 = vpop.permute.xlu0 %2609 }
 0x2fe   :  { %v6491_v19 = vpop.permute.xlu1 %2614 }
 0x2ff   :  { %3414 = vrot.lane.b32.xlu1 %v6449_v8, %s4844_s27 }
 0x300   :  { %3412 = vrot.lane.b32.xlu0 %v6452_v28, %s4844_s27 }
 0x302   :  { %v6503_v24 = vpop.permute.xlu1 %2871 }
 0x303   :  { %3105 = vperm.xlu1 %4393, %v4719_v7   ;;  %v6514_v7 = vpop.eup %4732 }
 0x304   :  { %3100 = vperm.xlu0 %4392, %v4721_v22   ;;  %v6508_v22 = vpop.permute.xlu0 %2866  ;;  %v4735_v2 = vpop.eup %4734 }
 0x305   :  { %v4737_v60 = vpop.eup %4736 }
 0x306   :  { %v6520_v23 = vpop.permute.xlu1 %3302  ;;  %v6555_v48 = vpop.eup %4738 }
 0x307   :  { %2439 = vperm.xlu1 %4393, %v6493_v0   ;;  %v6560_v50 = vpop.eup %4740 }
 0x308   :  { %2434 = vperm.xlu0 %4392, %v6498_v35   ;;  %v6527_v56 = vpop.permute.xlu0 %3300  ;;  %v6565_v46 = vpop.eup %4742 }
 0x309   :  { %v6572_v37 = vpop.eup %4744 }
 0x30a   :  { %v6539_v32 = vpop.permute.xlu1 %3398  ;;  %v6578_v21 = vpop.eup %4746 }
 0x30b   :  { %2664 = vperm.xlu1 %4393, %v6501_v25   ;;  %v6582_v57 = vpop.eup %4748 }
 0x30c   :  { %2659 = vperm.xlu0 %4392, %v6506_v18   ;;  %v6546_v54 = vpop.permute.xlu0 %3396  ;;  %8231 = vst [vmem:[#allocation25_spill] sm:$0xff] %v6582_v57 }
 0x30d   :  { %8224 = vst [vmem:[#allocation53_spill] sm:$0xff] %v6546_v54 }
 0x30e   :  { %v6553_v59 = vpop.permute.xlu1 %2399 }
 0x30f   :  { %2921 = vperm.xlu1 %4393, %v6511_v3   ;;  %8227 = vst [vmem:[#allocation3_spill] sm:$0xff] %v6553_v59 }
 0x310   :  { %2916 = vperm.xlu0 %4392, %v6514_v7   ;;  %v6557_v15 = vpop.permute.xlu0 %2394 }
 0x311   :  { %8228 = vst [vmem:[#allocation55_spill] sm:$0xff] %v6557_v15  ;;  %v2016_v15 = vmul.f32 1.442695, %v8234_v41  ;;  %v8242_v41 = vld [vmem:[#allocation30_spill] sm:$0xff] }
 0x313   :  { %3322 = vrot.lane.b32.xlu1 %v6501_v25, %s4843_s26 }
 0x314   :  { %3320 = vrot.lane.b32.xlu0 %v6506_v18, %s4843_s26  ;;  %v6575_v6 = vpop.permute.xlu0 %2619 }
 0x315   :  { %8230 = vst [vmem:[#allocation61_spill] sm:$0xff] %v6575_v6 }
 0x317   :  { %3418 = vrot.lane.b32.xlu1 %v6511_v3, %s4844_s27 }
 0x318   :  { %3416 = vrot.lane.b32.xlu0 %v6514_v7, %s4844_s27  ;;  %v6593_v54 = vpop.permute.xlu0 %2876 }
 0x319   :  { %8239 = vst [vmem:[#allocation54_spill] sm:$0xff] %v6593_v54 }
 0x31b   :  { %3115 = vperm.xlu1 %4393, %v4735_v2   ;;  %v2277_v2 = vadd.f32 %v6387_v14, %v2245_v27  ;;  %v8236_v14 = vld [vmem:[#allocation8_spill] sm:$0xff]  ;;  %v8237_v27 = vld [vmem:[#allocation69_spill] sm:$0xff] }
 0x31c   :  { %3110 = vperm.xlu0 %4392, %v4737_v60   ;;  %v6569_v60 = vpop.permute.xlu1 %2624  ;;  %v8238_v6 = vsub.f32 %v8236_v14, %v8237_v27 }
 0x31d   :  { %8229 = vst [vmem:[#allocation4_spill] sm:$0xff] %v6569_v60  ;;  %4750 = vrcp.f32 %v2277_v2  ;;  %v2112_v2 = vmul.f32 1.442695, %v8241_v40  ;;  %v6618_v40 = vpop.permute.xlu0 %3304 }
 0x31e   :  { %4752 = vrcp.f32 %v2276_v11  ;;  %v2014_v60 = vmul.f32 1.442695, %v8238_v6  ;;  %v8243_v11 = vsub.f32 %v8242_v41, %v8237_v27  ;;  %v8245_v6 = vld [vmem:[#allocation60_spill] sm:$0xff]  ;;  %8247 = vst [vmem:[#allocation5_spill] sm:$0xff] %v6618_v40 }
 0x31f   :  { %2449 = vperm.xlu1 %4393, %v6555_v48   ;;  %4754 = vpow2.f32 %v2016_v15  ;;  %v8246_v15 = vsub.f32 %v8245_v6, %v8233_v45  ;;  %v3848_v6 = vld [vmem:[%s7795_s0 + $0x208] sm:$0xff] }
 0x320   :  { %2444 = vperm.xlu0 %4392, %v6560_v50   ;;  %v6587_v59 = vpop.permute.xlu1 %2881  ;;  %4756 = vpow2.f32 %v2014_v60  ;;  %v2110_v52 = vmul.f32 1.442695, %v8243_v11  ;;  %v2331_v60 = vld [vmem:[%s7795_s0 + $0x8] sm:$0xff] }
 0x321   :  { %8235 = vst [vmem:[#allocation26_spill] sm:$0xff] %v6587_v59  ;;  %4758 = vpow2.f32 %v2112_v2  ;;  %v2208_v54 = vmul.f32 1.442695, %v8246_v15  ;;  %v8248_v2 = vld [vmem:[#allocation64_spill] sm:$0xff]  ;;  %v3815_v15 = vld [vmem:[%s7795_s0 + $0x100] sm:$0xff]  ;;  %v2523_v40 = vmul.f32 %v6330_v44, %v2331_v60  ;;  %v6645_v44 = vpop.permute.xlu0 %3400 }
 0x322   :  { %4760 = vpow2.f32 %v2110_v52  ;;  %v8249_v11 = vsub.f32 %v8248_v2, %v8237_v27  ;;  %v2330_v27 = vld [vmem:[%s7795_s0] sm:$0xff] }
 0x323   :  { %2674 = vperm.xlu1 %4393, %v6565_v46   ;;  %4762 = vpow2.f32 %v2208_v54  ;;  %v3847_v52 = vld [vmem:[%s7795_s0 + $0x200] sm:$0xff] }
 0x324   :  { %2669 = vperm.xlu0 %4392, %v6572_v37   ;;  %v6605_v14 = vpop.permute.xlu1 %3306  ;;  %v2206_v45 = vmul.f32 1.442695, %v8249_v11  ;;  %v3005_v11 = vmul.f32 %v3848_v6, %v6348_v4  ;;  %v3004_v60 = vmul.f32 %v3847_v52, %v6371_v51  ;;  %v2247_v4 = vadd.f32 %v6439_v39, %v6431_v36 }
 0x325   :  { %8244 = vst [vmem:[#allocation56_spill] sm:$0xff] %v6605_v14  ;;  %v2748_v14 = vmul.f32 %v3816_v61, %v6333_v20  ;;  %v2522_v61 = vmul.f32 %v6344_v5, %v2330_v27  ;;  %v2246_v5 = vadd.f32 %v6444_v29, %v6436_v12  ;;  %v3485_v39 = vsel %vm3484_vm2, %v8129_v1, %v6384_v10 }
 0x326   :  { %4764 = vpow2.f32 %v2206_v45  ;;  %v2279_v52 = vadd.f32 %v6449_v8, %v2247_v4  ;;  %v3518_v29 = vsel %vm3517_vm3, %v3485_v39, %v6403_v17 }
 0x327   :  { %2931 = vperm.xlu1 %4393, %v6578_v21   ;;  %v4751_v41 = vpop.eup %4750  ;;  %v2780_v54 = vadd.f32 %v2748_v14, %v2523_v40  ;;  %v2278_v8 = vadd.f32 %v6452_v28, %v2246_v5 }
 0x328   :  { %2926 = vperm.xlu0 %4392, %v6582_v57   ;;  %v4753_v59 = vpop.eup %4752  ;;  %v6639_v2 = vpop.permute.xlu1 %3402  ;;  %4766 = vrcp.f32 %v2279_v52 }
 0x329   :  { %v6643_v20 = vpop.eup %4754  ;;  %4768 = vrcp.f32 %v2278_v8 }
 0x32b   :  { %3326 = vrot.lane.b32.xlu1 %v6565_v46, %s4843_s26 }
 0x32c   :  { %3324 = vrot.lane.b32.xlu0 %v6572_v37, %s4843_s26 }
 0x32f   :  { %3422 = vrot.lane.b32.xlu1 %v6578_v21, %s4844_s27 }
 0x330   :  { %3420 = vrot.lane.b32.xlu0 %v6582_v57, %s4844_s27  ;;  %v2747_v57 = vmul.f32 %v3815_v15, %v6358_v47  ;;  %v8250_v47 = vld [vmem:[#allocation45_spill] sm:$0xff] }
 0x331   :  { %v3486_v45 = vsel %vm3484_vm2, %v8250_v47, %v6362_v26  ;;  %v8254_v47 = vld [vmem:[#allocation10_spill] sm:$0xff] }
 0x332   :  { %v2779_v6 = vadd.f32 %v2747_v57, %v2522_v61  ;;  %v3519_v51 = vsel %vm3517_vm3, %v3486_v45, %v6367_v38  ;;  %v8251_v61 = vld [vmem:[#allocation9_spill] sm:$0xff]  ;;  %v8255_v45 = vld [vmem:[#allocation74_spill] sm:$0xff] }
 0x333   :  { %3125 = vperm.xlu1 %4393, %v4751_v41   ;;  %v6650_v41 = vpop.eup %4756 }
 0x334   :  { %3120 = vperm.xlu0 %4392, %v4753_v59   ;;  %v3037_v59 = vadd.f32 %v3005_v11, %v2780_v54  ;;  %v6658_v14 = vpop.eup %4758  ;;  %v3036_v15 = vadd.f32 %v3004_v60, %v2779_v6  ;;  %v8252_v60 = vld [vmem:[#allocation70_spill] sm:$0xff]  ;;  %v8256_v6 = vsub.f32 %v8254_v47, %v8255_v45 }
 0x335   :  { %v6668_v57 = vpop.eup %4760  ;;  %v8253_v28 = vsub.f32 %v8251_v61, %v8252_v60  ;;  %v3818_v61 = vld [vmem:[%s7795_s0 + $0x118] sm:$0xff] }
 0x336   :  { %v6682_v10 = vpop.eup %4762  ;;  %v2018_v5 = vmul.f32 1.442695, %v8256_v6  ;;  %v8263_v6 = vld [vmem:[#allocation66_spill] sm:$0xff] }
 0x337   :  { %2459 = vperm.xlu1 %4393, %v6643_v20   ;;  %v6696_v54 = vpop.eup %4764  ;;  %v2020_v4 = vmul.f32 1.442695, %v8253_v28  ;;  %v2332_v28 = vld [vmem:[%s7795_s0 + $0x10] sm:$0xff] }
 0x338   :  { %2454 = vperm.xlu0 %4392, %v6650_v41   ;;  %v4767_v47 = vpop.eup %4766 }
 0x339   :  { %4770 = vpow2.f32 %v2020_v4 }
 0x33a   :  { %v3076_v40 = vpop.permute.xlu1 %3075  ;;  %4772 = vpow2.f32 %v2018_v5  ;;  %v8264_v5 = vsub.f32 %v8263_v6, %v8255_v45 }
 0x33b   :  { %v3229_v27 = vmul.f32 %v3076_v40, %v3037_v59  ;;  %v3551_v26 = vmul.f32 %v3519_v51, %v3076_v40  ;;  %2684 = vperm.xlu1 %4393, %v6658_v14   ;;  %v3071_v11 = vpop.permute.xlu0 %3070  ;;  %v8257_v40 = vld [vmem:[#allocation31_spill] sm:$0xff] }
 0x33c   :  { %v3228_v1 = vmul.f32 %v3071_v11, %v3036_v15  ;;  %v3550_v38 = vmul.f32 %v3518_v29, %v3071_v11  ;;  %2679 = vperm.xlu0 %4392, %v6668_v57   ;;  %v8258_v15 = vsub.f32 %v8257_v40, %v8252_v60  ;;  %v2333_v40 = vld [vmem:[%s7795_s0 + $0x18] sm:$0xff] }
 0x33d   :  { %3261 = vst.msk [vmem:[%s7797_s3 + $0x8] sm:$0xff] %vm116_vm0, %v3229_v27 }
 0x33e   :  { %3584 = vst.msk [vmem:[%s7798_s4 + $0x8] sm:$0xff] %vm3582_vm4, %v3551_v26  ;;  %v6685_v17 = vpop.permute.xlu1 %2409  ;;  %3583 = vst.msk [vmem:[%s7798_s4] sm:$0xff] %vm3582_vm4, %v3550_v38  ;;  %v2116_v39 = vmul.f32 1.442695, %v8258_v15  ;;  %v8259_v26 = vld [vmem:[#allocation32_spill] sm:$0xff]  ;;  %v3850_v15 = vld [vmem:[%s7795_s0 + $0x218] sm:$0xff] }
 0x33f   :  { %3260 = vst.msk [vmem:[%s7797_s3] sm:$0xff] %vm116_vm0, %v3228_v1  ;;  %2941 = vperm.xlu1 %4393, %v6682_v10   ;;  %v6701_v59 = vpop.permute.xlu0 %2404  ;;  %v8260_v52 = vsub.f32 %v8259_v26, %v8255_v45  ;;  %v8261_v1 = vld [vmem:[#allocation65_spill] sm:$0xff]  ;;  %v4769_v45 = vpop.eup %4768  ;;  %v3007_v6 = vmul.f32 %v3850_v15, %v6415_v58  ;;  %v2249_v58 = vadd.f32 %v6501_v25, %v6493_v0 }
 0x340   :  { %2936 = vperm.xlu0 %4392, %v6696_v54   ;;  %4774 = vpow2.f32 %v2116_v39  ;;  %v8262_v38 = vsub.f32 %v8261_v1, %v8252_v60  ;;  %v2210_v60 = vmul.f32 1.442695, %v8264_v5  ;;  %v3817_v39 = vld [vmem:[%s7795_s0 + $0x110] sm:$0xff] }
 0x341   :  { %v2114_v29 = vmul.f32 1.442695, %v8260_v52  ;;  %v2750_v52 = vmul.f32 %v3818_v61, %v6396_v49  ;;  %v2749_v5 = vmul.f32 %v3817_v39, %v6422_v53  ;;  %v3849_v49 = vld [vmem:[%s7795_s0 + $0x210] sm:$0xff]  ;;  %v2248_v39 = vadd.f32 %v6506_v18, %v6498_v35 }
 0x342   :  { %v6707_v51 = vpop.permute.xlu1 %2634  ;;  %v2212_v8 = vmul.f32 1.442695, %v8262_v38  ;;  %v2525_v38 = vmul.f32 %v6379_v55, %v2333_v40  ;;  %v3006_v40 = vmul.f32 %v3849_v49, %v6433_v13 }
 0x343   :  { %3330 = vrot.lane.b32.xlu1 %v6658_v14, %s4843_s26  ;;  %v6714_v27 = vpop.permute.xlu0 %2629  ;;  %4776 = vpow2.f32 %v2114_v29  ;;  %v2524_v29 = vmul.f32 %v6458_v31, %v2332_v28  ;;  %v6759_v12 = vpop.eup %4770 }
 0x344   :  { %3328 = vrot.lane.b32.xlu0 %v6668_v57, %s4843_s26  ;;  %4778 = vpow2.f32 %v2212_v8  ;;  %v2782_v61 = vadd.f32 %v2750_v52, %v2525_v38  ;;  %v6767_v28 = vpop.eup %4772 }
 0x345   :  { %4780 = vpow2.f32 %v2210_v60  ;;  %v2781_v8 = vadd.f32 %v2749_v5, %v2524_v29  ;;  %v3487_v29 = vsel %vm3484_vm2, %v5936_v34, %v6446_v33 }
 0x346   :  { %v6721_v11 = vpop.permute.xlu1 %2891  ;;  %v3039_v53 = vadd.f32 %v3007_v6, %v2782_v61  ;;  %v2281_v6 = vadd.f32 %v6511_v3, %v2249_v58  ;;  %v3520_v18 = vsel %vm3517_vm3, %v3487_v29, %v6465_v62  ;;  %v2280_v3 = vadd.f32 %v6514_v7, %v2248_v39  ;;  %v8266_v61 = vld [vmem:[#allocation11_spill] sm:$0xff] }
 0x347   :  { %3426 = vrot.lane.b32.xlu1 %v6682_v10, %s4844_s27  ;;  %v6734_v4 = vpop.permute.xlu0 %2886 }
 0x348   :  { %3424 = vrot.lane.b32.xlu0 %v6696_v54, %s4844_s27  ;;  %4782 = vrcp.f32 %v2281_v6 }
 0x349   :  { %4784 = vrcp.f32 %v2280_v3 }
 0x34a   :  { %v6750_v26 = vpop.permute.xlu1 %3310  ;;  %v6778_v15 = vpop.eup %4774 }
 0x34b   :  { %3135 = vperm.xlu1 %4393, %v4767_v47   ;;  %v6754_v1 = vpop.permute.xlu0 %3308  ;;  %v8265_v47 = vld [vmem:[#allocation58_spill] sm:$0xff] }
 0x34c   :  { %3130 = vperm.xlu0 %4392, %v4769_v45   ;;  %v3488_v60 = vsel %vm3484_vm2, %v8265_v47, %v6429_v43  ;;  %v3038_v43 = vadd.f32 %v3006_v40, %v2781_v8  ;;  %v8267_v8 = vld [vmem:[#allocation75_spill] sm:$0xff]  ;;  %v8269_v47 = vld [vmem:[#allocation12_spill] sm:$0xff] }
 0x34d   :  { %v3521_v52 = vsel %vm3517_vm3, %v3488_v60, %v6441_v42  ;;  %v6788_v13 = vpop.eup %4776  ;;  %v8268_v7 = vsub.f32 %v8266_v61, %v8267_v8  ;;  %v8270_v60 = vld [vmem:[#allocation77_spill] sm:$0xff]  ;;  %v3820_v61 = vld [vmem:[%s7795_s0 + $0x128] sm:$0xff] }
 0x34e   :  { %v6764_v31 = vpop.permute.xlu1 %3406  ;;  %v6802_v33 = vpop.eup %4778  ;;  %v8271_v40 = vsub.f32 %v8269_v47, %v8270_v60  ;;  %v8278_v47 = vld [vmem:[#allocation71_spill] sm:$0xff] }
 0x34f   :  { %2469 = vperm.xlu1 %4393, %v6759_v12   ;;  %v6771_v55 = vpop.permute.xlu0 %3404  ;;  %v6816_v49 = vpop.eup %4780  ;;  %v2024_v58 = vmul.f32 1.442695, %v8268_v7 }
 0x350   :  { %2464 = vperm.xlu0 %4392, %v6767_v28   ;;  %v2022_v39 = vmul.f32 1.442695, %v8271_v40  ;;  %v8279_v40 = vsub.f32 %v8278_v47, %v8270_v60 }
 0x351   :  { %4786 = vpow2.f32 %v2024_v58 }
 0x352   :  { %v3086_v25 = vpop.permute.xlu1 %3085  ;;  %4788 = vpow2.f32 %v2022_v39  ;;  %v4783_v58 = vpop.eup %4782  ;;  %v2214_v39 = vmul.f32 1.442695, %v8279_v40 }
 0x353   :  { %v3231_v45 = vmul.f32 %v3086_v25, %v3039_v53  ;;  %v3553_v38 = vmul.f32 %v3521_v52, %v3086_v25  ;;  %2694 = vperm.xlu1 %4393, %v6778_v15   ;;  %v3081_v5 = vpop.permute.xlu0 %3080  ;;  %v8272_v25 = vld [vmem:[#allocation33_spill] sm:$0xff] }
 0x354   :  { %v3230_v34 = vmul.f32 %v3081_v5, %v3038_v43  ;;  %v3552_v42 = vmul.f32 %v3520_v18, %v3081_v5  ;;  %2689 = vperm.xlu0 %4392, %v6788_v13   ;;  %v8273_v29 = vsub.f32 %v8272_v25, %v8267_v8  ;;  %v8274_v43 = vld [vmem:[#allocation34_spill] sm:$0xff] }
 0x355   :  { %3263 = vst.msk [vmem:[%s7797_s3 + $0x18] sm:$0xff] %vm116_vm0, %v3231_v45  ;;  %v8275_v6 = vsub.f32 %v8274_v43, %v8270_v60  ;;  %v3819_v25 = vld [vmem:[%s7795_s0 + $0x120] sm:$0xff]  ;;  %v2752_v43 = vmul.f32 %v3820_v61, %v6491_v19 }
 0x356   :  { %3586 = vst.msk [vmem:[%s7798_s4 + $0x18] sm:$0xff] %vm3582_vm4, %v3553_v38  ;;  %v6805_v62 = vpop.permute.xlu1 %2419  ;;  %3585 = vst.msk [vmem:[%s7798_s4 + $0x10] sm:$0xff] %vm3582_vm4, %v3552_v42  ;;  %v2120_v45 = vmul.f32 1.442695, %v8273_v29  ;;  %v3852_v29 = vld [vmem:[%s7795_s0 + $0x228] sm:$0xff]  ;;  %v2334_v60 = vld [vmem:[%s7795_s0 + $0x20] sm:$0xff]  ;;  %v2751_v47 = vmul.f32 %v3819_v25, %v6495_v30 }
 0x357   :  { %3262 = vst.msk [vmem:[%s7797_s3 + $0x10] sm:$0xff] %vm116_vm0, %v3230_v34  ;;  %2951 = vperm.xlu1 %4393, %v6802_v33   ;;  %v6821_v53 = vpop.permute.xlu0 %2414  ;;  %v2118_v18 = vmul.f32 1.442695, %v8275_v6  ;;  %v8276_v34 = vld [vmem:[#allocation67_spill] sm:$0xff]  ;;  %v4785_v6 = vpop.eup %4784  ;;  %v3009_v40 = vmul.f32 %v3852_v29, %v6503_v24  ;;  %v2526_v61 = vmul.f32 %v6484_v16, %v2334_v60 }
 0x358   :  { %2946 = vperm.xlu0 %4392, %v6816_v49   ;;  %4790 = vpow2.f32 %v2120_v45  ;;  %v8277_v42 = vsub.f32 %v8276_v34, %v8267_v8  ;;  %v2335_v8 = vld [vmem:[%s7795_s0 + $0x28] sm:$0xff] }
 0x359   :  { %4792 = vpow2.f32 %v2118_v18  ;;  %v3851_v18 = vld [vmem:[%s7795_s0 + $0x220] sm:$0xff]  ;;  %v2783_v24 = vadd.f32 %v2751_v47, %v2526_v61 }
 0x35a   :  { %v6827_v52 = vpop.permute.xlu1 %2644  ;;  %v2216_v3 = vmul.f32 1.442695, %v8277_v42  ;;  %v2527_v42 = vmul.f32 %v6477_v9, %v2335_v8  ;;  %v3008_v35 = vmul.f32 %v3851_v18, %v6508_v22  ;;  %v2251_v9 = vadd.f32 %v6565_v46, %v6555_v48 }
 0x35b   :  { %3334 = vrot.lane.b32.xlu1 %v6778_v15, %s4843_s26  ;;  %v6834_v38 = vpop.permute.xlu0 %2639  ;;  %v6881_v19 = vpop.eup %4786  ;;  %v2250_v22 = vadd.f32 %v6572_v37, %v6560_v50 }
 0x35c   :  { %3332 = vrot.lane.b32.xlu0 %v6788_v13, %s4843_s26  ;;  %4794 = vpow2.f32 %v2216_v3  ;;  %v6888_v0 = vpop.eup %4788  ;;  %v3040_v46 = vadd.f32 %v3008_v35, %v2783_v24  ;;  %v8285_v24 = vld [vmem:[#allocation78_spill] sm:$0xff] }
 0x35d   :  { %4796 = vpow2.f32 %v2214_v39  ;;  %v3490_v39 = vsel %vm3484_vm2, %v5957_v63, %v6520_v23  ;;  %v2283_v23 = vadd.f32 %v6578_v21, %v2251_v9  ;;  %v8282_v21 = vld [vmem:[#allocation25_spill] sm:$0xff] }
 0x35e   :  { %v6841_v5 = vpop.permute.xlu1 %2901  ;;  %v3523_v25 = vsel %vm3517_vm3, %v3490_v39, %v6539_v32  ;;  %v8284_v9 = vld [vmem:[#allocation13_spill] sm:$0xff] }
 0x35f   :  { %3430 = vrot.lane.b32.xlu1 %v6802_v33, %s4844_s27  ;;  %v6851_v7 = vpop.permute.xlu0 %2896  ;;  %4798 = vrcp.f32 %v2283_v23 }
 0x360   :  { %3428 = vrot.lane.b32.xlu0 %v6816_v49, %s4844_s27 }
 0x362   :  { %v6867_v45 = vpop.permute.xlu1 %3314  ;;  %v6898_v16 = vpop.eup %4790 }
 0x363   :  { %3145 = vperm.xlu1 %4393, %v4783_v58   ;;  %v6876_v34 = vpop.permute.xlu0 %3312  ;;  %v2784_v58 = vadd.f32 %v2752_v43, %v2527_v42  ;;  %v8280_v43 = vld [vmem:[#allocation76_spill] sm:$0xff]  ;;  %v6908_v63 = vpop.eup %4792  ;;  %v8281_v42 = vld [vmem:[#allocation53_spill] sm:$0xff] }
 0x364   :  { %3140 = vperm.xlu0 %4392, %v4785_v6   ;;  %v3489_v6 = vsel %vm3484_vm2, %v8280_v43, %v6527_v56 }
 0x365   :  { %v3041_v8 = vadd.f32 %v3009_v40, %v2784_v58  ;;  %v3522_v37 = vsel %vm3517_vm3, %v3489_v6, %v8281_v42  ;;  %v2282_v40 = vadd.f32 %v8282_v21, %v2250_v22  ;;  %v8298_v21 = vld [vmem:[#allocation72_spill] sm:$0xff] }
 0x366   :  { %v6883_v3 = vpop.permute.xlu1 %3410  ;;  %v6922_v35 = vpop.eup %4794 }
 0x367   :  { %2479 = vperm.xlu1 %4393, %v6881_v19   ;;  %v6892_v30 = vpop.permute.xlu0 %3408  ;;  %v6936_v58 = vpop.eup %4796  ;;  %4800 = vrcp.f32 %v2282_v40  ;;  %v8299_v40 = vsub.f32 %v8298_v21, %v8285_v24 }
 0x368   :  { %2474 = vperm.xlu0 %4392, %v6888_v0  }
 0x36a   :  { %v3096_v29 = vpop.permute.xlu1 %3095 }
 0x36b   :  { %v3233_v60 = vmul.f32 %v3096_v29, %v3041_v8  ;;  %v3555_v18 = vmul.f32 %v3523_v25, %v3096_v29  ;;  %2704 = vperm.xlu1 %4393, %v6898_v16   ;;  %v3091_v47 = vpop.permute.xlu0 %3090  ;;  %v8286_v8 = vsub.f32 %v8284_v9, %v8285_v24  ;;  %v8288_v25 = vld [vmem:[#allocation14_spill] sm:$0xff]  ;;  %v8289_v29 = vld [vmem:[#allocation79_spill] sm:$0xff]  ;;  %v2220_v9 = vmul.f32 1.442695, %v8299_v40  ;;  %v3853_v40 = vld [vmem:[%s7795_s0 + $0x230] sm:$0xff] }
 0x36c   :  { %v3232_v32 = vmul.f32 %v3091_v47, %v3040_v46  ;;  %v3554_v56 = vmul.f32 %v3522_v37, %v3091_v47  ;;  %2699 = vperm.xlu0 %4392, %v6908_v63   ;;  %v8290_v46 = vsub.f32 %v8288_v25, %v8289_v29  ;;  %v8295_v37 = vld [vmem:[#allocation36_spill] sm:$0xff]  ;;  %v4799_v25 = vpop.eup %4798 }
 0x36d   :  { %3265 = vst.msk [vmem:[%s7797_s3 + $0x28] sm:$0xff] %vm116_vm0, %v3233_v60  ;;  %v2028_v39 = vmul.f32 1.442695, %v8286_v8  ;;  %v8292_v60 = vld [vmem:[#allocation35_spill] sm:$0xff]  ;;  %v8296_v47 = vsub.f32 %v8295_v37, %v8289_v29  ;;  %v3822_v8 = vld [vmem:[%s7795_s0 + $0x138] sm:$0xff] }
 0x36e   :  { %3588 = vst.msk [vmem:[%s7798_s4 + $0x28] sm:$0xff] %vm3582_vm4, %v3555_v18  ;;  %v6925_v61 = vpop.permute.xlu1 %2429  ;;  %3587 = vst.msk [vmem:[%s7798_s4 + $0x20] sm:$0xff] %vm3582_vm4, %v3554_v56  ;;  %v2026_v43 = vmul.f32 1.442695, %v8290_v46  ;;  %v8293_v18 = vsub.f32 %v8292_v60, %v8285_v24  ;;  %v8301_v46 = vld [vmem:[#allocation73_spill] sm:$0xff] }
 0x36f   :  { %8283 = vst [vmem:[#allocation62_spill] sm:$0xff] %v6925_v61  ;;  %3264 = vst.msk [vmem:[%s7797_s3 + $0x20] sm:$0xff] %vm116_vm0, %v3232_v32  ;;  %2961 = vperm.xlu1 %4393, %v6922_v35   ;;  %v6941_v22 = vpop.permute.xlu0 %2424  ;;  %4802 = vpow2.f32 %v2028_v39  ;;  %v2122_v32 = vmul.f32 1.442695, %v8296_v47  ;;  %v2337_v24 = vld [vmem:[%s7795_s0 + $0x38] sm:$0xff]  ;;  %v8304_v47 = vld [vmem:[#allocation4_spill] sm:$0xff] }
 0x370   :  { %8287 = vst [vmem:[#allocation6_spill] sm:$0xff] %v6941_v22  ;;  %2956 = vperm.xlu0 %4392, %v6936_v58   ;;  %v2124_v23 = vmul.f32 1.442695, %v8293_v18  ;;  %4804 = vpow2.f32 %v2026_v43  ;;  %v8302_v43 = vsub.f32 %v8301_v46, %v8289_v29  ;;  %v3821_v18 = vld [vmem:[%s7795_s0 + $0x130] sm:$0xff]  ;;  %v8310_v61 = vld [vmem:[#allocation54_spill] sm:$0xff] }
 0x371   :  { %v4801_v21 = vpop.eup %4800  ;;  %v2336_v29 = vld [vmem:[%s7795_s0 + $0x30] sm:$0xff] }
 0x372   :  { %v6947_v6 = vpop.permute.xlu1 %2654  ;;  %4806 = vpow2.f32 %v2124_v23  ;;  %v2218_v60 = vmul.f32 1.442695, %v8302_v43  ;;  %v3854_v23 = vld [vmem:[%s7795_s0 + $0x238] sm:$0xff]  ;;  %v8306_v43 = vld [vmem:[#allocation3_spill] sm:$0xff] }
 0x373   :  { %8291 = vst [vmem:[#allocation63_spill] sm:$0xff] %v6947_v6  ;;  %3338 = vrot.lane.b32.xlu1 %v6898_v16, %s4843_s26  ;;  %v6954_v42 = vpop.permute.xlu0 %2649  ;;  %4808 = vpow2.f32 %v2122_v32  ;;  %v2754_v32 = vmul.f32 %v3822_v8, %v8304_v47  ;;  %v2529_v36 = vmul.f32 %v8306_v43, %v2337_v24  ;;  %v3010_v6 = vmul.f32 %v3853_v40, %v8310_v61  ;;  %v8313_v40 = vld [vmem:[#allocation5_spill] sm:$0xff]  ;;  %v8314_v43 = vld [vmem:[#allocation15_spill] sm:$0xff] }
 0x374   :  { %8294 = vst [vmem:[#allocation27_spill] sm:$0xff] %v6954_v42  ;;  %3336 = vrot.lane.b32.xlu0 %v6908_v63, %s4843_s26  ;;  %4810 = vpow2.f32 %v2220_v9  ;;  %v2252_v61 = vadd.f32 %v6668_v57, %v6650_v41 }
 0x375   :  { %4812 = vpow2.f32 %v2218_v60  ;;  %v2786_v42 = vadd.f32 %v2754_v32, %v2529_v36  ;;  %v8312_v60 = vld [vmem:[#allocation37_spill] sm:$0xff] }
 0x376   :  { %v6961_v56 = vpop.permute.xlu1 %2911 }
 0x377   :  { %8297 = vst [vmem:[#allocation28_spill] sm:$0xff] %v6961_v56  ;;  %3434 = vrot.lane.b32.xlu1 %v6922_v35, %s4844_s27  ;;  %v6971_v39 = vpop.permute.xlu0 %2906 }
 0x378   :  { %8300 = vst [vmem:[#allocation57_spill] sm:$0xff] %v6971_v39  ;;  %3432 = vrot.lane.b32.xlu0 %v6936_v58, %s4844_s27  ;;  %v8307_v39 = vld [vmem:[#allocation61_spill] sm:$0xff] }
 0x379   :  { %v2753_v22 = vmul.f32 %v3821_v18, %v8307_v39  ;;  %v7001_v8 = vpop.eup %4802  ;;  %v2253_v39 = vadd.f32 %v6658_v14, %v6643_v20 }
 0x37a   :  { %v6987_v37 = vpop.permute.xlu1 %3318 }
 0x37b   :  { %8303 = vst [vmem:[#allocation59_spill] sm:$0xff] %v6987_v37  ;;  %3155 = vperm.xlu1 %4393, %v4799_v25   ;;  %v6996_v46 = vpop.permute.xlu0 %3316  ;;  %v8308_v37 = vld [vmem:[#allocation26_spill] sm:$0xff]  ;;  %v8309_v25 = vld [vmem:[#allocation55_spill] sm:$0xff] }
 0x37c   :  { %8305 = vst [vmem:[#allocation7_spill] sm:$0xff] %v6996_v46  ;;  %v3011_v56 = vmul.f32 %v3854_v23, %v8308_v37  ;;  %3150 = vperm.xlu0 %4392, %v4801_v21   ;;  %v2528_v47 = vmul.f32 %v8309_v25, %v2336_v29  ;;  %v7008_v46 = vpop.eup %4804  ;;  %v8311_v37 = vld [vmem:[#allocation56_spill] sm:$0xff] }
 0x37d   :  { %v3492_v21 = vsel %vm3484_vm2, %v8312_v60, %v8311_v37  ;;  %v7018_v36 = vpop.eup %4806 }
 0x37e   :  { %v7003_v9 = vpop.permute.xlu1 %3414  ;;  %v2785_v18 = vadd.f32 %v2753_v22, %v2528_v47  ;;  %v3043_v23 = vadd.f32 %v3011_v56, %v2786_v42  ;;  %v3525_v32 = vsel %vm3517_vm3, %v3492_v21, %v6639_v2  ;;  %v3491_v22 = vsel %vm3484_vm2, %v8314_v43, %v8313_v40  ;;  %v7028_v25 = vpop.eup %4808  ;;  %v3823_v40 = vld [vmem:[%s7795_s0 + $0x140] sm:$0xff]  ;;  %v3856_v43 = vld [vmem:[%s7795_s0 + $0x248] sm:$0xff] }
 0x37f   :  { %2489 = vperm.xlu1 %4393, %v7001_v8   ;;  %v7012_v24 = vpop.permute.xlu0 %3412  ;;  %v2285_v47 = vadd.f32 %v6682_v10, %v2253_v39  ;;  %v3524_v57 = vsel %vm3517_vm3, %v3491_v22, %v6645_v44  ;;  %v2284_v10 = vadd.f32 %v6696_v54, %v2252_v61  ;;  %v3824_v61 = vld [vmem:[%s7795_s0 + $0x148] sm:$0xff] }
 0x380   :  { %2484 = vperm.xlu0 %4392, %v7008_v46   ;;  %v3042_v14 = vadd.f32 %v3010_v6, %v2785_v18  ;;  %v7042_v18 = vpop.eup %4810 }
 0x381   :  { %v7056_v39 = vpop.eup %4812  ;;  %4814 = vrcp.f32 %v2285_v47  ;;  %v2338_v47 = vld [vmem:[%s7795_s0 + $0x40] sm:$0xff] }
 0x382   :  { %v3106_v29 = vpop.permute.xlu1 %3105  ;;  %4816 = vrcp.f32 %v2284_v10  ;;  %v3013_v10 = vmul.f32 %v3856_v43, %v6721_v11 }
 0x383   :  { %v3235_v42 = vmul.f32 %v3106_v29, %v3043_v23  ;;  %v3557_v56 = vmul.f32 %v3525_v32, %v3106_v29  ;;  %2714 = vperm.xlu1 %4393, %v7018_v36   ;;  %v3101_v37 = vpop.permute.xlu0 %3100 }
 0x384   :  { %v3234_v2 = vmul.f32 %v3101_v37, %v3042_v14  ;;  %v3556_v6 = vmul.f32 %v3524_v57, %v3101_v37  ;;  %2709 = vperm.xlu0 %4392, %v7028_v25   ;;  %v2339_v14 = vld [vmem:[%s7795_s0 + $0x48] sm:$0xff]  ;;  %v3855_v57 = vld [vmem:[%s7795_s0 + $0x240] sm:$0xff] }
 0x385   :  { %3267 = vst.msk [vmem:[%s7797_s3 + $0x38] sm:$0xff] %vm116_vm0, %v3235_v42  ;;  %v2756_v42 = vmul.f32 %v3824_v61, %v6707_v51  ;;  %v2530_v61 = vmul.f32 %v6701_v59, %v2338_v47  ;;  %v2254_v59 = vadd.f32 %v6788_v13, %v6767_v28  ;;  %v8324_v13 = vld [vmem:[#allocation47_spill] sm:$0xff] }
 0x386   :  { %3590 = vst.msk [vmem:[%s7798_s4 + $0x38] sm:$0xff] %vm3582_vm4, %v3557_v56  ;;  %v7045_v44 = vpop.permute.xlu1 %2439  ;;  %3589 = vst.msk [vmem:[%s7798_s4 + $0x30] sm:$0xff] %vm3582_vm4, %v3556_v6  ;;  %v2755_v6 = vmul.f32 %v3823_v40, %v6714_v27  ;;  %v8320_v27 = vld [vmem:[#allocation43_spill] sm:$0xff]  ;;  %v8321_v40 = vld [vmem:[#allocation44_spill] sm:$0xff] }
 0x387   :  { %3266 = vst.msk [vmem:[%s7797_s3 + $0x30] sm:$0xff] %vm116_vm0, %v3234_v2  ;;  %2971 = vperm.xlu1 %4393, %v7042_v18   ;;  %v7058_v23 = vpop.permute.xlu0 %2434  ;;  %v2531_v2 = vmul.f32 %v6685_v17, %v2339_v14  ;;  %v3494_v11 = vsel %vm3484_vm2, %v8320_v27, %v6750_v26 }
 0x388   :  { %8315 = vst [vmem:[#allocation68_spill] sm:$0xff] %v7058_v23  ;;  %2966 = vperm.xlu0 %4392, %v7056_v39   ;;  %v2255_v23 = vadd.f32 %v6778_v15, %v6759_v12  ;;  %v2787_v17 = vadd.f32 %v2755_v6, %v2530_v61  ;;  %v8322_v15 = vld [vmem:[#allocation16_spill] sm:$0xff]  ;;  %v8326_v61 = vld [vmem:[#allocation21_spill] sm:$0xff] }
 0x38a   :  { %v7061_v54 = vpop.permute.xlu1 %2664  ;;  %v2287_v26 = vadd.f32 %v6802_v33, %v2255_v23  ;;  %v2286_v33 = vadd.f32 %v6816_v49, %v2254_v59  ;;  %v2341_v59 = vld [vmem:[%s7795_s0 + $0x58] sm:$0xff] }
 0x38b   :  { %3342 = vrot.lane.b32.xlu1 %v7018_v36, %s4843_s26  ;;  %v7065_v60 = vpop.permute.xlu0 %2659  ;;  %v4815_v29 = vpop.eup %4814 }
 0x38c   :  { %3340 = vrot.lane.b32.xlu0 %v7028_v25, %s4843_s26  ;;  %v4817_v56 = vpop.eup %4816  ;;  %4818 = vrcp.f32 %v2287_v26 }
 0x38d   :  { %4820 = vrcp.f32 %v2286_v33 }
 0x38e   :  { %v7069_v21 = vpop.permute.xlu1 %2921 }
 0x38f   :  { %3438 = vrot.lane.b32.xlu1 %v7042_v18, %s4844_s27  ;;  %v7076_v32 = vpop.permute.xlu0 %2916 }
 0x390   :  { %8316 = vst [vmem:[#allocation8_spill] sm:$0xff] %v7076_v32  ;;  %3436 = vrot.lane.b32.xlu0 %v7056_v39, %s4844_s27  ;;  %v8319_v32 = vld [vmem:[#allocation38_spill] sm:$0xff] }
 0x392   :  { %v7089_v22 = vpop.permute.xlu1 %3322 }
 0x393   :  { %8317 = vst [vmem:[#allocation69_spill] sm:$0xff] %v7089_v22  ;;  %3165 = vperm.xlu1 %4393, %v4815_v29   ;;  %v7098_v37 = vpop.permute.xlu0 %3320  ;;  %v2788_v29 = vadd.f32 %v2756_v42, %v2531_v2  ;;  %v3012_v22 = vmul.f32 %v3855_v57, %v6734_v4  ;;  %v3527_v4 = vsel %vm3517_vm3, %v3494_v11, %v6764_v31  ;;  %v8323_v2 = vld [vmem:[#allocation17_spill] sm:$0xff] }
 0x394   :  { %8318 = vst [vmem:[#allocation29_spill] sm:$0xff] %v7098_v37  ;;  %3160 = vperm.xlu0 %4392, %v4817_v56   ;;  %v3493_v56 = vsel %vm3484_vm2, %v8322_v15, %v6754_v1 }
 0x395   :  { %v3045_v14 = vadd.f32 %v3013_v10, %v2788_v29  ;;  %v3044_v42 = vadd.f32 %v3012_v22, %v2787_v17  ;;  %v3526_v6 = vsel %vm3517_vm3, %v3493_v56, %v6771_v55  ;;  %v8325_v55 = vld [vmem:[#allocation39_spill] sm:$0xff] }
 0x396   :  { %v7103_v51 = vpop.permute.xlu1 %3418  ;;  %v4819_v11 = vpop.eup %4818 }
 0x397   :  { %2499 = vperm.xlu1 %4393, %v8319_v32   ;;  %v7110_v37 = vpop.permute.xlu0 %3416  ;;  %v4821_v56 = vpop.eup %4820 }
 0x398   :  { %2494 = vperm.xlu0 %4392, %v8321_v40  }
 0x39a   :  { %v3116_v43 = vpop.permute.xlu1 %3115 }
 0x39b   :  { %v3237_v47 = vmul.f32 %v3116_v43, %v3045_v14  ;;  %v3559_v57 = vmul.f32 %v3527_v4, %v3116_v43  ;;  %2724 = vperm.xlu1 %4393, %v8323_v2   ;;  %v3111_v10 = vpop.permute.xlu0 %3110  ;;  %v3826_v14 = vld [vmem:[%s7795_s0 + $0x158] sm:$0xff]  ;;  %v3825_v4 = vld [vmem:[%s7795_s0 + $0x150] sm:$0xff] }
 0x39c   :  { %v3236_v1 = vmul.f32 %v3111_v10, %v3044_v42  ;;  %v3558_v31 = vmul.f32 %v3526_v6, %v3111_v10  ;;  %2719 = vperm.xlu0 %4392, %v8324_v13   ;;  %v3858_v43 = vld [vmem:[%s7795_s0 + $0x258] sm:$0xff]  ;;  %v2758_v15 = vmul.f32 %v3826_v14, %v6827_v52  ;;  %v2533_v6 = vmul.f32 %v6805_v62, %v2341_v59 }
 0x39d   :  { %3269 = vst.msk [vmem:[%s7797_s3 + $0x48] sm:$0xff] %vm116_vm0, %v3237_v47  ;;  %v2257_v47 = vadd.f32 %v6898_v16, %v6881_v19  ;;  %v2757_v10 = vmul.f32 %v3825_v4, %v6834_v38  ;;  %v3015_v52 = vmul.f32 %v3858_v43, %v6841_v5  ;;  %v2256_v4 = vadd.f32 %v6908_v63, %v6888_v0  ;;  %v8332_v63 = vld [vmem:[#allocation46_spill] sm:$0xff] }
 0x39e   :  { %3592 = vst.msk [vmem:[%s7798_s4 + $0x48] sm:$0xff] %vm3582_vm4, %v3559_v57  ;;  %v7137_v23 = vpop.permute.xlu1 %2449  ;;  %3591 = vst.msk [vmem:[%s7798_s4 + $0x40] sm:$0xff] %vm3582_vm4, %v3558_v31  ;;  %v2340_v57 = vld [vmem:[%s7795_s0 + $0x50] sm:$0xff] }
 0x39f   :  { %3268 = vst.msk [vmem:[%s7797_s3 + $0x40] sm:$0xff] %vm116_vm0, %v3236_v1  ;;  %2981 = vperm.xlu1 %4393, %v8325_v55   ;;  %v7148_v22 = vpop.permute.xlu0 %2444  ;;  %v2532_v31 = vmul.f32 %v6821_v53, %v2340_v57  ;;  %v2289_v62 = vadd.f32 %v6922_v35, %v2257_v47  ;;  %v8331_v47 = vld [vmem:[#allocation19_spill] sm:$0xff] }
 0x3a0   :  { %2976 = vperm.xlu0 %4392, %v8326_v61  }
 0x3a1   :  { %v2789_v14 = vadd.f32 %v2757_v10, %v2532_v31  ;;  %4822 = vrcp.f32 %v2289_v62  ;;  %v2349_v10 = vld [vmem:[%s7795_s0 + $0x98] sm:$0xff] }
 0x3a2   :  { %v7151_v49 = vpop.permute.xlu1 %2674 }
 0x3a3   :  { %3346 = vrot.lane.b32.xlu1 %v8323_v2, %s4843_s26  ;;  %v7155_v29 = vpop.permute.xlu0 %2669  ;;  %v3857_v2 = vld [vmem:[%s7795_s0 + $0x250] sm:$0xff] }
 0x3a4   :  { %3344 = vrot.lane.b32.xlu0 %v8324_v13, %s4843_s26  ;;  %v2790_v13 = vadd.f32 %v2758_v15, %v2533_v6  ;;  %v3014_v33 = vmul.f32 %v3857_v2, %v6851_v7  ;;  %v8329_v7 = vld [vmem:[#allocation20_spill] sm:$0xff] }
 0x3a6   :  { %v7159_v17 = vpop.permute.xlu1 %2931  ;;  %v3047_v59 = vadd.f32 %v3015_v52, %v2790_v13  ;;  %v3833_v13 = vld [vmem:[%s7795_s0 + $0x190] sm:$0xff] }
 0x3a7   :  { %3442 = vrot.lane.b32.xlu1 %v8325_v55, %s4844_s27  ;;  %v7166_v27 = vpop.permute.xlu0 %2926 }
 0x3a8   :  { %3440 = vrot.lane.b32.xlu0 %v8326_v61, %s4844_s27  ;;  %v8327_v61 = vld [vmem:[#allocation18_spill] sm:$0xff] }
 0x3aa   :  { %v3327_v42 = vpop.permute.xlu1 %3326 }
 0x3ab   :  { %3175 = vperm.xlu1 %4393, %v4819_v11   ;;  %v3325_v26 = vpop.permute.xlu0 %3324  ;;  %v3502_v1 = vsel %vm3484_vm2, %v6555_v48, %v3327_v42  ;;  %v8328_v48 = vld [vmem:[#allocation22_spill] sm:$0xff] }
 0x3ac   :  { %3170 = vperm.xlu0 %4392, %v4821_v56   ;;  %v3501_v38 = vsel %vm3484_vm2, %v6560_v50, %v3325_v26  ;;  %v3496_v11 = vsel %vm3484_vm2, %v8328_v48, %v6867_v45  ;;  %v8330_v50 = vld [vmem:[#allocation49_spill] sm:$0xff]  ;;  %v3046_v45 = vadd.f32 %v3014_v33, %v2789_v14  ;;  %v2288_v26 = vadd.f32 %v6936_v58, %v2256_v4 }
 0x3ad   :  { %v3529_v35 = vsel %vm3517_vm3, %v3496_v11, %v6883_v3  ;;  %v3495_v42 = vsel %vm3484_vm2, %v8330_v50, %v6876_v34  ;;  %v3834_v58 = vld [vmem:[%s7795_s0 + $0x198] sm:$0xff] }
 0x3ae   :  { %v3423_v16 = vpop.permute.xlu1 %3422  ;;  %v3528_v57 = vsel %vm3517_vm3, %v3495_v42, %v6892_v30  ;;  %v8333_v30 = vld [vmem:[#allocation41_spill] sm:$0xff]  ;;  %4824 = vrcp.f32 %v2288_v26  ;;  %v2259_v42 = vadd.f32 %v7018_v36, %v7001_v8  ;;  %v3860_v36 = vld [vmem:[%s7795_s0 + $0x268] sm:$0xff] }
 0x3af   :  { %v7196_v55 = vsel %vm3517_vm3, %v3502_v1, %v3423_v16  ;;  %2509 = vperm.xlu1 %4393, %v8327_v61   ;;  %v3421_v5 = vpop.permute.xlu0 %3420  ;;  %v8334_v1 = vld [vmem:[#allocation48_spill] sm:$0xff] }
 0x3b0   :  { %v7206_v53 = vsel %vm3517_vm3, %v3501_v38, %v3421_v5  ;;  %2504 = vperm.xlu0 %4392, %v8329_v7   ;;  %v2348_v16 = vld [vmem:[%s7795_s0 + $0x90] sm:$0xff]  ;;  %v3866_v5 = vld [vmem:[%s7795_s0 + $0x298] sm:$0xff] }
 0x3b2   :  { %v3126_v43 = vpop.permute.xlu1 %3125 }
 0x3b3   :  { %v3239_v15 = vmul.f32 %v3126_v43, %v3047_v59  ;;  %v3561_v56 = vmul.f32 %v3529_v35, %v3126_v43  ;;  %2734 = vperm.xlu1 %4393, %v8331_v47   ;;  %v3121_v2 = vpop.permute.xlu0 %3120  ;;  %v4823_v59 = vpop.eup %4822  ;;  %v3865_v35 = vld [vmem:[%s7795_s0 + $0x290] sm:$0xff] }
 0x3b4   :  { %v3238_v34 = vmul.f32 %v3121_v2, %v3046_v45  ;;  %v3560_v3 = vmul.f32 %v3528_v57, %v3121_v2  ;;  %2729 = vperm.xlu0 %4392, %v8332_v63   ;;  %v2343_v57 = vld [vmem:[%s7795_s0 + $0x68] sm:$0xff]  ;;  %v3827_v2 = vld [vmem:[%s7795_s0 + $0x160] sm:$0xff] }
 0x3b5   :  { %3271 = vst.msk [vmem:[%s7797_s3 + $0x58] sm:$0xff] %vm116_vm0, %v3239_v15  ;;  %v3828_v15 = vld [vmem:[%s7795_s0 + $0x168] sm:$0xff] }
 0x3b6   :  { %3594 = vst.msk [vmem:[%s7798_s4 + $0x58] sm:$0xff] %vm3582_vm4, %v3561_v56  ;;  %v2460_v6 = vpop.permute.xlu1 %2459  ;;  %3593 = vst.msk [vmem:[%s7798_s4 + $0x50] sm:$0xff] %vm3582_vm4, %v3560_v3  ;;  %v8335_v3 = vld [vmem:[#allocation63_spill] sm:$0xff] }
 0x3b7   :  { %3270 = vst.msk [vmem:[%s7797_s3 + $0x50] sm:$0xff] %vm116_vm0, %v3238_v34  ;;  %2991 = vperm.xlu1 %4393, %v8333_v30   ;;  %v2455_v52 = vpop.permute.xlu0 %2454  ;;  %v2541_v33 = vmul.f32 %v2460_v6, %v2349_v10  ;;  %v8336_v6 = vld [vmem:[#allocation50_spill] sm:$0xff] }
 0x3b8   :  { %2986 = vperm.xlu0 %4392, %v8334_v1   ;;  %v2540_v14 = vmul.f32 %v2455_v52, %v2348_v16  ;;  %v4825_v10 = vpop.eup %4824  ;;  %v2291_v52 = vadd.f32 %v7042_v18, %v2259_v42  ;;  %v8342_v42 = vld [vmem:[#allocation81_spill] sm:$0xff] }
 0x3ba   :  { %v2685_v31 = vpop.permute.xlu1 %2684  ;;  %4826 = vrcp.f32 %v2291_v52  ;;  %v8346_v52 = vld [vmem:[#allocation7_spill] sm:$0xff] }
 0x3bb   :  { %v2766_v62 = vmul.f32 %v3834_v58, %v2685_v31  ;;  %3350 = vrot.lane.b32.xlu1 %v8331_v47, %s4843_s26  ;;  %v2680_v38 = vpop.permute.xlu0 %2679  ;;  %v2342_v58 = vld [vmem:[%s7795_s0 + $0x60] sm:$0xff] }
 0x3bc   :  { %v2765_v11 = vmul.f32 %v3833_v13, %v2680_v38  ;;  %3348 = vrot.lane.b32.xlu0 %v8332_v63, %s4843_s26  ;;  %v2760_v63 = vmul.f32 %v3828_v15, %v8335_v3  ;;  %v8337_v31 = vld [vmem:[#allocation62_spill] sm:$0xff]  ;;  %v8339_v38 = vld [vmem:[#allocation28_spill] sm:$0xff] }
 0x3bd   :  { %v2798_v48 = vadd.f32 %v2766_v62, %v2541_v33  ;;  %v2535_v13 = vmul.f32 %v8337_v31, %v2343_v57  ;;  %v8338_v33 = vld [vmem:[#allocation27_spill] sm:$0xff] }
 0x3be   :  { %v2942_v4 = vpop.permute.xlu1 %2941  ;;  %v2797_v43 = vadd.f32 %v2765_v11, %v2540_v14  ;;  %v2759_v62 = vmul.f32 %v3827_v2, %v8338_v33  ;;  %v2258_v14 = vadd.f32 %v7028_v25, %v7008_v46  ;;  %v8340_v11 = vld [vmem:[#allocation6_spill] sm:$0xff]  ;;  %v8344_v57 = vld [vmem:[#allocation51_spill] sm:$0xff] }
 0x3bf   :  { %v3023_v50 = vmul.f32 %v3866_v5, %v2942_v4  ;;  %3185 = vperm.xlu1 %4393, %v4823_v59   ;;  %v2937_v56 = vpop.permute.xlu0 %2936  ;;  %v3017_v5 = vmul.f32 %v3860_v36, %v8339_v38  ;;  %v2534_v59 = vmul.f32 %v8340_v11, %v2342_v58  ;;  %v2792_v4 = vadd.f32 %v2760_v63, %v2535_v13  ;;  %v8345_v36 = vld [vmem:[#allocation83_spill] sm:$0xff]  ;;  %v8348_v13 = vld [vmem:[#allocation82_spill] sm:$0xff] }
 0x3c0   :  { %v3022_v47 = vmul.f32 %v3865_v35, %v2937_v56  ;;  %3444 = vrot.lane.b32.xlu0 %v8334_v1, %s4844_s27  ;;  %v3859_v1 = vld [vmem:[%s7795_s0 + $0x260] sm:$0xff]  ;;  %v8341_v35 = vld [vmem:[#allocation57_spill] sm:$0xff]  ;;  %v2290_v3 = vadd.f32 %v7056_v39, %v2258_v14  ;;  %v3836_v11 = vld [vmem:[%s7795_s0 + $0x1a8] sm:$0xff] }
 0x3c1   :  { %v7266_v45 = vadd.f32 %v3023_v50, %v2798_v48  ;;  %v2791_v25 = vadd.f32 %v2759_v62, %v2534_v59  ;;  %v8349_v33 = vld [vmem:[#allocation2_spill] sm:$0xff] }
 0x3c2   :  { %v3331_v34 = vpop.permute.xlu1 %3330  ;;  %v7280_v26 = vadd.f32 %v3022_v47, %v2797_v43  ;;  %v3016_v43 = vmul.f32 %v3859_v1, %v8341_v35  ;;  %v8343_v47 = vld [vmem:[#allocation59_spill] sm:$0xff]  ;;  %4828 = vrcp.f32 %v8349_v33  ;;  %v8352_v59 = vld [vmem:[#allocation86_spill] sm:$0xff]  ;;  %v8353_v35 = vld [vmem:[#allocation40_spill] sm:$0xff] }
 0x3c3   :  { %2519 = vperm.xlu1 %4393, %v8336_v6   ;;  %v3329_v16 = vpop.permute.xlu0 %3328  ;;  %v3504_v18 = vsel %vm3484_vm2, %v6643_v20, %v3331_v34  ;;  %v3498_v20 = vsel %vm3484_vm2, %v8344_v57, %v8343_v47  ;;  %v3049_v34 = vadd.f32 %v3017_v5, %v2792_v4  ;;  %v8350_v5 = vld [vmem:[#allocation85_spill] sm:$0xff]  ;;  %4830 = vrcp.f32 %v2290_v3  ;;  %v8354_v47 = vld [vmem:[#allocation84_spill] sm:$0xff] }
 0x3c4   :  { %3180 = vperm.xlu0 %4392, %v4825_v10   ;;  %v3503_v15 = vsel %vm3484_vm2, %v6650_v41, %v3329_v16  ;;  %v3531_v63 = vsel %vm3517_vm3, %v3498_v20, %v7003_v9  ;;  %v8347_v41 = vld [vmem:[#allocation23_spill] sm:$0xff]  ;;  %v3048_v31 = vadd.f32 %v3016_v43, %v2791_v25  ;;  %v4827_v4 = vpop.eup %4826  ;;  %v2350_v43 = vld [vmem:[%s7795_s0 + $0xa0] sm:$0xff]  ;;  %v3830_v33 = vld [vmem:[%s7795_s0 + $0x178] sm:$0xff] }
 0x3c5   :  { %v3497_v58 = vsel %vm3484_vm2, %v8347_v41, %v8346_v52  ;;  %v3868_v20 = vld [vmem:[%s7795_s0 + $0x2a8] sm:$0xff]  ;;  %v8355_v52 = vld [vmem:[#allocation80_spill] sm:$0xff] }
 0x3c6   :  { %v3427_v48 = vpop.permute.xlu1 %3426  ;;  %v3530_v62 = vsel %vm3517_vm3, %v3497_v58, %v7012_v24  ;;  %v8351_v24 = vld [vmem:[#allocation42_spill] sm:$0xff] }
 0x3c7   :  { %v7300_v50 = vsel %vm3517_vm3, %v3504_v18, %v3427_v48  ;;  %2744 = vperm.xlu1 %4393, %v8342_v42   ;;  %v3425_v56 = vpop.permute.xlu0 %3424  ;;  %4832 = vrcp.f32 %v8351_v24  ;;  %v2351_v18 = vld [vmem:[%s7795_s0 + $0xa8] sm:$0xff]  ;;  %v3867_v58 = vld [vmem:[%s7795_s0 + $0x2a0] sm:$0xff]  ;;  %v3829_v24 = vld [vmem:[%s7795_s0 + $0x170] sm:$0xff] }
 0x3c8   :  { %v7309_v2 = vsel %vm3517_vm3, %v3503_v15, %v3425_v56  ;;  %2514 = vperm.xlu0 %4392, %v8345_v36   ;;  %4834 = vrcp.f32 %v8353_v35  ;;  %v3835_v15 = vld [vmem:[%s7795_s0 + $0x1a0] sm:$0xff] }
 0x3c9   :  { %4836 = vrcp.f32 %v8354_v47 }
 0x3ca   :  { %v3136_v10 = vpop.permute.xlu1 %3135  ;;  %4838 = vrcp.f32 %v8355_v52 }
 0x3cb   :  { %v3241_v1 = vmul.f32 %v3136_v10, %v3049_v34  ;;  %v3563_v16 = vmul.f32 %v3531_v63, %v3136_v10  ;;  %3001 = vperm.xlu1 %4393, %v8348_v13   ;;  %v3131_v38 = vpop.permute.xlu0 %3130 }
 0x3cc   :  { %v3240_v9 = vmul.f32 %v3131_v38, %v3048_v31  ;;  %v3562_v39 = vmul.f32 %v3530_v62, %v3131_v38  ;;  %2739 = vperm.xlu0 %4392, %v8350_v5   ;;  %v4829_v10 = vpop.eup %4828 }
 0x3cd   :  { %3273 = vst.msk [vmem:[%s7797_s3 + $0x68] sm:$0xff] %vm116_vm0, %v3241_v1  ;;  %v4831_v31 = vpop.eup %4830 }
 0x3ce   :  { %3596 = vst.msk [vmem:[%s7798_s4 + $0x68] sm:$0xff] %vm3582_vm4, %v3563_v16  ;;  %v2470_v14 = vpop.permute.xlu1 %2469  ;;  %3595 = vst.msk [vmem:[%s7798_s4 + $0x60] sm:$0xff] %vm3582_vm4, %v3562_v39 }
 0x3cf   :  { %3272 = vst.msk [vmem:[%s7797_s3 + $0x60] sm:$0xff] %vm116_vm0, %v3240_v9  ;;  %3354 = vrot.lane.b32.xlu1 %v8342_v42, %s4843_s26  ;;  %v2465_v48 = vpop.permute.xlu0 %2464  ;;  %v2543_v56 = vmul.f32 %v2470_v14, %v2351_v18  ;;  %v2345_v14 = vld [vmem:[%s7795_s0 + $0x78] sm:$0xff] }
 0x3d0   :  { %2996 = vperm.xlu0 %4392, %v8352_v59   ;;  %v2542_v34 = vmul.f32 %v2465_v48, %v2350_v43  ;;  %v3862_v18 = vld [vmem:[%s7795_s0 + $0x278] sm:$0xff]  ;;  %v2344_v43 = vld [vmem:[%s7795_s0 + $0x70] sm:$0xff] }
 0x3d1   :  { %v4833_v39 = vpop.eup %4832  ;;  %v3019_v47 = vmul.f32 %v3862_v18, %v7069_v21 }
 0x3d2   :  { %v2695_v42 = vpop.permute.xlu1 %2694  ;;  %v4835_v35 = vpop.eup %4834 }
 0x3d3   :  { %v2768_v25 = vmul.f32 %v3836_v11, %v2695_v42  ;;  %3195 = vperm.xlu1 %4393, %v4827_v4   ;;  %v2690_v57 = vpop.permute.xlu0 %2689  ;;  %v2762_v11 = vmul.f32 %v3830_v33, %v7061_v54  ;;  %v3861_v42 = vld [vmem:[%s7795_s0 + $0x270] sm:$0xff]  ;;  %v4837_v54 = vpop.eup %4836 }
 0x3d4   :  { %v2767_v63 = vmul.f32 %v3835_v15, %v2690_v57  ;;  %3352 = vrot.lane.b32.xlu0 %v8350_v5, %s4843_s26  ;;  %v8356_v5 = vld [vmem:[#allocation87_spill] sm:$0xff] }
 0x3d5   :  { %v2800_v3 = vadd.f32 %v2768_v25, %v2543_v56  ;;  %4840 = vrcp.f32 %v8356_v5  ;;  %v2537_v56 = vmul.f32 %v7045_v44, %v2345_v14  ;;  %v2761_v25 = vmul.f32 %v3829_v24, %v7065_v60  ;;  %v4839_v44 = vpop.eup %4838  ;;  %v8362_v5 = vld [vmem:[#allocation52_spill] sm:$0xff] }
 0x3d6   :  { %v2952_v41 = vpop.permute.xlu1 %2951  ;;  %v2799_v1 = vadd.f32 %v2767_v63, %v2542_v34  ;;  %v8357_v34 = vld [vmem:[#allocation68_spill] sm:$0xff] }
 0x3d7   :  { %v3025_v16 = vmul.f32 %v3868_v20, %v2952_v41  ;;  %3205 = vperm.xlu1 %4393, %v4829_v10   ;;  %v2947_v62 = vpop.permute.xlu0 %2946  ;;  %v2794_v63 = vadd.f32 %v2762_v11, %v2537_v56  ;;  %v8358_v10 = vld [vmem:[#allocation8_spill] sm:$0xff] }
 0x3d8   :  { %v3024_v9 = vmul.f32 %v3867_v58, %v2947_v62  ;;  %3190 = vperm.xlu0 %4392, %v4831_v31   ;;  %v3018_v52 = vmul.f32 %v3861_v42, %v8358_v10  ;;  %v2352_v56 = vld [vmem:[%s7795_s0 + $0xb0] sm:$0xff] }
 0x3d9   :  { %v7369_v38 = vadd.f32 %v3025_v16, %v2800_v3  ;;  %v2536_v3 = vmul.f32 %v8357_v34, %v2344_v43  ;;  %v8360_v16 = vld [vmem:[#allocation24_spill] sm:$0xff]  ;;  %v3051_v33 = vadd.f32 %v3019_v47, %v2794_v63 }
 0x3da   :  { %v3335_v48 = vpop.permute.xlu1 %3334  ;;  %v7382_v4 = vadd.f32 %v3024_v9, %v2799_v1  ;;  %v8359_v1 = vld [vmem:[#allocation69_spill] sm:$0xff]  ;;  %v3869_v10 = vld [vmem:[%s7795_s0 + $0x2b0] sm:$0xff] }
 0x3db   :  { %3215 = vperm.xlu1 %4393, %v4833_v39   ;;  %v3333_v15 = vpop.permute.xlu0 %3332  ;;  %v3506_v57 = vsel %vm3484_vm2, %v6759_v12, %v3335_v48  ;;  %v2793_v58 = vadd.f32 %v2761_v25, %v2536_v3  ;;  %v3500_v12 = vsel %vm3484_vm2, %v8360_v16, %v8359_v1  ;;  %v8361_v39 = vld [vmem:[#allocation29_spill] sm:$0xff]  ;;  %v2347_v16 = vld [vmem:[%s7795_s0 + $0x88] sm:$0xff] }
 0x3dc   :  { %3200 = vperm.xlu0 %4392, %v4835_v35   ;;  %v3505_v60 = vsel %vm3484_vm2, %v6767_v28, %v3333_v15  ;;  %v3533_v62 = vsel %vm3517_vm3, %v3500_v12, %v7103_v51  ;;  %v3499_v14 = vsel %vm3484_vm2, %v8362_v5, %v8361_v39  ;;  %v3838_v15 = vld [vmem:[%s7795_s0 + $0x1b8] sm:$0xff]  ;;  %v3831_v12 = vld [vmem:[%s7795_s0 + $0x180] sm:$0xff] }
 0x3dd   :  { %v3050_v18 = vadd.f32 %v3018_v52, %v2793_v58  ;;  %v3532_v11 = vsel %vm3517_vm3, %v3499_v14, %v7110_v37  ;;  %v2353_v37 = vld [vmem:[%s7795_s0 + $0xb8] sm:$0xff]  ;;  %v2346_v5 = vld [vmem:[%s7795_s0 + $0x80] sm:$0xff] }
 0x3de   :  { %v3431_v20 = vpop.permute.xlu1 %3430  ;;  %v3863_v14 = vld [vmem:[%s7795_s0 + $0x280] sm:$0xff] }
 0x3df   :  { %v7398_v41 = vsel %vm3517_vm3, %v3506_v57, %v3431_v20  ;;  %3225 = vperm.xlu1 %4393, %v4837_v54   ;;  %v3429_v21 = vpop.permute.xlu0 %3428  ;;  %v4841_v48 = vpop.eup %4840  ;;  %v3870_v20 = vld [vmem:[%s7795_s0 + $0x2b8] sm:$0xff] }
 0x3e0   :  { %v7406_v31 = vsel %vm3517_vm3, %v3505_v60, %v3429_v21  ;;  %3210 = vperm.xlu0 %4392, %v4839_v44   ;;  %v3832_v60 = vld [vmem:[%s7795_s0 + $0x188] sm:$0xff] }
 0x3e2   :  { %v3146_v9 = vpop.permute.xlu1 %3145 }
 0x3e3   :  { %v3243_v28 = vmul.f32 %v3146_v9, %v3051_v33  ;;  %v3565_v24 = vmul.f32 %v3533_v62, %v3146_v9  ;;  %3446 = vrot.lane.b32.xlu1 %v8333_v30, %s4844_s27  ;;  %v3141_v35 = vpop.permute.xlu0 %3140  ;;  %v3864_v33 = vld [vmem:[%s7795_s0 + $0x288] sm:$0xff]  ;;  %v2764_v9 = vmul.f32 %v3832_v60, %v7151_v49 }
 0x3e4   :  { %v3242_v51 = vmul.f32 %v3141_v35, %v3050_v18  ;;  %v3564_v43 = vmul.f32 %v3532_v11, %v3141_v35  ;;  %3220 = vperm.xlu0 %4392, %v4841_v48   ;;  %v2763_v18 = vmul.f32 %v3831_v12, %v7155_v29  ;;  %v3021_v48 = vmul.f32 %v3864_v33, %v7159_v17 }
 0x3e5   :  { %3275 = vst.msk [vmem:[%s7797_s3 + $0x78] sm:$0xff] %vm116_vm0, %v3243_v28  ;;  %v2538_v35 = vmul.f32 %v7148_v22, %v2346_v5 }
 0x3e6   :  { %3598 = vst.msk [vmem:[%s7798_s4 + $0x78] sm:$0xff] %vm3582_vm4, %v3565_v24  ;;  %v2480_v42 = vpop.permute.xlu1 %2479  ;;  %3597 = vst.msk [vmem:[%s7798_s4 + $0x70] sm:$0xff] %vm3582_vm4, %v3564_v43  ;;  %v2539_v24 = vmul.f32 %v7137_v23, %v2347_v16  ;;  %v3020_v43 = vmul.f32 %v3863_v14, %v7166_v27 }
 0x3e7   :  { %3274 = vst.msk [vmem:[%s7797_s3 + $0x70] sm:$0xff] %vm116_vm0, %v3242_v51  ;;  %3450 = vrot.lane.b32.xlu1 %v8348_v13, %s4844_s27  ;;  %v2475_v30 = vpop.permute.xlu0 %2474  ;;  %v3837_v13 = vld [vmem:[%s7795_s0 + $0x1b0] sm:$0xff]  ;;  %v2545_v47 = vmul.f32 %v2480_v42, %v2353_v37 }
 0x3e8   :  { %3448 = vrot.lane.b32.xlu0 %v8352_v59, %s4844_s27  ;;  %v2544_v34 = vmul.f32 %v2475_v30, %v2352_v56  ;;  %v2796_v51 = vadd.f32 %v2764_v9, %v2539_v24  ;;  %v2795_v30 = vadd.f32 %v2763_v18, %v2538_v35 }
 0x3ea   :  { %v2705_v25 = vpop.permute.xlu1 %2704  ;;  %v3053_v29 = vadd.f32 %v3021_v48, %v2796_v51 }
 0x3eb   :  { %v2770_v54 = vmul.f32 %v3838_v15, %v2705_v25  ;;  %v2700_v57 = vpop.permute.xlu0 %2699 }
 0x3ec   :  { %v2769_v63 = vmul.f32 %v3837_v13, %v2700_v57 }
 0x3ed   :  { %v2802_v3 = vadd.f32 %v2770_v54, %v2545_v47  ;;  %v2354_v54 = vld [vmem:[%s7795_s0 + $0xc0] sm:$0xff] }
 0x3ee   :  { %v2962_v59 = vpop.permute.xlu1 %2961  ;;  %v2801_v52 = vadd.f32 %v2769_v63, %v2544_v34 }
 0x3ef   :  { %v3027_v44 = vmul.f32 %v3870_v20, %v2962_v59  ;;  %v2957_v21 = vpop.permute.xlu0 %2956  ;;  %v3839_v20 = vld [vmem:[%s7795_s0 + $0x1c0] sm:$0xff]  ;;  %v3872_v59 = vld [vmem:[%s7795_s0 + $0x2c8] sm:$0xff] }
 0x3f0   :  { %v3026_v1 = vmul.f32 %v3869_v10, %v2957_v21  ;;  %v3871_v21 = vld [vmem:[%s7795_s0 + $0x2c0] sm:$0xff] }
 0x3f1   :  { %v7458_v58 = vadd.f32 %v3027_v44, %v2802_v3 }
 0x3f2   :  { %v3339_v62 = vpop.permute.xlu1 %3338  ;;  %v7470_v39 = vadd.f32 %v3026_v1, %v2801_v52 }
 0x3f3   :  { %v3337_v28 = vpop.permute.xlu0 %3336  ;;  %v3508_v49 = vsel %vm3484_vm2, %v6881_v19, %v3339_v62  ;;  %v3052_v19 = vadd.f32 %v3020_v43, %v2795_v30 }
 0x3f4   :  { %v3507_v37 = vsel %vm3484_vm2, %v6888_v0, %v3337_v28 }
 0x3f6   :  { %v3435_v11 = vpop.permute.xlu1 %3434 }
 0x3f7   :  { %v7486_v42 = vsel %vm3517_vm3, %v3508_v49, %v3435_v11  ;;  %v3433_v23 = vpop.permute.xlu0 %3432 }
 0x3f8   :  { %v7491_v17 = vsel %vm3517_vm3, %v3507_v37, %v3433_v23 }
 0x3fa   :  { %v3156_v15 = vpop.permute.xlu1 %3155 }
 0x3fb   :  { %v3245_v56 = vmul.f32 %v3156_v15, %v3053_v29  ;;  %v3567_v22 = vmul.f32 %v7196_v55, %v3156_v15  ;;  %v3151_v25 = vpop.permute.xlu0 %3150  ;;  %v2355_v55 = vld [vmem:[%s7795_s0 + $0xc8] sm:$0xff] }
 0x3fc   :  { %v3244_v0 = vmul.f32 %v3151_v25, %v3052_v19  ;;  %v3566_v27 = vmul.f32 %v7206_v53, %v3151_v25  ;;  %v3840_v53 = vld [vmem:[%s7795_s0 + $0x1c8] sm:$0xff] }
 0x3fd   :  { %3277 = vst.msk [vmem:[%s7797_s3 + $0x88] sm:$0xff] %vm116_vm0, %v3245_v56 }
 0x3fe   :  { %3600 = vst.msk [vmem:[%s7798_s4 + $0x88] sm:$0xff] %vm3582_vm4, %v3567_v22  ;;  %v2490_v13 = vpop.permute.xlu1 %2489  ;;  %3599 = vst.msk [vmem:[%s7798_s4 + $0x80] sm:$0xff] %vm3582_vm4, %v3566_v27 }
 0x3ff   :  { %3276 = vst.msk [vmem:[%s7797_s3 + $0x80] sm:$0xff] %vm116_vm0, %v3244_v0  ;;  %v2485_v47 = vpop.permute.xlu0 %2484  ;;  %v2547_v34 = vmul.f32 %v2490_v13, %v2355_v55 }
 0x400   :  { %v2546_v10 = vmul.f32 %v2485_v47, %v2354_v54 }
 0x402   :  { %v2715_v57 = vpop.permute.xlu1 %2714 }
 0x403   :  { %v2772_v3 = vmul.f32 %v3840_v53, %v2715_v57  ;;  %v2710_v63 = vpop.permute.xlu0 %2709 }
 0x404   :  { %v2771_v44 = vmul.f32 %v3839_v20, %v2710_v63 }
 0x405   :  { %v2804_v52 = vadd.f32 %v2772_v3, %v2547_v34 }
 0x406   :  { %v2972_v60 = vpop.permute.xlu1 %2971  ;;  %v2803_v1 = vadd.f32 %v2771_v44, %v2546_v10 }
 0x407   :  { %v3029_v16 = vmul.f32 %v3872_v59, %v2972_v60  ;;  %v2967_v12 = vpop.permute.xlu0 %2966 }
 0x408   :  { %v3028_v62 = vmul.f32 %v3871_v21, %v2967_v12 }
 0x409   :  { %v7529_v33 = vadd.f32 %v3029_v16, %v2804_v52 }
 0x40a   :  { %v3343_v9 = vpop.permute.xlu1 %3342  ;;  %v7531_v5 = vadd.f32 %v3028_v62, %v2803_v1  ;;  %v3874_v1 = vld [vmem:[%s7795_s0 + $0x2d8] sm:$0xff]  ;;  %v3844_v62 = vld [vmem:[%s7795_s0 + $0x1e8] sm:$0xff] }
 0x40b   :  { %v3341_v14 = vpop.permute.xlu0 %3340  ;;  %v3510_v28 = vsel %vm3484_vm2, %v7001_v8, %v3343_v9 }
 0x40c   :  { %v3509_v48 = vsel %vm3484_vm2, %v7008_v46, %v3341_v14 }
 0x40e   :  { %v3439_v24 = vpop.permute.xlu1 %3438 }
 0x40f   :  { %v7536_v18 = vsel %vm3517_vm3, %v3510_v28, %v3439_v24  ;;  %v3437_v49 = vpop.permute.xlu0 %3436  ;;  %v3841_v28 = vld [vmem:[%s7795_s0 + $0x1d0] sm:$0xff] }
 0x410   :  { %v7541_v11 = vsel %vm3517_vm3, %v3509_v48, %v3437_v49  ;;  %v2359_v48 = vld [vmem:[%s7795_s0 + $0xe8] sm:$0xff] }
 0x411   :  { %v3876_v49 = vld [vmem:[%s7795_s0 + $0x2e8] sm:$0xff] }
 0x412   :  { %v3166_v35 = vpop.permute.xlu1 %3165 }
 0x413   :  { %v3247_v51 = vmul.f32 %v3166_v35, %v7266_v45  ;;  %v3569_v43 = vmul.f32 %v7300_v50, %v3166_v35  ;;  %v3161_v37 = vpop.permute.xlu0 %3160 }
 0x414   :  { %v3246_v46 = vmul.f32 %v3161_v37, %v7280_v26  ;;  %v3568_v8 = vmul.f32 %v7309_v2, %v3161_v37 }
 0x415   :  { %3279 = vst.msk [vmem:[%s7797_s3 + $0x98] sm:$0xff] %vm116_vm0, %v3247_v51 }
 0x416   :  { %3602 = vst.msk [vmem:[%s7798_s4 + $0x98] sm:$0xff] %vm3582_vm4, %v3569_v43  ;;  %v2500_v23 = vpop.permute.xlu1 %2499  ;;  %3601 = vst.msk [vmem:[%s7798_s4 + $0x90] sm:$0xff] %vm3582_vm4, %v3568_v8  ;;  %v2356_v43 = vld [vmem:[%s7795_s0 + $0xd0] sm:$0xff] }
 0x417   :  { %3278 = vst.msk [vmem:[%s7797_s3 + $0x90] sm:$0xff] %vm116_vm0, %v3246_v46  ;;  %v7563_v45 = vpop.permute.xlu0 %2494 }
 0x41a   :  { %v2725_v50 = vpop.permute.xlu1 %2724 }
 0x41b   :  { %v2720_v30 = vpop.permute.xlu0 %2719 }
 0x41e   :  { %v2982_v29 = vpop.permute.xlu1 %2981 }
 0x41f   :  { %v7565_v15 = vpop.permute.xlu0 %2976  ;;  %v3031_v24 = vmul.f32 %v3874_v1, %v2982_v29 }
 0x422   :  { %v7567_v26 = vpop.permute.xlu1 %3346 }
 0x423   :  { %v7569_v2 = vpop.permute.xlu0 %3344 }
 0x426   :  { %v7571_v19 = vpop.permute.xlu1 %3442 }
 0x427   :  { %v7573_v56 = vpop.permute.xlu0 %3440 }
 0x42a   :  { %v3176_v22 = vpop.permute.xlu1 %3175 }
 0x42b   :  { %v3249_v25 = vmul.f32 %v3176_v22, %v7369_v38  ;;  %v3571_v0 = vmul.f32 %v7398_v41, %v3176_v22  ;;  %v3171_v27 = vpop.permute.xlu0 %3170 }
 0x42c   :  { %v3248_v13 = vmul.f32 %v3171_v27, %v7382_v4  ;;  %v3570_v55 = vmul.f32 %v7406_v31, %v3171_v27 }
 0x42d   :  { %3281 = vst.msk [vmem:[%s7797_s3 + $0xa8] sm:$0xff] %vm116_vm0, %v3249_v25  ;;  %v3846_v25 = vld [vmem:[%s7795_s0 + $0x1f8] sm:$0xff] }
 0x42e   :  { %3604 = vst.msk [vmem:[%s7798_s4 + $0xa8] sm:$0xff] %vm3582_vm4, %v3571_v0  ;;  %v2510_v47 = vpop.permute.xlu1 %2509  ;;  %3603 = vst.msk [vmem:[%s7798_s4 + $0xa0] sm:$0xff] %vm3582_vm4, %v3570_v55  ;;  %v3878_v55 = vld [vmem:[%s7795_s0 + $0x2f8] sm:$0xff] }
 0x42f   :  { %3280 = vst.msk [vmem:[%s7797_s3 + $0xa0] sm:$0xff] %vm116_vm0, %v3248_v13  ;;  %v7595_v38 = vpop.permute.xlu0 %2504  ;;  %v2551_v29 = vmul.f32 %v2510_v47, %v2359_v48 }
 0x432   :  { %v2735_v41 = vpop.permute.xlu1 %2734 }
 0x433   :  { %v7597_v53 = vpop.permute.xlu0 %2729  ;;  %v2776_v35 = vmul.f32 %v3844_v62, %v2735_v41  ;;  %v3511_v62 = vsel %vm3484_vm2, %v8321_v40, %v7569_v2  ;;  %v2360_v40 = vld [vmem:[%s7795_s0 + $0xf0] sm:$0xff] }
 0x434   :  { %v3877_v2 = vld [vmem:[%s7795_s0 + $0x2f0] sm:$0xff] }
 0x436   :  { %v2992_v54 = vpop.permute.xlu1 %2991 }
 0x437   :  { %v7599_v4 = vpop.permute.xlu0 %2986  ;;  %v3033_v22 = vmul.f32 %v3876_v49, %v2992_v54  ;;  %v2358_v54 = vld [vmem:[%s7795_s0 + $0xe0] sm:$0xff] }
 0x43a   :  { %v7601_v31 = vpop.permute.xlu1 %3350 }
 0x43b   :  { %v7603_v57 = vpop.permute.xlu0 %3348 }
 0x43e   :  { %v3186_v20 = vpop.permute.xlu1 %3185 }
 0x43f   :  { %v3251_v34 = vmul.f32 %v3186_v20, %v7458_v58  ;;  %v3573_v3 = vmul.f32 %v7486_v42, %v3186_v20  ;;  %v7607_v63 = vpop.permute.xlu0 %3444 }
 0x441   :  { %3283 = vst.msk [vmem:[%s7797_s3 + $0xb8] sm:$0xff] %vm116_vm0, %v3251_v34 }
 0x442   :  { %3606 = vst.msk [vmem:[%s7798_s4 + $0xb8] sm:$0xff] %vm3582_vm4, %v3573_v3  ;;  %v2520_v59 = vpop.permute.xlu1 %2519 }
 0x443   :  { %v3181_v10 = vpop.permute.xlu0 %3180 }
 0x444   :  { %v3250_v52 = vmul.f32 %v3181_v10, %v7470_v39  ;;  %v3572_v58 = vmul.f32 %v7491_v17, %v3181_v10  ;;  %v3842_v39 = vld [vmem:[%s7795_s0 + $0x1d8] sm:$0xff] }
 0x445   :  { %v2357_v17 = vld [vmem:[%s7795_s0 + $0xd8] sm:$0xff]  ;;  %v2774_v12 = vmul.f32 %v3842_v39, %v2725_v50  ;;  %v3873_v50 = vld [vmem:[%s7795_s0 + $0x2d0] sm:$0xff] }
 0x446   :  { %v2745_v44 = vpop.permute.xlu1 %2744  ;;  %3282 = vst.msk [vmem:[%s7797_s3 + $0xb0] sm:$0xff] %vm116_vm0, %v3250_v52  ;;  %v2549_v14 = vmul.f32 %v2500_v23, %v2357_v17  ;;  %v2773_v23 = vmul.f32 %v3841_v28, %v2720_v30  ;;  %v2548_v30 = vmul.f32 %v7563_v45, %v2356_v43  ;;  %v3030_v41 = vmul.f32 %v3873_v50, %v7565_v15  ;;  %v3875_v45 = vld [vmem:[%s7795_s0 + $0x2e0] sm:$0xff] }
 0x447   :  { %3605 = vst.msk [vmem:[%s7798_s4 + $0xb0] sm:$0xff] %vm3582_vm4, %v3572_v58  ;;  %v7627_v42 = vpop.permute.xlu0 %2514  ;;  %v3032_v1 = vmul.f32 %v3875_v45, %v7599_v4 }
 0x448   :  { %v2806_v37 = vadd.f32 %v2774_v12, %v2549_v14  ;;  %v2805_v3 = vadd.f32 %v2773_v23, %v2548_v30  ;;  %v2552_v43 = vmul.f32 %v7627_v42, %v2360_v40 }
 0x44a   :  { %v3002_v60 = vpop.permute.xlu1 %3001  ;;  %v3063_v27 = vadd.f32 %v3031_v24, %v2806_v37  ;;  %v3062_v12 = vadd.f32 %v3030_v41, %v2805_v3 }
 0x44b   :  { %v7632_v21 = vpop.permute.xlu0 %2739  ;;  %v3035_v17 = vmul.f32 %v3878_v55, %v3002_v60 }
 0x44e   :  { %v7640_v16 = vpop.permute.xlu1 %3354 }
 0x44f   :  { %v7645_v9 = vpop.permute.xlu0 %2996 }
 0x450   :  { %v3034_v37 = vmul.f32 %v3877_v2, %v7645_v9  ;;  %v3514_v9 = vsel %vm3484_vm2, %v8327_v61, %v7601_v31  ;;  %v3516_v61 = vsel %vm3484_vm2, %v8336_v6, %v7640_v16 }
 0x452   :  { %v3196_v51 = vpop.permute.xlu1 %3195 }
 0x453   :  { %v3253_v46 = vmul.f32 %v3196_v51, %v7529_v33  ;;  %v3575_v8 = vmul.f32 %v7536_v18, %v3196_v51  ;;  %v7667_v0 = vpop.permute.xlu0 %3352  ;;  %v3512_v33 = vsel %vm3484_vm2, %v8319_v32, %v7567_v26  ;;  %v3843_v18 = vld [vmem:[%s7795_s0 + $0x1e0] sm:$0xff]  ;;  %v2808_v32 = vadd.f32 %v2776_v35, %v2551_v29  ;;  %v2361_v26 = vld [vmem:[%s7795_s0 + $0xf8] sm:$0xff] }
 0x454   :  { %v3545_v13 = vsel %vm3517_vm3, %v3512_v33, %v7571_v19  ;;  %v2778_v19 = vmul.f32 %v3846_v25, %v2745_v44  ;;  %v2775_v10 = vmul.f32 %v3843_v18, %v7597_v53  ;;  %v2553_v39 = vmul.f32 %v2520_v59, %v2361_v26  ;;  %v3845_v59 = vld [vmem:[%s7795_s0 + $0x1f0] sm:$0xff] }
 0x455   :  { %3285 = vst.msk [vmem:[%s7797_s3 + $0xc8] sm:$0xff] %vm116_vm0, %v3253_v46  ;;  %v3065_v52 = vadd.f32 %v3033_v22, %v2808_v32  ;;  %v2550_v53 = vmul.f32 %v7595_v38, %v2358_v54  ;;  %v2777_v24 = vmul.f32 %v3845_v59, %v7632_v21  ;;  %v3513_v51 = vsel %vm3484_vm2, %v8329_v7, %v7603_v57 }
 0x456   :  { %3608 = vst.msk [vmem:[%s7798_s4 + $0xc8] sm:$0xff] %vm3582_vm4, %v3575_v8  ;;  %v3206_v47 = vpop.permute.xlu1 %3205  ;;  %v2810_v14 = vadd.f32 %v2778_v19, %v2553_v39  ;;  %v3546_v46 = vsel %vm3517_vm3, %v3513_v51, %v7607_v63  ;;  %v3515_v33 = vsel %vm3484_vm2, %v8345_v36, %v7667_v0 }
 0x457   :  { %v3255_v20 = vmul.f32 %v3206_v47, %v3063_v27  ;;  %v3577_v34 = vmul.f32 %v3545_v13, %v3206_v47  ;;  %v3191_v58 = vpop.permute.xlu0 %3190  ;;  %v2807_v38 = vadd.f32 %v2775_v10, %v2550_v53  ;;  %v2809_v7 = vadd.f32 %v2777_v24, %v2552_v43 }
 0x458   :  { %v3252_v15 = vmul.f32 %v3191_v58, %v7531_v5  ;;  %v3574_v44 = vmul.f32 %v7541_v11, %v3191_v58  ;;  %v3544_v11 = vsel %vm3517_vm3, %v3511_v62, %v7573_v56  ;;  %v3067_v28 = vadd.f32 %v3035_v17, %v2810_v14 }
 0x459   :  { %3287 = vst.msk [vmem:[%s7797_s3 + $0xd8] sm:$0xff] %vm116_vm0, %v3255_v20  ;;  %v3064_v49 = vadd.f32 %v3032_v1, %v2807_v38  ;;  %v3066_v50 = vadd.f32 %v3034_v37, %v2809_v7 }
 0x45a   :  { %3610 = vst.msk [vmem:[%s7798_s4 + $0xd8] sm:$0xff] %vm3582_vm4, %v3577_v34  ;;  %v3216_v60 = vpop.permute.xlu1 %3215  ;;  %3607 = vst.msk [vmem:[%s7798_s4 + $0xc0] sm:$0xff] %vm3582_vm4, %v3574_v44 }
 0x45b   :  { %3284 = vst.msk [vmem:[%s7797_s3 + $0xc0] sm:$0xff] %vm116_vm0, %v3252_v15  ;;  %v3257_v5 = vmul.f32 %v3216_v60, %v3065_v52  ;;  %v3201_v4 = vpop.permute.xlu0 %3200 }
 0x45c   :  { %v3254_v48 = vmul.f32 %v3201_v4, %v3062_v12  ;;  %v3576_v56 = vmul.f32 %v3544_v11, %v3201_v4 }
 0x45d   :  { %3289 = vst.msk [vmem:[%s7797_s3 + $0xe8] sm:$0xff] %vm116_vm0, %v3257_v5 }
 0x45e   :  { %v3226_v35 = vpop.permute.xlu1 %3225  ;;  %3286 = vst.msk [vmem:[%s7797_s3 + $0xd0] sm:$0xff] %vm116_vm0, %v3254_v48 }
 0x45f   :  { %3609 = vst.msk [vmem:[%s7798_s4 + $0xd0] sm:$0xff] %vm3582_vm4, %v3576_v56  ;;  %v3259_v21 = vmul.f32 %v3226_v35, %v3067_v28  ;;  %v3211_v8 = vpop.permute.xlu0 %3210 }
 0x460   :  { %v3256_v57 = vmul.f32 %v3211_v8, %v3064_v49  ;;  %v3578_v42 = vmul.f32 %v3546_v46, %v3211_v8 }
 0x461   :  { %3291 = vst.msk [vmem:[%s7797_s3 + $0xf8] sm:$0xff] %vm116_vm0, %v3259_v21 }
 0x462   :  { %v3447_v23 = vpop.permute.xlu1 %3446  ;;  %3288 = vst.msk [vmem:[%s7797_s3 + $0xe0] sm:$0xff] %vm116_vm0, %v3256_v57 }
 0x463   :  { %3611 = vst.msk [vmem:[%s7798_s4 + $0xe0] sm:$0xff] %vm3582_vm4, %v3578_v42  ;;  %v3547_v63 = vsel %vm3517_vm3, %v3514_v9, %v3447_v23  ;;  %v3221_v22 = vpop.permute.xlu0 %3220 }
 0x464   :  { %v3579_v29 = vmul.f32 %v3547_v63, %v3216_v60  ;;  %v3258_v25 = vmul.f32 %v3221_v22, %v3066_v50 }
 0x466   :  { %3612 = vst.msk [vmem:[%s7798_s4 + $0xe8] sm:$0xff] %vm3582_vm4, %v3579_v29  ;;  %v3451_v31 = vpop.permute.xlu1 %3450 }
 0x467   :  { %3290 = vst.msk [vmem:[%s7797_s3 + $0xf0] sm:$0xff] %vm116_vm0, %v3258_v25  ;;  %v3549_v27 = vsel %vm3517_vm3, %v3516_v61, %v3451_v31  ;;  %v3449_v30 = vpop.permute.xlu0 %3448 }
 0x468   :  { %v3581_v18 = vmul.f32 %v3549_v27, %v3226_v35  ;;  %v3548_v6 = vsel %vm3517_vm3, %v3515_v33, %v3449_v30 }
 0x469   :  { %v3580_v16 = vmul.f32 %v3548_v6, %v3221_v22 }
 0x46a   :  { %3614 = vst.msk [vmem:[%s7798_s4 + $0xf8] sm:$0xff] %vm3582_vm4, %v3581_v18 }
 0x46b   :  { %3613 = vst.msk [vmem:[%s7798_s4 + $0xf0] sm:$0xff] %vm3582_vm4, %v3580_v16 }

</bundles_post_ra>
